<compile_context>
chip_gen: v5e
topology: v5e:2x2
jax: 0.10.0
libtpu: 0.0.40
codegen_flags: <defaults>
</compile_context>

<pallas_src>
import functools

import jax
import jax.numpy as jnp
from jax.experimental import pallas as pl
from jax.experimental.pallas import tpu as pltpu


# ---------------------------------------------------------------------------
# Fused kernel: [pool-folded Linear + MaxMin] x depth_linear -> Linear head.
# MaxMin semantics (reference): pairs are adjacent features (y0,y1),(y2,y3),...
# and the output is concat([max(pair_i)...], [min(pair_i)...]).  Weights are
# pre-permuted (even output rows first, odd second) so the pairing becomes two
# contiguous 128-lane-aligned half slices; the two halves are then consumed by
# the next layer against a pre-split weight, so the reference feature order is
# reproduced without ever materializing the concatenation.
# ---------------------------------------------------------------------------
def _make_fused_kernel(n_lip):
    """Ref layout (in order), n_lip >= 1:
       x                                    (TB, K0)        bf16
       w0, b0                               (K0, C) bf16, (1, C) f32
       [w_top, w_bot, b] * (n_lip - 1)      (C/2, C) bf16 x2, (1, C) f32
       wh_top, wh_bot, bh                   (C/2, P) bf16 x2, (1, P) f32
       o                                    (TB, P)         f32
    """
    def kernel(*refs):
        x_ref = refs[0]
        idx = 1

        # Layer 0: channel-zero-pad + AvgPool2d(4,/4) + Flatten folded into w0.
        w0_ref, b0_ref = refs[idx], refs[idx + 1]
        idx += 2
        y = jnp.dot(x_ref[...], w0_ref[...],
                    preferred_element_type=jnp.float32) + b0_ref[...]
        h = y.shape[-1] // 2
        a, c = y[:, :h], y[:, h:]
        zmax = jnp.maximum(a, c).astype(jnp.bfloat16)     # MaxMin halves kept
        zmin = jnp.minimum(a, c).astype(jnp.bfloat16)     # separate (no concat)

        # Layers 1 .. n_lip-1: pre-split input weights (top = max half, bot = min half).
        for _ in range(n_lip - 1):
            wt_ref, wb_ref, b_ref = refs[idx], refs[idx + 1], refs[idx + 2]
            idx += 3
            y = (jnp.dot(zmax, wt_ref[...], preferred_element_type=jnp.float32)
                 + jnp.dot(zmin, wb_ref[...], preferred_element_type=jnp.float32)
                 + b_ref[...])
            h = y.shape[-1] // 2
            a, c = y[:, :h], y[:, h:]
            zmax = jnp.maximum(a, c).astype(jnp.bfloat16)
            zmin = jnp.minimum(a, c).astype(jnp.bfloat16)

        # Vanilla head (pre-split the same way); output lane-dense (padded to 128).
        wht_ref, whb_ref, bh_ref, o_ref = (refs[idx], refs[idx + 1],
                                           refs[idx + 2], refs[idx + 3])
        o_ref[...] = (jnp.dot(zmax, wht_ref[...], preferred_element_type=jnp.float32)
                      + jnp.dot(zmin, whb_ref[...], preferred_element_type=jnp.float32)
                      + bh_ref[...]).astype(o_ref.dtype)
    return kernel


# ---------------------------------------------------------------------------
# Parameter init (deterministic, nn.Linear-style uniform bounds) — PyTorch layout.
# ---------------------------------------------------------------------------
def init_params(key, num_channels, depth_linear, n_classes, imsize=32):
    in_feats = num_channels * (imsize // 4) * (imsize // 4)
    params = {"lin": [], "last": None}
    for _ in range(depth_linear):
        key, k1, k2 = jax.random.split(key, 3)
        bound = 1.0 / float(in_feats) ** 0.5
        w = jax.random.uniform(k1, (in_feats, in_feats), jnp.float32, -bound, bound)
        b = jax.random.uniform(k2, (in_feats,), jnp.float32, -bound, bound)
        params["lin"].append((w, b))
    key, k1, k2 = jax.random.split(key, 3)
    bound = 1.0 / float(in_feats) ** 0.5
    w = jax.random.uniform(k1, (n_classes, in_feats), jnp.float32, -bound, bound)
    b = jax.random.uniform(k2, (n_classes,), jnp.float32, -bound, bound)
    params["last"] = (w, b)
    return params


# ---------------------------------------------------------------------------
# One-time parameter preprocessing (hoisted out of the forward pass):
#   * fold zero-channel-pad + AvgPool2d(4, divisor_override=4) + Flatten into
#     the first LinearLipschitz weight (zero-padded channels dropped entirely),
#   * pre-permute each LinearLipschitz weight's OUTPUT rows to [even | odd],
#   * pre-transpose all weights to (in, out) layout and pre-split the input side
#     of every layer after the first (and of the head) into max/min halves,
#   * cast all weights to bf16 (biases stay f32), pad head outputs to 128 lanes.
# ---------------------------------------------------------------------------
def prepare_params(params, num_channels, in_chan=3, imsize=32):
    H = W = imsize
    Ho, Wo = H // 4, W // 4

    # pool[oh, ow, h, w] = 0.25 * [h//4 == oh] * [w//4 == ow]
    #   (AvgPool2d(4, divisor_override=4) == window_sum / 4)
    sel_h = (jnp.arange(H)[:, None] // 4 == jnp.arange(Ho)[None, :]).astype(jnp.float32)
    sel_w = (jnp.arange(W)[:, None] // 4 == jnp.arange(Wo)[None, :]).astype(jnp.float32)
    pool = 0.25 * jnp.einsum("ho,wp->ophw", sel_h, sel_w)          # (Ho, Wo, H, W)

    n_lip = len(params["lin"])
    assert n_lip >= 1, "this fused kernel assumes depth_linear >= 1"

    lin_args = []
    for li, (w, b) in enumerate(params["lin"]):
        cout = w.shape[0]
        perm = jnp.concatenate([jnp.arange(0, cout, 2), jnp.arange(1, cout, 2)])
        wp = w[perm]                     # permute OUTPUT rows only (MaxMin halves)
        bp = b[perm][None, :].astype(jnp.float32)
        if li == 0:
            # (cout, num_channels, Ho, Wo): drop zero-padded channels, contract pooling.
            wr = wp.reshape(cout, num_channels, Ho, Wo)[:, :in_chan]
            weff = jnp.einsum("ocij,ijhw->ochw", wr, pool).reshape(cout, in_chan * H * W)
            lin_args += [weff.T.astype(jnp.bfloat16), bp]          # (in_chan*H*W, cout)
        else:
            wt = wp.T                                              # (cin, cout)
            hh = wt.shape[0] // 2
            lin_args += [wt[:hh].astype(jnp.bfloat16),             # consumes max half
                         wt[hh:].astype(jnp.bfloat16),             # consumes min half
                         bp]

    wl, bl = params["last"]
    n_classes, cin = wl.shape
    cout_pad = ((n_classes + 127) // 128) * 128
    wh = jnp.zeros((cin, cout_pad), jnp.float32).at[:, :n_classes].set(wl.T)
    bh = jnp.zeros((1, cout_pad), jnp.float32).at[:, :n_classes].set(bl[None, :])
    hh = cin // 2
    head_args = [wh[:hh].astype(jnp.bfloat16), wh[hh:].astype(jnp.bfloat16), bh]

    return {"lin": lin_args, "head": head_args, "n_lip": n_lip,
            "n_classes": n_classes, "cout_pad": cout_pad}


# ---------------------------------------------------------------------------
# Batch-tile selection:
#   * tiny batches: round up to 8 sublanes (single full-array block),
#   * moderate/large batches: ~half the batch rounded to 16 (bf16 sublane pack),
#     capped at 512 rows (HBM-roofline sweet spot, well inside VMEM in bf16),
#     which yields >= 2 grid steps so "parallel" shards across v7x's two TCs.
# ---------------------------------------------------------------------------
def _choose_batch_tile(B):
    if B < 16:
        return ((B + 7) // 8) * 8
    half = (((B + 1) // 2) + 15) // 16 * 16
    return min(half, 512)


# ---------------------------------------------------------------------------
# Forward: one pallas_call, batch-tiled "parallel" grid, all weights resident.
# ---------------------------------------------------------------------------
def lipschitz_network_forward(prep, x):
    B = x.shape[0]
    # bf16 activation stream; pad/pool folded into W1 so only raw channels flow.
    x_flat = x.reshape(B, -1).astype(jnp.bfloat16)
    K0 = x_flat.shape[1]

    TB = _choose_batch_tile(B)
    Bp = ((B + TB - 1) // TB) * TB
    if Bp != B:
        x_flat = jnp.pad(x_flat, ((0, Bp - B), (0, 0)))

    args = [x_flat] + list(prep["lin"]) + list(prep["head"])
    in_specs = [pl.BlockSpec((TB, K0), lambda i: (i, 0))]
    for a in args[1:]:
        # Weights/biases: constant index_map -> fetched once, VMEM-resident.
        in_specs.append(pl.BlockSpec(a.shape, lambda i: (0, 0)))

    cout_pad = prep["cout_pad"]
    out = pl.pallas_call(
        _make_fused_kernel(prep["n_lip"]),
        out_shape=jax.ShapeDtypeStruct((Bp, cout_pad), jnp.float32),
        grid=(Bp // TB,),
        in_specs=in_specs,
        out_specs=pl.BlockSpec((TB, cout_pad), lambda i: (i, 0)),
        compiler_params=pltpu.CompilerParams(dimension_semantics=("parallel",)),
    )(*args)
    return out[:B, :prep["n_classes"]]


# ---------------------------------------------------------------------------
# Pure-JAX reference of the original module's forward (for a correctness check).
# ---------------------------------------------------------------------------
def reference_forward(params, x, num_channels):
    B, cin, H, W = x.shape
    xp = jnp.concatenate(
        [x, jnp.zeros((B, num_channels - cin, H, W), x.dtype)], axis=1)   # PaddingChannels
    xr = xp.reshape(B, num_channels, H // 4, 4, W // 4, 4)
    xpool = xr.sum(axis=(3, 5)) / 4.0                                     # divisor_override=4
    f = xpool.reshape(B, -1)                                              # Flatten (NCHW)
    for (w, b) in params["lin"]:                                          # LinearLipschitz
        y = f @ w.T + b
        h = y.shape[-1] // 2
        yp = y.reshape(B, h, 2)
        f = jnp.concatenate([yp.max(-1), yp.min(-1)], axis=-1)            # MaxMin
    w, b = params["last"]                                                 # vanilla head
    return f @ w.T + b


if __name__ == "__main__":
    B, num_channels, depth_linear, n_classes = 2, 4, 2, 10
    key = jax.random.PRNGKey(0)
    kx, kp = jax.random.split(key)
    # cifar10-style input: 3 channels, 32x32 (so flatten == num_channels*8*8 = 256)
    x = jax.random.normal(kx, (B, 3, 32, 32), jnp.float32)
    params = init_params(kp, num_channels, depth_linear, n_classes, imsize=32)
    prep = prepare_params(params, num_channels, in_chan=3, imsize=32)

    fwd = jax.jit(functools.partial(lipschitz_network_forward, prep))
    out = jax.block_until_ready(fwd(x))
    assert out.shape == (B, n_classes), out.shape

    ref = jax.block_until_ready(reference_forward(params, x, num_channels))
    max_err = float(jnp.max(jnp.abs(out - ref)))
    assert max_err < 5e-2, f"kernel vs reference mismatch: max abs err {max_err}"
    print("KERNEL_OK")
</pallas_src>

<mosaic_0001>
module attributes {stable_mosaic.version = 11 : i64} {
  func.func @kernel(%arg0: i32, %arg1: memref<8x3072xbf16, #tpu.memory_space<vmem>>, %arg2: memref<3072x256xbf16, #tpu.memory_space<vmem>>, %arg3: memref<1x256xf32, #tpu.memory_space<vmem>>, %arg4: memref<128x256xbf16, #tpu.memory_space<vmem>>, %arg5: memref<128x256xbf16, #tpu.memory_space<vmem>>, %arg6: memref<1x256xf32, #tpu.memory_space<vmem>>, %arg7: memref<128x128xbf16, #tpu.memory_space<vmem>>, %arg8: memref<128x128xbf16, #tpu.memory_space<vmem>>, %arg9: memref<1x128xf32, #tpu.memory_space<vmem>>, %arg10: memref<8x128xf32, #tpu.memory_space<vmem>>) attributes {dimension_semantics = [#tpu.dimension_semantics<parallel>], iteration_bounds = array<i64: 1>, scalar_prefetch = 0 : i64, scratch_operands = 0 : i64, tpu.core_type = #tpu.core_type<tc>, window_params = [{transform_indices = @transform_0, window_bounds = array<i64: 8, 3072>}, {pipeline_mode = #tpu.pipeline_mode<synchronous>, transform_indices = @transform_1, window_bounds = array<i64: 3072, 256>}, {pipeline_mode = #tpu.pipeline_mode<synchronous>, transform_indices = @transform_2, window_bounds = array<i64: 1, 256>}, {pipeline_mode = #tpu.pipeline_mode<synchronous>, transform_indices = @transform_3, window_bounds = array<i64: 128, 256>}, {pipeline_mode = #tpu.pipeline_mode<synchronous>, transform_indices = @transform_4, window_bounds = array<i64: 128, 256>}, {pipeline_mode = #tpu.pipeline_mode<synchronous>, transform_indices = @transform_5, window_bounds = array<i64: 1, 256>}, {pipeline_mode = #tpu.pipeline_mode<synchronous>, transform_indices = @transform_6, window_bounds = array<i64: 128, 128>}, {pipeline_mode = #tpu.pipeline_mode<synchronous>, transform_indices = @transform_7, window_bounds = array<i64: 128, 128>}, {pipeline_mode = #tpu.pipeline_mode<synchronous>, transform_indices = @transform_8, window_bounds = array<i64: 1, 128>}, {transform_indices = @transform_9, window_bounds = array<i64: 8, 128>}]} {
    %c0 = arith.constant 0 : index
    %c0_0 = arith.constant 0 : index
    %0 = vector.load %arg1[%c0, %c0_0] : memref<8x3072xbf16, #tpu.memory_space<vmem>>, vector<8x3072xbf16>
    %c0_1 = arith.constant 0 : index
    %c0_2 = arith.constant 0 : index
    %1 = vector.load %arg2[%c0_1, %c0_2] : memref<3072x256xbf16, #tpu.memory_space<vmem>>, vector<3072x256xbf16>
    %cst = arith.constant dense<0.000000e+00> : vector<8x256xf32>
    %2 = tpu.matmul %0, %1, %cst {dimension_numbers = #tpu.dot_dimension_numbers<[1], [0], [0], [1], [0, 0, 1, 1], [], []>} : vector<8x3072xbf16>, vector<3072x256xbf16>, vector<8x256xf32> -> vector<8x256xf32>
    %c0_3 = arith.constant 0 : index
    %c0_4 = arith.constant 0 : index
    %3 = vector.load %arg3[%c0_3, %c0_4] : memref<1x256xf32, #tpu.memory_space<vmem>>, vector<1x256xf32>
    %4 = vector.broadcast %3 : vector<1x256xf32> to vector<8x256xf32>
    %5 = arith.addf %2, %4 : vector<8x256xf32>
    %6 = vector.extract_strided_slice %5 {offsets = [0, 0], sizes = [8, 128], strides = [1, 1]} : vector<8x256xf32> to vector<8x128xf32>
    %7 = vector.extract_strided_slice %5 {offsets = [0, 128], sizes = [8, 128], strides = [1, 1]} : vector<8x256xf32> to vector<8x128xf32>
    %8 = arith.maximumf %6, %7 : vector<8x128xf32>
    %9 = arith.truncf %8 : vector<8x128xf32> to vector<8x128xbf16>
    %10 = arith.minimumf %6, %7 : vector<8x128xf32>
    %11 = arith.truncf %10 : vector<8x128xf32> to vector<8x128xbf16>
    %c0_5 = arith.constant 0 : index
    %c0_6 = arith.constant 0 : index
    %12 = vector.load %arg4[%c0_5, %c0_6] : memref<128x256xbf16, #tpu.memory_space<vmem>>, vector<128x256xbf16>
    %cst_7 = arith.constant dense<0.000000e+00> : vector<8x256xf32>
    %13 = tpu.matmul %9, %12, %cst_7 {dimension_numbers = #tpu.dot_dimension_numbers<[1], [0], [0], [1], [0, 0, 1, 1], [], []>} : vector<8x128xbf16>, vector<128x256xbf16>, vector<8x256xf32> -> vector<8x256xf32>
    %c0_8 = arith.constant 0 : index
    %c0_9 = arith.constant 0 : index
    %14 = vector.load %arg5[%c0_8, %c0_9] : memref<128x256xbf16, #tpu.memory_space<vmem>>, vector<128x256xbf16>
    %cst_10 = arith.constant dense<0.000000e+00> : vector<8x256xf32>
    %15 = tpu.matmul %11, %14, %cst_10 {dimension_numbers = #tpu.dot_dimension_numbers<[1], [0], [0], [1], [0, 0, 1, 1], [], []>} : vector<8x128xbf16>, vector<128x256xbf16>, vector<8x256xf32> -> vector<8x256xf32>
    %16 = arith.addf %13, %15 : vector<8x256xf32>
    %c0_11 = arith.constant 0 : index
    %c0_12 = arith.constant 0 : index
    %17 = vector.load %arg6[%c0_11, %c0_12] : memref<1x256xf32, #tpu.memory_space<vmem>>, vector<1x256xf32>
    %18 = vector.broadcast %17 : vector<1x256xf32> to vector<8x256xf32>
    %19 = arith.addf %16, %18 : vector<8x256xf32>
    %20 = vector.extract_strided_slice %19 {offsets = [0, 0], sizes = [8, 128], strides = [1, 1]} : vector<8x256xf32> to vector<8x128xf32>
    %21 = vector.extract_strided_slice %19 {offsets = [0, 128], sizes = [8, 128], strides = [1, 1]} : vector<8x256xf32> to vector<8x128xf32>
    %22 = arith.maximumf %20, %21 : vector<8x128xf32>
    %23 = arith.truncf %22 : vector<8x128xf32> to vector<8x128xbf16>
    %24 = arith.minimumf %20, %21 : vector<8x128xf32>
    %25 = arith.truncf %24 : vector<8x128xf32> to vector<8x128xbf16>
    %c0_13 = arith.constant 0 : index
    %c0_14 = arith.constant 0 : index
    %26 = vector.load %arg7[%c0_13, %c0_14] : memref<128x128xbf16, #tpu.memory_space<vmem>>, vector<128x128xbf16>
    %cst_15 = arith.constant dense<0.000000e+00> : vector<8x128xf32>
    %27 = tpu.matmul %23, %26, %cst_15 {dimension_numbers = #tpu.dot_dimension_numbers<[1], [0], [0], [1], [0, 0, 1, 1], [], []>} : vector<8x128xbf16>, vector<128x128xbf16>, vector<8x128xf32> -> vector<8x128xf32>
    %c0_16 = arith.constant 0 : index
    %c0_17 = arith.constant 0 : index
    %28 = vector.load %arg8[%c0_16, %c0_17] : memref<128x128xbf16, #tpu.memory_space<vmem>>, vector<128x128xbf16>
    %cst_18 = arith.constant dense<0.000000e+00> : vector<8x128xf32>
    %29 = tpu.matmul %25, %28, %cst_18 {dimension_numbers = #tpu.dot_dimension_numbers<[1], [0], [0], [1], [0, 0, 1, 1], [], []>} : vector<8x128xbf16>, vector<128x128xbf16>, vector<8x128xf32> -> vector<8x128xf32>
    %30 = arith.addf %27, %29 : vector<8x128xf32>
    %c0_19 = arith.constant 0 : index
    %c0_20 = arith.constant 0 : index
    %31 = vector.load %arg9[%c0_19, %c0_20] : memref<1x128xf32, #tpu.memory_space<vmem>>, vector<1x128xf32>
    %32 = vector.broadcast %31 : vector<1x128xf32> to vector<8x128xf32>
    %33 = arith.addf %30, %32 : vector<8x128xf32>
    %c0_21 = arith.constant 0 : index
    %c0_22 = arith.constant 0 : index
    %34 = vector.load %arg10[%c0_21, %c0_22] : memref<8x128xf32, #tpu.memory_space<vmem>>, vector<8x128xf32>
    tpu.vector_store %arg10[%c0_21, %c0_22], %33 {strides = array<i32>} : memref<8x128xf32, #tpu.memory_space<vmem>>, vector<8x128xf32>,
    return
  }
  func.func @transform_0(%arg0: i32) -> (i32, i32) {
    %c0_i32 = arith.constant 0 : i32
    %c0_i32_0 = arith.constant 0 : i32
    return %arg0, %c0_i32 : i32, i32
  }
  func.func @transform_1(%arg0: i32) -> (i32, i32) {
    %c0_i32 = arith.constant 0 : i32
    %c0_i32_0 = arith.constant 0 : i32
    %c0_i32_1 = arith.constant 0 : i32
    return %c0_i32, %c0_i32_0 : i32, i32
  }
  func.func @transform_2(%arg0: i32) -> (i32, i32) {
    %c0_i32 = arith.constant 0 : i32
    %c0_i32_0 = arith.constant 0 : i32
    %c0_i32_1 = arith.constant 0 : i32
    return %c0_i32, %c0_i32_0 : i32, i32
  }
  func.func @transform_3(%arg0: i32) -> (i32, i32) {
    %c0_i32 = arith.constant 0 : i32
    %c0_i32_0 = arith.constant 0 : i32
    %c0_i32_1 = arith.constant 0 : i32
    return %c0_i32, %c0_i32_0 : i32, i32
  }
  func.func @transform_4(%arg0: i32) -> (i32, i32) {
    %c0_i32 = arith.constant 0 : i32
    %c0_i32_0 = arith.constant 0 : i32
    %c0_i32_1 = arith.constant 0 : i32
    return %c0_i32, %c0_i32_0 : i32, i32
  }
  func.func @transform_5(%arg0: i32) -> (i32, i32) {
    %c0_i32 = arith.constant 0 : i32
    %c0_i32_0 = arith.constant 0 : i32
    %c0_i32_1 = arith.constant 0 : i32
    return %c0_i32, %c0_i32_0 : i32, i32
  }
  func.func @transform_6(%arg0: i32) -> (i32, i32) {
    %c0_i32 = arith.constant 0 : i32
    %c0_i32_0 = arith.constant 0 : i32
    %c0_i32_1 = arith.constant 0 : i32
    return %c0_i32, %c0_i32_0 : i32, i32
  }
  func.func @transform_7(%arg0: i32) -> (i32, i32) {
    %c0_i32 = arith.constant 0 : i32
    %c0_i32_0 = arith.constant 0 : i32
    %c0_i32_1 = arith.constant 0 : i32
    return %c0_i32, %c0_i32_0 : i32, i32
  }
  func.func @transform_8(%arg0: i32) -> (i32, i32) {
    %c0_i32 = arith.constant 0 : i32
    %c0_i32_0 = arith.constant 0 : i32
    %c0_i32_1 = arith.constant 0 : i32
    return %c0_i32, %c0_i32_0 : i32, i32
  }
  func.func @transform_9(%arg0: i32) -> (i32, i32) {
    %c0_i32 = arith.constant 0 : i32
    %c0_i32_0 = arith.constant 0 : i32
    return %arg0, %c0_i32 : i32, i32
  }
}

</mosaic_0001>

<bundles_post_ra>
// kernel: lipschitz_network_forward.1
= control target key start
LH: loop header
LB: loop body
LE: loop exit
PB: predicated region body
PF: predicated region fallthrough
CT: control target
= control target key end

     0   :  { %14 = vsyncpa [#allocation3], 0  ;;  %s6253_s0 = inlined_call_operand.vmem [shape: bf16[8,3072], index: 0, kind: input, shape index: {}]   ;;  %s6254_s1 = inlined_call_operand.hbm [shape: bf16[3072,256], index: 1, kind: input, shape index: {}]   ;;  %s6255_s2 = inlined_call_operand.hbm [shape: f32[1,256], index: 2, kind: input, shape index: {}]   ;;  %s6256_s3 = inlined_call_operand.hbm [shape: bf16[128,256], index: 3, kind: input, shape index: {}]   ;;  %s6257_s4 = inlined_call_operand.hbm [shape: bf16[128,256], index: 4, kind: input, shape index: {}]   ;;  %s6258_s5 = inlined_call_operand.hbm [shape: f32[1,256], index: 5, kind: input, shape index: {}]   ;;  %s6259_s6 = inlined_call_operand.hbm [shape: bf16[128,128], index: 6, kind: input, shape index: {}]   ;;  %s6260_s7 = inlined_call_operand.hbm [shape: bf16[128,128], index: 7, kind: input, shape index: {}]   ;;  %s6261_s8 = inlined_call_operand.hbm [shape: f32[1,128], index: 8, kind: input, shape index: {}]   ;;  %s6262_s9 = inlined_call_operand.vmem [shape: f32[8,128], index: 9, kind: output, shape index: {}]  }
   0x1   :  { %15 = vsyncpa [#allocation5], 0 }
   0x2   :  { %16 = vsyncpa [#allocation8], 0 }
   0x3   :  { %17 = vsyncpa [#allocation11], 0  ;;  %s39_s11 = sshll.u32 %s6255_s2, 4  ;;  %s40_s11 = int_to_ptr.hbm [resolvable:$true] %s39_s11 }
   0x4   :  { %18 = vsyncpa [#allocation14], 0  ;;  %s5986_s12 = smov [#allocation4]   ;;  %s62_s16 = sshll.u32 %s6257_s4, 4  ;;  %s63_s16 = int_to_ptr.hbm [resolvable:$true] %s62_s16 }
   0x5   :  { %s41_s13 = sshll.u32 %s5986_s12, 4  ;;  %s5987_s17 = smov [#allocation7]   ;;  %s42_s13 = int_to_ptr.vmem [resolvable:$true] %s41_s13 }
   0x6   :  { %44 = dma.hbm_to_vmem [thread:$0]  %s40_s11, 32, %s42_s13, [#allocation5]  }
   0x7   :  { %s64_s18 = sshll.u32 %s5987_s17, 4  ;;  %s86_s21 = sshll.u32 %s6259_s6, 4  ;;  %s65_s18 = int_to_ptr.vmem [resolvable:$true] %s64_s18  ;;  %s87_s21 = int_to_ptr.hbm [resolvable:$true] %s86_s21 }
   0x8   :  { %s5988_s2 = smov 128   ;;  %s5989_s22 = smov 8  }
   0x9   :  { %70 = dma.hbm_to_vmem [thread:$0]  %s63_s16, 2048, %s65_s18, [#allocation8], %s5988_s2, %s5988_s2, %s5989_s22  }
   0xa   :  { %s5990_s23 = smov [#allocation10]   ;;  %s25_s27 = sshll.u32 %s6254_s1, 4  ;;  %s26_s27 = int_to_ptr.hbm [resolvable:$true] %s25_s27 }
   0xb   :  { %s88_s24 = sshll.u32 %s5990_s23, 4  ;;  %s5991_s4 = smov 64   ;;  %s89_s24 = int_to_ptr.vmem [resolvable:$true] %s88_s24 }
   0xc   :  { %s5992_s28 = smov 4   ;;  %s5993_s6 = smov [#allocation2]  }
   0xd   :  { %94 = dma.hbm_to_vmem [thread:$0]  %s87_s21, 1024, %s89_s24, [#allocation11], %s5991_s4, %s5991_s4, %s5992_s28  }
   0xe   :  { %s27_s29 = sshll.u32 %s5993_s6, 4  ;;  %s49_s11 = sshll.u32 %s6256_s3, 4  ;;  %s28_s29 = int_to_ptr.vmem [resolvable:$true] %s27_s29  ;;  %s50_s11 = int_to_ptr.hbm [resolvable:$true] %s49_s11 }
   0xf   :  { %33 = dma.hbm_to_vmem [thread:$0]  %s26_s27, 49152, %s28_s29, [#allocation3], %s5988_s2, %s5988_s2, %s5989_s22  }
  0x10   :  { %s76_s1 = sshll.u32 %s6258_s5, 4  ;;  %s5994_s14 = smov [#allocation6]   ;;  %s77_s1 = int_to_ptr.hbm [resolvable:$true] %s76_s1 }
  0x11   :  { %s51_s15 = sshll.u32 %s5994_s14, 4  ;;  %s5995_s16 = smov [#allocation9]   ;;  %s52_s15 = int_to_ptr.vmem [resolvable:$true] %s51_s15 }
  0x12   :  { %57 = dma.hbm_to_vmem [thread:$0]  %s50_s11, 2048, %s52_s15, [#allocation5], %s5988_s2, %s5988_s2, %s5989_s22  }
  0x13   :  { %s78_s17 = sshll.u32 %s5995_s16, 4  ;;  %s99_s20 = sshll.u32 %s6260_s7, 4  ;;  %s79_s17 = int_to_ptr.vmem [resolvable:$true] %s78_s17  ;;  %s100_s20 = int_to_ptr.hbm [resolvable:$true] %s99_s20 }
  0x14   :  { %81 = dma.hbm_to_vmem [thread:$0]  %s77_s1, 32, %s79_s17, [#allocation8]  }
  0x15   :  { %s113_s23 = sshll.u32 %s6261_s8, 4  ;;  %s5996_s24 = smov [#allocation12]   ;;  %s114_s23 = int_to_ptr.hbm [resolvable:$true] %s113_s23 }
  0x16   :  { %s101_s5 = sshll.u32 %s5996_s24, 4  ;;  %s5997_s2 = smov [#allocation13]   ;;  %s102_s5 = int_to_ptr.vmem [resolvable:$true] %s101_s5 }
  0x17   :  { %107 = dma.hbm_to_vmem [thread:$0]  %s100_s20, 1024, %s102_s5, [#allocation11], %s5991_s4, %s5991_s4, %s5992_s28  }
  0x18   :  { %s115_s22 = sshll.u32 %s5997_s2, 4  ;;  %s116_s22 = int_to_ptr.vmem [resolvable:$true] %s115_s22 }
  0x19   :  { %118 = dma.hbm_to_vmem [thread:$0]  %s114_s23, 16, %s116_s22, [#allocation14]  }
  0x1a   :  { %5976 = dma.done.wait [#allocation3], 49152  }
  0x1b   :  { %5977 = vsyncadd [#allocation3], 4294918144 }
  0x1c   :  { %5978 = dma.done.wait [#allocation5], 2080  }
  0x1d   :  { %5979 = vsyncadd [#allocation5], 4294965216 }
  0x1e   :  { %5980 = dma.done.wait [#allocation8], 2080  }
  0x1f   :  { %5981 = vsyncadd [#allocation8], 4294965216 }
  0x20   :  { %5982 = dma.done.wait [#allocation11], 2048  }
  0x21   :  { %5983 = vsyncadd [#allocation11], 4294965248 }
  0x22   :  { %5984 = dma.done.wait [#allocation14], 16  }
  0x23   :  { %5985 = vsyncadd [#allocation14], 4294967280  ;;  %v3668_v0 = vld [vmem:[#allocation2 + $0x70] sm:$0xf]  ;;  %v5353_v1 = vld [vmem:[#allocation2 + $0x74] sm:$0xf0] }
  0x24   :  { %v3732_v2 = vld [vmem:[#allocation2 + $0xf0] sm:$0xf]  ;;  %v3669_v3 = vor.u32 %v5353_v1, %v3668_v0  ;;  %v5369_v4 = vld [vmem:[#allocation2 + $0xf4] sm:$0xf0]  ;;  %v3660_v11 = vld [vmem:[#allocation2 + $0x60] sm:$0xf] }
  0x25   :  { %v3796_v5 = vld [vmem:[#allocation2 + $0x170] sm:$0xf]  ;;  %v5385_v6 = vld [vmem:[#allocation2 + $0x174] sm:$0xf0]  ;;  %v3733_v7 = vor.u32 %v5369_v4, %v3732_v2  ;;  %v5351_v13 = vld [vmem:[#allocation2 + $0x64] sm:$0xf0] }
  0x26   :  { %v3797_v8 = vor.u32 %v5385_v6, %v3796_v5  ;;  %v3860_v9 = vld [vmem:[#allocation2 + $0x1f0] sm:$0xf]  ;;  %v5401_v10 = vld [vmem:[#allocation2 + $0x1f4] sm:$0xf0]  ;;  %2557 = vmatpush.bf16.msra.mxu0 %v3669_v3  ;;  %v3724_v14 = vld [vmem:[#allocation2 + $0xe0] sm:$0xf]  ;;  %v3661_v16 = vor.u32 %v5351_v13, %v3660_v11 }
  0x27   :  { %v3861_v12 = vor.u32 %v5401_v10, %v3860_v9  ;;  %v5367_v15 = vld [vmem:[#allocation2 + $0xe4] sm:$0xf0]  ;;  %2570 = vmatpush.bf16.msra.mxu1 %v3733_v7  ;;  %v3788_v18 = vld [vmem:[#allocation2 + $0x160] sm:$0xf]  ;;  %v3652_v23 = vld [vmem:[#allocation2 + $0x50] sm:$0xf] }
  0x28   :  { %2583 = vmatpush.bf16.msra.mxu2 %v3797_v8  ;;  %v3725_v17 = vor.u32 %v5367_v15, %v3724_v14  ;;  %v5383_v19 = vld [vmem:[#allocation2 + $0x164] sm:$0xf0]  ;;  %v3852_v20 = vld [vmem:[#allocation2 + $0x1e0] sm:$0xf]  ;;  %v5349_v24 = vld [vmem:[#allocation2 + $0x54] sm:$0xf0] }
  0x29   :  { %2596 = vmatpush.bf16.msra.mxu3 %v3861_v12  ;;  %v3789_v21 = vor.u32 %v5383_v19, %v3788_v18  ;;  %v5399_v22 = vld [vmem:[#allocation2 + $0x1e4] sm:$0xf0]  ;;  %v3716_v26 = vld [vmem:[#allocation2 + $0xd0] sm:$0xf]  ;;  %v5365_v27 = vld [vmem:[#allocation2 + $0xd4] sm:$0xf0]  ;;  %v3653_v29 = vor.u32 %v5349_v24, %v3652_v23 }
  0x2a   :  { %v3853_v25 = vor.u32 %v5399_v22, %v3852_v20  ;;  %v3780_v28 = vld [vmem:[#allocation2 + $0x150] sm:$0xf]  ;;  %2558 = vmatpush.bf16.msra.mxu0 %v3661_v16  ;;  %v5381_v30 = vld [vmem:[#allocation2 + $0x154] sm:$0xf0]  ;;  %v3717_v33 = vor.u32 %v5365_v27, %v3716_v26  ;;  %v3644_v35 = vld [vmem:[#allocation2 + $0x40] sm:$0xf] }
  0x2b   :  { %v3844_v31 = vld [vmem:[#allocation2 + $0x1d0] sm:$0xf]  ;;  %v5397_v32 = vld [vmem:[#allocation2 + $0x1d4] sm:$0xf0]  ;;  %2571 = vmatpush.bf16.msra.mxu1 %v3725_v17  ;;  %v3781_v34 = vor.u32 %v5381_v30, %v3780_v28  ;;  %v5347_v36 = vld [vmem:[#allocation2 + $0x44] sm:$0xf0] }
  0x2c   :  { %2584 = vmatpush.bf16.msra.mxu2 %v3789_v21  ;;  %v3708_v37 = vld [vmem:[#allocation2 + $0xc0] sm:$0xf]  ;;  %v3845_v38 = vor.u32 %v5397_v32, %v3844_v31  ;;  %v5363_v39 = vld [vmem:[#allocation2 + $0xc4] sm:$0xf0]  ;;  %v3645_v44 = vor.u32 %v5347_v36, %v3644_v35  ;;  %v3636_v47 = vld [vmem:[#allocation2 + $0x30] sm:$0xf] }
  0x2d   :  { %2597 = vmatpush.bf16.msra.mxu3 %v3853_v25  ;;  %v3772_v40 = vld [vmem:[#allocation2 + $0x140] sm:$0xf]  ;;  %v5379_v41 = vld [vmem:[#allocation2 + $0x144] sm:$0xf0]  ;;  %v3709_v45 = vor.u32 %v5363_v39, %v3708_v37  ;;  %v5345_v48 = vld [vmem:[#allocation2 + $0x34] sm:$0xf0] }
  0x2e   :  { %v3836_v42 = vld [vmem:[#allocation2 + $0x1c0] sm:$0xf]  ;;  %v5395_v43 = vld [vmem:[#allocation2 + $0x1c4] sm:$0xf0]  ;;  %2559 = vmatpush.bf16.msra.mxu0 %v3653_v29  ;;  %v3773_v46 = vor.u32 %v5379_v41, %v3772_v40  ;;  %v3700_v49 = vld [vmem:[#allocation2 + $0xb0] sm:$0xf]  ;;  %v3637_v56 = vor.u32 %v5345_v48, %v3636_v47 }
  0x2f   :  { %2572 = vmatpush.bf16.msra.mxu1 %v3717_v33  ;;  %v3837_v50 = vor.u32 %v5395_v43, %v3836_v42  ;;  %v5361_v51 = vld [vmem:[#allocation2 + $0xb4] sm:$0xf0]  ;;  %v3764_v52 = vld [vmem:[#allocation2 + $0x130] sm:$0xf]  ;;  %v3628_v59 = vld [vmem:[#allocation2 + $0x20] sm:$0xf] }
  0x30   :  { %2585 = vmatpush.bf16.msra.mxu2 %v3781_v34  ;;  %v5377_v53 = vld [vmem:[#allocation2 + $0x134] sm:$0xf0]  ;;  %v3828_v54 = vld [vmem:[#allocation2 + $0x1b0] sm:$0xf]  ;;  %v3701_v57 = vor.u32 %v5361_v51, %v3700_v49  ;;  %v5343_v60 = vld [vmem:[#allocation2 + $0x24] sm:$0xf0] }
  0x31   :  { %2598 = vmatpush.bf16.msra.mxu3 %v3845_v38  ;;  %v5393_v55 = vld [vmem:[#allocation2 + $0x1b4] sm:$0xf0]  ;;  %v3765_v58 = vor.u32 %v5377_v53, %v3764_v52  ;;  %v3692_v61 = vld [vmem:[#allocation2 + $0xa0] sm:$0xf]  ;;  %v5359_v63 = vld [vmem:[#allocation2 + $0xa4] sm:$0xf0]  ;;  %v3629_v4 = vor.u32 %v5343_v60, %v3628_v59 }
  0x32   :  { %2560 = vmatpush.bf16.msra.mxu0 %v3645_v44  ;;  %v3829_v62 = vor.u32 %v5393_v55, %v3828_v54  ;;  %v3756_v0 = vld [vmem:[#allocation2 + $0x120] sm:$0xf]  ;;  %v5375_v1 = vld [vmem:[#allocation2 + $0x124] sm:$0xf0]  ;;  %v3693_v5 = vor.u32 %v5359_v63, %v3692_v61  ;;  %v3620_v7 = vld [vmem:[#allocation2 + $0x10] sm:$0xf] }
  0x33   :  { %2573 = vmatpush.bf16.msra.mxu1 %v3709_v45  ;;  %v3820_v2 = vld [vmem:[#allocation2 + $0x1a0] sm:$0xf]  ;;  %v5391_v3 = vld [vmem:[#allocation2 + $0x1a4] sm:$0xf0]  ;;  %v3757_v6 = vor.u32 %v5375_v1, %v3756_v0  ;;  %v5341_v8 = vld [vmem:[#allocation2 + $0x14] sm:$0xf0] }
  0x34   :  { %2586 = vmatpush.bf16.msra.mxu2 %v3773_v46  ;;  %v3684_v9 = vld [vmem:[#allocation2 + $0x90] sm:$0xf]  ;;  %v3821_v10 = vor.u32 %v5391_v3, %v3820_v2  ;;  %v5357_v11 = vld [vmem:[#allocation2 + $0x94] sm:$0xf0]  ;;  %v3621_v16 = vor.u32 %v5341_v8, %v3620_v7  ;;  %v3612_v17 = vld [vmem:[#allocation2] sm:$0xf] }
  0x35   :  { %2599 = vmatpush.bf16.msra.mxu3 %v3837_v50  ;;  %v3748_v12 = vld [vmem:[#allocation2 + $0x110] sm:$0xf]  ;;  %v5373_v13 = vld [vmem:[#allocation2 + $0x114] sm:$0xf0]  ;;  %v5339_v18 = vld [vmem:[#allocation2 + $0x4] sm:$0xf0]  ;;  %v3685_v19 = vor.u32 %v5357_v11, %v3684_v9 }
  0x36   :  { %2561 = vmatpush.bf16.msra.mxu0 %v3637_v56  ;;  %v3812_v14 = vld [vmem:[#allocation2 + $0x190] sm:$0xf]  ;;  %v5389_v15 = vld [vmem:[#allocation2 + $0x194] sm:$0xf0]  ;;  %v3749_v20 = vor.u32 %v5373_v13, %v3748_v12  ;;  %v3676_v21 = vld [vmem:[#allocation2 + $0x80] sm:$0xf]  ;;  %v3613_v31 = vor.u32 %v5339_v18, %v3612_v17 }
  0x37   :  { %2574 = vmatpush.bf16.msra.mxu1 %v3701_v57  ;;  %v5355_v22 = vld [vmem:[#allocation2 + $0x84] sm:$0xf0]  ;;  %v3740_v23 = vld [vmem:[#allocation2 + $0x100] sm:$0xf]  ;;  %v3813_v24 = vor.u32 %v5389_v15, %v3812_v14  ;;  %v3924_v28 = vld [vmem:[#allocation2 + $0x270] sm:$0xf] }
  0x38   :  { %2587 = vmatpush.bf16.msra.mxu2 %v3765_v58  ;;  %v5371_v25 = vld [vmem:[#allocation2 + $0x104] sm:$0xf0]  ;;  %v3804_v26 = vld [vmem:[#allocation2 + $0x180] sm:$0xf]  ;;  %v5417_v29 = vld [vmem:[#allocation2 + $0x274] sm:$0xf0]  ;;  %v3677_v35 = vor.u32 %v5355_v22, %v3676_v21 }
  0x39   :  { %2600 = vmatpush.bf16.msra.mxu3 %v3829_v62  ;;  %v5387_v27 = vld [vmem:[#allocation2 + $0x184] sm:$0xf0]  ;;  %v3988_v30 = vld [vmem:[#allocation2 + $0x2f0] sm:$0xf]  ;;  %v5433_v32 = vld [vmem:[#allocation2 + $0x2f4] sm:$0xf0]  ;;  %v3741_v36 = vor.u32 %v5371_v25, %v3740_v23  ;;  %v3925_v40 = vor.u32 %v5417_v29, %v3924_v28 }
  0x3a   :  { %2562 = vmatpush.bf16.msra.mxu0 %v3629_v4  ;;  %v4052_v33 = vld [vmem:[#allocation2 + $0x370] sm:$0xf]  ;;  %v5449_v34 = vld [vmem:[#allocation2 + $0x374] sm:$0xf0]  ;;  %v3805_v39 = vor.u32 %v5387_v27, %v3804_v26  ;;  %v3989_v41 = vor.u32 %v5433_v32, %v3988_v30  ;;  %v3916_v43 = vld [vmem:[#allocation2 + $0x260] sm:$0xf] }
  0x3b   :  { %2575 = vmatpush.bf16.msra.mxu1 %v3693_v5  ;;  %v4116_v37 = vld [vmem:[#allocation2 + $0x3f0] sm:$0xf]  ;;  %v5465_v38 = vld [vmem:[#allocation2 + $0x3f4] sm:$0xf0]  ;;  %v4053_v42 = vor.u32 %v5449_v34, %v4052_v33  ;;  %v5415_v44 = vld [vmem:[#allocation2 + $0x264] sm:$0xf0] }
  0x3c   :  { %2588 = vmatpush.bf16.msra.mxu2 %v3757_v6  ;;  %v3980_v45 = vld [vmem:[#allocation2 + $0x2e0] sm:$0xf]  ;;  %v4117_v46 = vor.u32 %v5465_v38, %v4116_v37  ;;  %v5431_v47 = vld [vmem:[#allocation2 + $0x2e4] sm:$0xf0]  ;;  %v3917_v52 = vor.u32 %v5415_v44, %v3916_v43  ;;  %v3908_v53 = vld [vmem:[#allocation2 + $0x250] sm:$0xf] }
  0x3d   :  { %2601 = vmatpush.bf16.msra.mxu3 %v3821_v10  ;;  %v4044_v48 = vld [vmem:[#allocation2 + $0x360] sm:$0xf]  ;;  %v5447_v49 = vld [vmem:[#allocation2 + $0x364] sm:$0xf0]  ;;  %v3981_v54 = vor.u32 %v5431_v47, %v3980_v45  ;;  %v5413_v56 = vld [vmem:[#allocation2 + $0x254] sm:$0xf0] }
  0x3e   :  { %2563 = vmatpush.bf16.msra.mxu0 %v3621_v16  ;;  %v4108_v50 = vld [vmem:[#allocation2 + $0x3e0] sm:$0xf]  ;;  %v5463_v51 = vld [vmem:[#allocation2 + $0x3e4] sm:$0xf0]  ;;  %v4045_v55 = vor.u32 %v5447_v49, %v4044_v48  ;;  %v3972_v57 = vld [vmem:[#allocation2 + $0x2d0] sm:$0xf]  ;;  %v3909_v0 = vor.u32 %v5413_v56, %v3908_v53 }
  0x3f   :  { %2576 = vmatpush.bf16.msra.mxu1 %v3685_v19  ;;  %v5429_v58 = vld [vmem:[#allocation2 + $0x2d4] sm:$0xf0]  ;;  %v4109_v59 = vor.u32 %v5463_v51, %v4108_v50  ;;  %v4036_v60 = vld [vmem:[#allocation2 + $0x350] sm:$0xf]  ;;  %v152_v2 = vld [vmem:[%s6253_s0 + $0x8] sm:$0xff] }
  0x40   :  { %2589 = vmatpush.bf16.msra.mxu2 %v3749_v20  ;;  %v5445_v61 = vld [vmem:[#allocation2 + $0x354] sm:$0xf0]  ;;  %v4100_v62 = vld [vmem:[#allocation2 + $0x3d0] sm:$0xf]  ;;  %v3973_v1 = vor.u32 %v5429_v58, %v3972_v57  ;;  %v151_v3 = vld [vmem:[%s6253_s0] sm:$0xff]  ;;  %v567_v8 = vunpack.c.l.b16 %v152_v2  ;;  %v568_v10 = vunpack.c.h.b16 %v152_v2 }
  0x41   :  { %2602 = vmatpush.bf16.msra.mxu3 %v3813_v24  ;;  %v5461_v63 = vld [vmem:[#allocation2 + $0x3d4] sm:$0xf0]  ;;  %v4037_v4 = vor.u32 %v5445_v61, %v4036_v60  ;;  %v3900_v5 = vld [vmem:[#allocation2 + $0x240] sm:$0xf]  ;;  %v5411_v6 = vld [vmem:[#allocation2 + $0x244] sm:$0xf0]  ;;  %v565_v9 = vunpack.c.l.b16 %v151_v3  ;;  %v566_v15 = vunpack.c.h.b16 %v151_v3 }
  0x42   :  { %2564 = vmatpush.bf16.msra.mxu0 %v3613_v31  ;;  %v3964_v7 = vld [vmem:[#allocation2 + $0x2c0] sm:$0xf]  ;;  %v4101_v11 = vor.u32 %v5461_v63, %v4100_v62  ;;  %v5427_v12 = vld [vmem:[#allocation2 + $0x2c4] sm:$0xf0]  ;;  %v6084_v18 = vpack.c.b16 %v567_v8, %v567_v8  ;;  %v6088_v20 = vpack.c.b16 %v568_v10, %v568_v10  ;;  %v3901_v21 = vor.u32 %v5411_v6, %v3900_v5  ;;  %v3892_v25 = vld [vmem:[#allocation2 + $0x230] sm:$0xf] }
  0x43   :  { %2577 = vmatpush.bf16.msra.mxu1 %v3677_v35  ;;  %v4028_v13 = vld [vmem:[#allocation2 + $0x340] sm:$0xf]  ;;  %v5443_v14 = vld [vmem:[#allocation2 + $0x344] sm:$0xf0]  ;;  %v6086_v19 = vpack.c.b16 %v565_v9, %v565_v9  ;;  %v6090_v22 = vpack.c.b16 %v566_v15, %v566_v15  ;;  %v3965_v23 = vor.u32 %v5427_v12, %v3964_v7  ;;  %v5409_v26 = vld [vmem:[#allocation2 + $0x234] sm:$0xf0] }
  0x44   :  { %2590 = vmatpush.bf16.msra.mxu2 %v3741_v36  ;;  %v4092_v16 = vld [vmem:[#allocation2 + $0x3c0] sm:$0xf]  ;;  %v5459_v17 = vld [vmem:[#allocation2 + $0x3c4] sm:$0xf0]  ;;  %v4029_v24 = vor.u32 %v5443_v14, %v4028_v13  ;;  %v3956_v27 = vld [vmem:[#allocation2 + $0x2b0] sm:$0xf]  ;;  %v3893_v34 = vor.u32 %v5409_v26, %v3892_v25 }
  0x45   :  { %2603 = vmatpush.bf16.msra.mxu3 %v3805_v39  ;;  %v4093_v28 = vor.u32 %v5459_v17, %v4092_v16  ;;  %v5425_v29 = vld [vmem:[#allocation2 + $0x2b4] sm:$0xf0]  ;;  %v4020_v30 = vld [vmem:[#allocation2 + $0x330] sm:$0xf]  ;;  %2565 = vmatmul.bf16.vlgmr.msra.gmra.mxu0 %v6086_v19  ;;  %v3884_v37 = vld [vmem:[#allocation2 + $0x220] sm:$0xf] }
  0x46   :  { %2609 = vmatpush.bf16.msrb.mxu0 %v3925_v40  ;;  %v5441_v31 = vld [vmem:[#allocation2 + $0x334] sm:$0xf0]  ;;  %v4084_v32 = vld [vmem:[#allocation2 + $0x3b0] sm:$0xf]  ;;  %2578 = vmatmul.bf16.vlgmr.msra.gmra.mxu1 %v6090_v22  ;;  %v3957_v35 = vor.u32 %v5425_v29, %v3956_v27  ;;  %v5407_v38 = vld [vmem:[#allocation2 + $0x224] sm:$0xf0] }
  0x47   :  { %2622 = vmatpush.bf16.msrb.mxu1 %v3989_v41  ;;  %2591 = vmatmul.bf16.vlgmr.msra.gmra.mxu2 %v6084_v18  ;;  %v5457_v33 = vld [vmem:[#allocation2 + $0x3b4] sm:$0xf0]  ;;  %v4021_v36 = vor.u32 %v5441_v31, %v4020_v30  ;;  %v3948_v39 = vld [vmem:[#allocation2 + $0x2a0] sm:$0xf]  ;;  %v5423_v41 = vld [vmem:[#allocation2 + $0x2a4] sm:$0xf0] }
  0x48   :  { %2635 = vmatpush.bf16.msrb.mxu2 %v4053_v42  ;;  %2604 = vmatmul.bf16.vlgmr.msra.gmra.mxu3 %v6088_v20  ;;  %v4085_v40 = vor.u32 %v5457_v33, %v4084_v32  ;;  %v4012_v42 = vld [vmem:[#allocation2 + $0x320] sm:$0xf]  ;;  %v5439_v43 = vld [vmem:[#allocation2 + $0x324] sm:$0xf0]  ;;  %v3949_v47 = vor.u32 %v5423_v41, %v3948_v39  ;;  %v3876_v49 = vld [vmem:[#allocation2 + $0x210] sm:$0xf] }
  0x49   :  { %2648 = vmatpush.bf16.msrb.mxu3 %v4117_v46  ;;  %v4076_v44 = vld [vmem:[#allocation2 + $0x3a0] sm:$0xf]  ;;  %v5455_v45 = vld [vmem:[#allocation2 + $0x3a4] sm:$0xf0]  ;;  %v3885_v46 = vor.u32 %v5407_v38, %v3884_v37  ;;  %v4013_v48 = vor.u32 %v5439_v43, %v4012_v42  ;;  %v5405_v50 = vld [vmem:[#allocation2 + $0x214] sm:$0xf0] }
  0x4a   :  { %2610 = vmatpush.bf16.msrb.mxu0 %v3917_v52  ;;  %v3940_v51 = vld [vmem:[#allocation2 + $0x290] sm:$0xf]  ;;  %v4077_v52 = vor.u32 %v5455_v45, %v4076_v44  ;;  %v5421_v53 = vld [vmem:[#allocation2 + $0x294] sm:$0xf0]  ;;  %v3868_v58 = vld [vmem:[#allocation2 + $0x200] sm:$0xf] }
  0x4b   :  { %2623 = vmatpush.bf16.msrb.mxu1 %v3981_v54  ;;  %v4004_v54 = vld [vmem:[#allocation2 + $0x310] sm:$0xf]  ;;  %v5453_v57 = vld [vmem:[#allocation2 + $0x394] sm:$0xf0]  ;;  %v5403_v60 = vld [vmem:[#allocation2 + $0x204] sm:$0xf0]  ;;  %v3941_v63 = vor.u32 %v5421_v53, %v3940_v51 }
  0x4c   :  { %2636 = vmatpush.bf16.msrb.mxu2 %v4045_v55  ;;  %v5437_v55 = vld [vmem:[#allocation2 + $0x314] sm:$0xf0]  ;;  %v4068_v56 = vld [vmem:[#allocation2 + $0x390] sm:$0xf]  ;;  %v3932_v61 = vld [vmem:[#allocation2 + $0x280] sm:$0xf] }
  0x4d   :  { %2649 = vmatpush.bf16.msrb.mxu3 %v4109_v59  ;;  %v3877_v59 = vor.u32 %v5405_v50, %v3876_v49  ;;  %v5419_v62 = vld [vmem:[#allocation2 + $0x284] sm:$0xf0]  ;;  %v154_v3 = vld [vmem:[%s6253_s0 + $0x18] sm:$0xff]  ;;  %v4060_v5 = vld [vmem:[#allocation2 + $0x380] sm:$0xf] }
  0x4e   :  { %2611 = vmatpush.bf16.msrb.mxu0 %v3909_v0  ;;  %v4005_v0 = vor.u32 %v5437_v55, %v4004_v54  ;;  %v5435_v2 = vld [vmem:[#allocation2 + $0x304] sm:$0xf0]  ;;  %v153_v7 = vld [vmem:[%s6253_s0 + $0x10] sm:$0xff]  ;;  %v5481_v9 = vld [vmem:[#allocation2 + $0x474] sm:$0xf0]  ;;  %v571_v15 = vunpack.c.l.b16 %v154_v3  ;;  %v3933_v16 = vor.u32 %v5419_v62, %v3932_v61  ;;  %v572_v25 = vunpack.c.h.b16 %v154_v3 }
  0x4f   :  { %2624 = vmatpush.bf16.msrb.mxu1 %v3973_v1  ;;  %v3996_v1 = vld [vmem:[#allocation2 + $0x300] sm:$0xf]  ;;  %v5451_v6 = vld [vmem:[#allocation2 + $0x384] sm:$0xf0]  ;;  %v4180_v8 = vld [vmem:[#allocation2 + $0x470] sm:$0xf] }
  0x50   :  { %2637 = vmatpush.bf16.msrb.mxu2 %v4037_v4  ;;  %v4069_v4 = vor.u32 %v5453_v57, %v4068_v56  ;;  %v4244_v10 = vld [vmem:[#allocation2 + $0x4f0] sm:$0xf]  ;;  %v5497_v12 = vld [vmem:[#allocation2 + $0x4f4] sm:$0xf0]  ;;  %v3997_v17 = vor.u32 %v5435_v2, %v3996_v1  ;;  %v4061_v26 = vor.u32 %v5451_v6, %v4060_v5  ;;  %v4181_v27 = vor.u32 %v5481_v9, %v4180_v8  ;;  %v4172_v31 = vld [vmem:[#allocation2 + $0x460] sm:$0xf] }
  0x51   :  { %2650 = vmatpush.bf16.msrb.mxu3 %v4101_v11  ;;  %v3869_v11 = vor.u32 %v5403_v60, %v3868_v58  ;;  %v4308_v13 = vld [vmem:[#allocation2 + $0x570] sm:$0xf]  ;;  %v5513_v14 = vld [vmem:[#allocation2 + $0x574] sm:$0xf0]  ;;  %v4245_v29 = vor.u32 %v5497_v12, %v4244_v10  ;;  %v5479_v32 = vld [vmem:[#allocation2 + $0x464] sm:$0xf0]  ;;  %v6102_v38 = vpack.c.b16 %v571_v15, %v571_v15  ;;  %v6106_v42 = vpack.c.b16 %v572_v25, %v572_v25 }
  0x52   :  { %2612 = vmatpush.bf16.msrb.mxu0 %v3901_v21  ;;  %v4372_v21 = vld [vmem:[#allocation2 + $0x5f0] sm:$0xf]  ;;  %v4309_v30 = vor.u32 %v5513_v14, %v4308_v13  ;;  %v4236_v33 = vld [vmem:[#allocation2 + $0x4e0] sm:$0xf]  ;;  %v5511_v37 = vld [vmem:[#allocation2 + $0x564] sm:$0xf0]  ;;  %v4173_v43 = vor.u32 %v5479_v32, %v4172_v31 }
  0x53   :  { %2625 = vmatpush.bf16.msrb.mxu1 %v3965_v23  ;;  %v5529_v23 = vld [vmem:[#allocation2 + $0x5f4] sm:$0xf0]  ;;  %v4364_v39 = vld [vmem:[#allocation2 + $0x5e0] sm:$0xf]  ;;  %v4228_v49 = vld [vmem:[#allocation2 + $0x4d0] sm:$0xf] }
  0x54   :  { %2638 = vmatpush.bf16.msrb.mxu2 %v4029_v24  ;;  %v569_v24 = vunpack.c.l.b16 %v153_v7  ;;  %v5493_v51 = vld [vmem:[#allocation2 + $0x4d4] sm:$0xf0]  ;;  %v4356_v54 = vld [vmem:[#allocation2 + $0x5d0] sm:$0xf]  ;;  %v5475_v60 = vld [vmem:[#allocation2 + $0x444] sm:$0xf0] }
  0x55   :  { %2651 = vmatpush.bf16.msrb.mxu3 %v4093_v28  ;;  %v570_v28 = vunpack.c.h.b16 %v153_v7  ;;  %v5509_v53 = vld [vmem:[#allocation2 + $0x554] sm:$0xf0]  ;;  %v4229_v57 = vor.u32 %v5493_v51, %v4228_v49  ;;  %v4220_v61 = vld [vmem:[#allocation2 + $0x4c0] sm:$0xf]  ;;  %v5507_v1 = vld [vmem:[#allocation2 + $0x544] sm:$0xf0] }
  0x56   :  { %2613 = vmatpush.bf16.msrb.mxu0 %v3893_v34  ;;  %v4373_v34 = vor.u32 %v5529_v23, %v4372_v21  ;;  %v6104_v41 = vpack.c.b16 %v569_v24, %v569_v24  ;;  %v5525_v55 = vld [vmem:[#allocation2 + $0x5d4] sm:$0xf0]  ;;  %v4348_v2 = vld [vmem:[#allocation2 + $0x5c0] sm:$0xf]  ;;  %v5523_v3 = vld [vmem:[#allocation2 + $0x5c4] sm:$0xf0] }
  0x57   :  { %2626 = vmatpush.bf16.msrb.mxu1 %v3957_v35  ;;  %v5495_v35 = vld [vmem:[#allocation2 + $0x4e4] sm:$0xf0]  ;;  %v6108_v44 = vpack.c.b16 %v570_v28, %v570_v28  ;;  %v4357_v62 = vor.u32 %v5525_v55, %v4356_v54  ;;  %v4148_v7 = vld [vmem:[#allocation2 + $0x430] sm:$0xf]  ;;  %v5473_v8 = vld [vmem:[#allocation2 + $0x434] sm:$0xf0]  ;;  %v4349_v10 = vor.u32 %v5523_v3, %v4348_v2 }
  0x58   :  { %2639 = vmatpush.bf16.msrb.mxu2 %v4021_v36  ;;  %v4300_v36 = vld [vmem:[#allocation2 + $0x560] sm:$0xf]  ;;  %v4237_v45 = vor.u32 %v5495_v35, %v4236_v33  ;;  %v4212_v9 = vld [vmem:[#allocation2 + $0x4b0] sm:$0xf]  ;;  %v5505_v13 = vld [vmem:[#allocation2 + $0x534] sm:$0xf0] }
  0x59   :  { %2652 = vmatpush.bf16.msrb.mxu3 %v4085_v40  ;;  %v5527_v40 = vld [vmem:[#allocation2 + $0x5e4] sm:$0xf0]  ;;  %v4276_v12 = vld [vmem:[#allocation2 + $0x530] sm:$0xf]  ;;  %v5521_v15 = vld [vmem:[#allocation2 + $0x5b4] sm:$0xf0] }
  0x5a   :  { %2614 = vmatpush.bf16.msrb.mxu0 %v3885_v46  ;;  %v4301_v46 = vor.u32 %v5511_v37, %v4300_v36  ;;  %v4365_v50 = vor.u32 %v5527_v40, %v4364_v39  ;;  %v4340_v14 = vld [vmem:[#allocation2 + $0x5b0] sm:$0xf]  ;;  %v4277_v21 = vor.u32 %v5505_v13, %v4276_v12  ;;  %v4140_v23 = vld [vmem:[#allocation2 + $0x420] sm:$0xf]  ;;  %v5471_v24 = vld [vmem:[#allocation2 + $0x424] sm:$0xf0] }
  0x5b   :  { %2627 = vmatpush.bf16.msrb.mxu1 %v3949_v47  ;;  %v4164_v47 = vld [vmem:[#allocation2 + $0x450] sm:$0xf]  ;;  %v4204_v25 = vld [vmem:[#allocation2 + $0x4a0] sm:$0xf]  ;;  %v5519_v31 = vld [vmem:[#allocation2 + $0x5a4] sm:$0xf0]  ;;  %v4141_v32 = vor.u32 %v5471_v24, %v4140_v23 }
  0x5c   :  { %2640 = vmatpush.bf16.msrb.mxu2 %v4013_v48  ;;  %v5477_v48 = vld [vmem:[#allocation2 + $0x454] sm:$0xf0]  ;;  %v4268_v28 = vld [vmem:[#allocation2 + $0x520] sm:$0xf]  ;;  %v4132_v33 = vld [vmem:[#allocation2 + $0x410] sm:$0xf] }
  0x5d   :  { %2653 = vmatpush.bf16.msrb.mxu3 %v4077_v52  ;;  %v4292_v52 = vld [vmem:[#allocation2 + $0x550] sm:$0xf]  ;;  %v4165_v56 = vor.u32 %v5477_v48, %v4164_v47  ;;  %v5469_v36 = vld [vmem:[#allocation2 + $0x414] sm:$0xf0]  ;;  %v4124_v48 = vld [vmem:[#allocation2 + $0x400] sm:$0xf] }
  0x5e   :  { %2615 = vmatpush.bf16.msrb.mxu0 %v3877_v59  ;;  %v4293_v58 = vor.u32 %v5509_v53, %v4292_v52  ;;  %v4156_v59 = vld [vmem:[#allocation2 + $0x440] sm:$0xf]  ;;  %v4196_v37 = vld [vmem:[#allocation2 + $0x490] sm:$0xf]  ;;  %v5485_v39 = vld [vmem:[#allocation2 + $0x494] sm:$0xf0]  ;;  %v4133_v49 = vor.u32 %v5469_v36, %v4132_v33 }
  0x5f   :  { %2628 = vmatpush.bf16.msrb.mxu1 %v3941_v63  ;;  %v5491_v63 = vld [vmem:[#allocation2 + $0x4c4] sm:$0xf0]  ;;  %v5517_v47 = vld [vmem:[#allocation2 + $0x594] sm:$0xf0]  ;;  %v4188_v51 = vld [vmem:[#allocation2 + $0x480] sm:$0xf]  ;;  %v4197_v53 = vor.u32 %v5485_v39, %v4196_v37 }
  0x60   :  { %2641 = vmatpush.bf16.msrb.mxu2 %v4005_v0  ;;  %v4284_v0 = vld [vmem:[#allocation2 + $0x540] sm:$0xf]  ;;  %v4221_v5 = vor.u32 %v5491_v63, %v4220_v61  ;;  %v5483_v52 = vld [vmem:[#allocation2 + $0x484] sm:$0xf0]  ;;  %v5545_v63 = vld [vmem:[#allocation2 + $0x674] sm:$0xf0] }
  0x61   :  { %2654 = vmatpush.bf16.msrb.mxu3 %v4069_v4  ;;  %v4157_v4 = vor.u32 %v5475_v60, %v4156_v59  ;;  %v4285_v6 = vor.u32 %v5507_v1, %v4284_v0  ;;  %v4252_v55 = vld [vmem:[#allocation2 + $0x500] sm:$0xf]  ;;  %v5515_v60 = vld [vmem:[#allocation2 + $0x584] sm:$0xf0]  ;;  %v4500_v0 = vld [vmem:[#allocation2 + $0x6f0] sm:$0xf] }
  0x62   :  { %2616 = vmatpush.bf16.msrb.mxu0 %v3869_v11  ;;  %v5489_v11 = vld [vmem:[#allocation2 + $0x4b4] sm:$0xf0]  ;;  %v4316_v59 = vld [vmem:[#allocation2 + $0x580] sm:$0xf]  ;;  %v156_v61 = vld [vmem:[%s6253_s0 + $0x28] sm:$0xff] }
  0x63   :  { %2629 = vmatpush.bf16.msrb.mxu1 %v3933_v16  ;;  %v4149_v16 = vor.u32 %v5473_v8, %v4148_v7  ;;  %v5561_v2 = vld [vmem:[#allocation2 + $0x6f4] sm:$0xf0]  ;;  %v4564_v3 = vld [vmem:[#allocation2 + $0x770] sm:$0xf]  ;;  %v4317_v12 = vor.u32 %v5515_v60, %v4316_v59  ;;  %v4492_v23 = vld [vmem:[#allocation2 + $0x6e0] sm:$0xf] }
  0x64   :  { %2642 = vmatpush.bf16.msrb.mxu2 %v3997_v17  ;;  %v4213_v17 = vor.u32 %v5489_v11, %v4212_v9  ;;  %v4628_v8 = vld [vmem:[#allocation2 + $0x7f0] sm:$0xf]  ;;  %v5593_v9 = vld [vmem:[#allocation2 + $0x7f4] sm:$0xf0]  ;;  %v5571_v59 = vld [vmem:[#allocation2 + $0x744] sm:$0xf0] }
  0x65   :  { %2655 = vmatpush.bf16.msrb.mxu3 %v4061_v26  ;;  %2617 = vmatmul.bf16.vlgmr.msrb.gmra.mxu0 %v6104_v41  ;;  %v4341_v26 = vor.u32 %v5521_v15, %v4340_v14  ;;  %v576_v14 = vunpack.c.h.b16 %v156_v61  ;;  %v4501_v15 = vor.u32 %v5561_v2, %v4500_v0  ;;  %v4629_v24 = vor.u32 %v5593_v9, %v4628_v8  ;;  %v4420_v37 = vld [vmem:[#allocation2 + $0x650] sm:$0xf]  ;;  %v5541_v39 = vld [vmem:[#allocation2 + $0x654] sm:$0xf0]  ;;  %v4604_v60 = vld [vmem:[#allocation2 + $0x7c0] sm:$0xf] }
  0x66   :  { %2661 = vmatpush.bf16.msra.mxu0 %v4181_v27  ;;  %2630 = vmatmul.bf16.vlgmr.msrb.gmra.mxu1 %v6108_v44  ;;  %v5487_v27 = vld [vmem:[#allocation2 + $0x4a4] sm:$0xf0]  ;;  %v5537_v2 = vld [vmem:[#allocation2 + $0x634] sm:$0xf0]  ;;  %v4596_v8 = vld [vmem:[#allocation2 + $0x7b0] sm:$0xf] }
  0x67   :  { %2674 = vmatpush.bf16.msra.mxu1 %v4245_v29  ;;  %2643 = vmatmul.bf16.vlgmr.msrb.gmra.mxu2 %v6102_v38  ;;  %v5503_v29 = vld [vmem:[#allocation2 + $0x524] sm:$0xf0]  ;;  %v6126_v33 = vpack.c.b16 %v576_v14, %v576_v14  ;;  %v5585_v9 = vld [vmem:[#allocation2 + $0x7b4] sm:$0xf0] }
  0x68   :  { %2687 = vmatpush.bf16.msra.mxu2 %v4309_v30  ;;  %2656 = vmatmul.bf16.vlgmr.msrb.gmra.mxu3 %v6106_v42  ;;  %v4332_v30 = vld [vmem:[#allocation2 + $0x5a0] sm:$0xf]  ;;  %v4269_v35 = vor.u32 %v5503_v29, %v4268_v28  ;;  %v5575_v28 = vld [vmem:[#allocation2 + $0x764] sm:$0xf0] }
  0x69   :  { %2700 = vmatpush.bf16.msra.mxu3 %v4373_v34  ;;  %v4205_v34 = vor.u32 %v5487_v27, %v4204_v25  ;;  %v4333_v40 = vor.u32 %v5519_v31, %v4332_v30  ;;  %v4556_v27 = vld [vmem:[#allocation2 + $0x760] sm:$0xf]  ;;  %v5535_v14 = vld [vmem:[#allocation2 + $0x624] sm:$0xf0] }
  0x6a   :  { %2662 = vmatpush.bf16.msra.mxu0 %v4173_v43  ;;  %v4260_v43 = vld [vmem:[#allocation2 + $0x510] sm:$0xf]  ;;  %v4620_v31 = vld [vmem:[#allocation2 + $0x7e0] sm:$0xf]  ;;  %v4557_v36 = vor.u32 %v5575_v28, %v4556_v27 }
  0x6b   :  { %2675 = vmatpush.bf16.msra.mxu1 %v4237_v45  ;;  %v5501_v45 = vld [vmem:[#allocation2 + $0x514] sm:$0xf0] }
  0x6c   :  { %2688 = vmatpush.bf16.msra.mxu2 %v4301_v46  ;;  %v4324_v46 = vld [vmem:[#allocation2 + $0x590] sm:$0xf]  ;;  %v4261_v54 = vor.u32 %v5501_v45, %v4260_v43  ;;  %v5557_v45 = vld [vmem:[#allocation2 + $0x6d4] sm:$0xf0] }
  0x6d   :  { %2701 = vmatpush.bf16.msra.mxu3 %v4365_v50  ;;  %v5467_v50 = vld [vmem:[#allocation2 + $0x404] sm:$0xf0] }
  0x6e   :  { %2663 = vmatpush.bf16.msra.mxu0 %v4165_v56  ;;  %v5499_v56 = vld [vmem:[#allocation2 + $0x504] sm:$0xf0]  ;;  %v4125_v1 = vor.u32 %v5467_v50, %v4124_v48  ;;  %v4612_v48 = vld [vmem:[#allocation2 + $0x7d0] sm:$0xf]  ;;  %v4421_v50 = vor.u32 %v5541_v39, %v4420_v37  ;;  %v5549_v37 = vld [vmem:[#allocation2 + $0x694] sm:$0xf0] }
  0x6f   :  { %2676 = vmatpush.bf16.msra.mxu1 %v4229_v57  ;;  %v155_v57 = vld [vmem:[%s6253_s0 + $0x20] sm:$0xff]  ;;  %v4253_v7 = vor.u32 %v5499_v56, %v4252_v55  ;;  %v4516_v39 = vld [vmem:[#allocation2 + $0x710] sm:$0xf] }
  0x70   :  { %2689 = vmatpush.bf16.msra.mxu2 %v4293_v58  ;;  %v4325_v58 = vor.u32 %v5517_v47, %v4324_v46  ;;  %v574_v11 = vunpack.c.h.b16 %v155_v57  ;;  %v4548_v46 = vld [vmem:[#allocation2 + $0x750] sm:$0xf]  ;;  %v5573_v47 = vld [vmem:[#allocation2 + $0x754] sm:$0xf0]  ;;  %v4476_v55 = vld [vmem:[#allocation2 + $0x6c0] sm:$0xf] }
  0x71   :  { %2702 = vmatpush.bf16.msra.mxu3 %v4357_v62  ;;  %v4436_v62 = vld [vmem:[#allocation2 + $0x670] sm:$0xf] }
  0x72   :  { %2664 = vmatpush.bf16.msra.mxu0 %v4157_v4  ;;  %v5577_v4 = vld [vmem:[#allocation2 + $0x774] sm:$0xf0]  ;;  %v4437_v13 = vor.u32 %v5545_v63, %v4436_v62  ;;  %v6124_v30 = vpack.c.b16 %v574_v11, %v574_v11 }
  0x73   :  { %2677 = vmatpush.bf16.msra.mxu1 %v4221_v5  ;;  %v573_v5 = vunpack.c.l.b16 %v155_v57  ;;  %v5555_v57 = vld [vmem:[#allocation2 + $0x6c4] sm:$0xf0] }
  0x74   :  { %2690 = vmatpush.bf16.msra.mxu2 %v4285_v6  ;;  %v4189_v6 = vor.u32 %v5483_v52, %v4188_v51  ;;  %v4549_v52 = vor.u32 %v5573_v47, %v4548_v46  ;;  %v4477_v63 = vor.u32 %v5555_v57, %v4476_v55  ;;  %v4380_v46 = vld [vmem:[#allocation2 + $0x600] sm:$0xf]  ;;  %v157_v55 = vld [vmem:[%s6253_s0 + $0x30] sm:$0xff] }
  0x75   :  { %2703 = vmatpush.bf16.msra.mxu3 %v4349_v10  ;;  %v575_v10 = vunpack.c.l.b16 %v156_v61  ;;  %v6120_v25 = vpack.c.b16 %v573_v5, %v573_v5  ;;  %v5587_v61 = vld [vmem:[#allocation2 + $0x7c4] sm:$0xf0]  ;;  %v5553_v5 = vld [vmem:[#allocation2 + $0x6b4] sm:$0xf0]  ;;  %v4572_v57 = vld [vmem:[#allocation2 + $0x780] sm:$0xf] }
  0x76   :  { %2665 = vmatpush.bf16.msra.mxu0 %v4149_v16  ;;  %v4565_v16 = vor.u32 %v5577_v4, %v4564_v3  ;;  %v4468_v3 = vld [vmem:[#allocation2 + $0x6b0] sm:$0xf]  ;;  %v4605_v4 = vor.u32 %v5587_v61, %v4604_v60  ;;  %v5609_v61 = vld [vmem:[#allocation2 + $0x874] sm:$0xf0] }
  0x77   :  { %2678 = vmatpush.bf16.msra.mxu1 %v4213_v17  ;;  %v4428_v17 = vld [vmem:[#allocation2 + $0x660] sm:$0xf]  ;;  %v6122_v29 = vpack.c.b16 %v575_v10, %v575_v10  ;;  %v4469_v11 = vor.u32 %v5553_v5, %v4468_v3  ;;  %v4692_v60 = vld [vmem:[#allocation2 + $0x870] sm:$0xf]  ;;  %v577_v3 = vunpack.c.l.b16 %v157_v55 }
  0x78   :  { %2691 = vmatpush.bf16.msra.mxu2 %v4277_v21  ;;  %v5543_v21 = vld [vmem:[#allocation2 + $0x664] sm:$0xf0] }
  0x79   :  { %2704 = vmatpush.bf16.msra.mxu3 %v4341_v26  ;;  %v5559_v26 = vld [vmem:[#allocation2 + $0x6e4] sm:$0xf0] }
  0x7a   :  { %2666 = vmatpush.bf16.msra.mxu0 %v4141_v32  ;;  %v5591_v32 = vld [vmem:[#allocation2 + $0x7e4] sm:$0xf0] }
  0x7b   :  { %2679 = vmatpush.bf16.msra.mxu1 %v4205_v34  ;;  %v4429_v34 = vor.u32 %v5543_v21, %v4428_v17  ;;  %v4621_v43 = vor.u32 %v5591_v32, %v4620_v31  ;;  %v5551_v17 = vld [vmem:[#allocation2 + $0x6a4] sm:$0xf0]  ;;  %v4524_v21 = vld [vmem:[#allocation2 + $0x720] sm:$0xf]  ;;  %v4388_v32 = vld [vmem:[#allocation2 + $0x610] sm:$0xf] }
  0x7c   :  { %2692 = vmatpush.bf16.msra.mxu2 %v4269_v35  ;;  %v4493_v35 = vor.u32 %v5559_v26, %v4492_v23  ;;  %v5567_v23 = vld [vmem:[#allocation2 + $0x724] sm:$0xf0] }
  0x7d   :  { %2705 = vmatpush.bf16.msra.mxu3 %v4333_v40  ;;  %v4484_v40 = vld [vmem:[#allocation2 + $0x6d0] sm:$0xf]  ;;  %v5583_v26 = vld [vmem:[#allocation2 + $0x7a4] sm:$0xf0]  ;;  %v4525_v31 = vor.u32 %v5567_v23, %v4524_v21  ;;  %v6138_v23 = vpack.c.b16 %v577_v3, %v577_v3 }
  0x7e   :  { %2667 = vmatpush.bf16.msra.mxu0 %v4133_v49  ;;  %v5589_v49 = vld [vmem:[#allocation2 + $0x7d4] sm:$0xf0]  ;;  %v4485_v51 = vor.u32 %v5557_v45, %v4484_v40  ;;  %v4660_v3 = vld [vmem:[#allocation2 + $0x830] sm:$0xf] }
  0x7f   :  { %2680 = vmatpush.bf16.msra.mxu1 %v4197_v53  ;;  %v4412_v53 = vld [vmem:[#allocation2 + $0x640] sm:$0xf]  ;;  %v4613_v56 = vor.u32 %v5589_v49, %v4612_v48  ;;  %v5565_v40 = vld [vmem:[#allocation2 + $0x714] sm:$0xf0]  ;;  %v5531_v48 = vld [vmem:[#allocation2 + $0x604] sm:$0xf0] }
  0x80   :  { %2693 = vmatpush.bf16.msra.mxu2 %v4261_v54  ;;  %v5539_v54 = vld [vmem:[#allocation2 + $0x644] sm:$0xf0]  ;;  %v5581_v45 = vld [vmem:[#allocation2 + $0x794] sm:$0xf0]  ;;  %v4444_v49 = vld [vmem:[#allocation2 + $0x680] sm:$0xf] }
  0x81   :  { %2706 = vmatpush.bf16.msra.mxu3 %v4325_v58  ;;  %v4540_v58 = vld [vmem:[#allocation2 + $0x740] sm:$0xf]  ;;  %v4413_v62 = vor.u32 %v5539_v54, %v4412_v53  ;;  %v5563_v54 = vld [vmem:[#allocation2 + $0x704] sm:$0xf0] }
  0x82   :  { %2668 = vmatpush.bf16.msra.mxu0 %v4125_v1  ;;  %v4541_v0 = vor.u32 %v5571_v59, %v4540_v58  ;;  %v4404_v1 = vld [vmem:[#allocation2 + $0x630] sm:$0xf]  ;;  %v4508_v53 = vld [vmem:[#allocation2 + $0x700] sm:$0xf]  ;;  %v5579_v58 = vld [vmem:[#allocation2 + $0x784] sm:$0xf0] }
  0x83   :  { %2681 = vmatpush.bf16.msra.mxu1 %v4189_v6  ;;  %v4532_v6 = vld [vmem:[#allocation2 + $0x730] sm:$0xf]  ;;  %v4405_v10 = vor.u32 %v5537_v2, %v4404_v1  ;;  %v158_v59 = vld [vmem:[%s6253_s0 + $0x38] sm:$0xff]  ;;  %v4509_v5 = vor.u32 %v5563_v54, %v4508_v53 }
  0x84   :  { %2694 = vmatpush.bf16.msra.mxu2 %v4253_v7  ;;  %v5569_v7 = vld [vmem:[#allocation2 + $0x734] sm:$0xf0]  ;;  %v4820_v1 = vld [vmem:[#allocation2 + $0x970] sm:$0xf] }
  0x85   :  { %2707 = vmatpush.bf16.msra.mxu3 %v4317_v12  ;;  %2669 = vmatmul.bf16.vlgmr.msra.gmra.mxu0 %v6120_v25  ;;  %v4533_v12 = vor.u32 %v5569_v7, %v4532_v6  ;;  %v5641_v2 = vld [vmem:[#allocation2 + $0x974] sm:$0xf0]  ;;  %v4884_v6 = vld [vmem:[#allocation2 + $0x9f0] sm:$0xf] }
  0x86   :  { %2713 = vmatpush.bf16.msrb.mxu0 %v4437_v13  ;;  %2682 = vmatmul.bf16.vlgmr.msra.gmra.mxu1 %v6124_v30  ;;  %v4396_v13 = vld [vmem:[#allocation2 + $0x620] sm:$0xf]  ;;  %v5657_v7 = vld [vmem:[#allocation2 + $0x9f4] sm:$0xf0] }
  0x87   :  { %2726 = vmatpush.bf16.msrb.mxu1 %v4501_v15  ;;  %2695 = vmatmul.bf16.vlgmr.msra.gmra.mxu2 %v6122_v29  ;;  %v4460_v15 = vld [vmem:[#allocation2 + $0x6a0] sm:$0xf]  ;;  %v4397_v27 = vor.u32 %v5535_v14, %v4396_v13  ;;  %v4821_v14 = vor.u32 %v5641_v2, %v4820_v1  ;;  %v4885_v21 = vor.u32 %v5657_v7, %v4884_v6  ;;  %v5617_v7 = vld [vmem:[#allocation2 + $0x8b4] sm:$0xf0] }
  0x88   :  { %2739 = vmatpush.bf16.msrb.mxu2 %v4565_v16  ;;  %2708 = vmatmul.bf16.vlgmr.msra.gmra.mxu3 %v6126_v33  ;;  %v4597_v16 = vor.u32 %v5585_v9, %v4596_v8  ;;  %v4461_v28 = vor.u32 %v5551_v17, %v4460_v15  ;;  %v579_v8 = vunpack.c.l.b16 %v158_v59  ;;  %v578_v9 = vunpack.c.h.b16 %v157_v55  ;;  %v4684_v15 = vld [vmem:[#allocation2 + $0x860] sm:$0xf] }
  0x89   :  { %2752 = vmatpush.bf16.msrb.mxu3 %v4629_v24  ;;  %v4588_v24 = vld [vmem:[#allocation2 + $0x7a0] sm:$0xf] }
  0x8a   :  { %2714 = vmatpush.bf16.msrb.mxu0 %v4429_v34  ;;  %v5533_v34 = vld [vmem:[#allocation2 + $0x614] sm:$0xf0]  ;;  %v4748_v17 = vld [vmem:[#allocation2 + $0x8e0] sm:$0xf] }
  0x8b   :  { %2727 = vmatpush.bf16.msrb.mxu1 %v4493_v35  ;;  %v4452_v35 = vld [vmem:[#allocation2 + $0x690] sm:$0xf]  ;;  %v4389_v47 = vor.u32 %v5533_v34, %v4388_v32  ;;  %v4876_v32 = vld [vmem:[#allocation2 + $0x9e0] sm:$0xf]  ;;  %v5655_v34 = vld [vmem:[#allocation2 + $0x9e4] sm:$0xf0] }
  0x8c   :  { %2740 = vmatpush.bf16.msrb.mxu2 %v4557_v36  ;;  %v4589_v36 = vor.u32 %v5583_v26, %v4588_v24  ;;  %v5623_v24 = vld [vmem:[#allocation2 + $0x8e4] sm:$0xf0]  ;;  %v4812_v26 = vld [vmem:[#allocation2 + $0x960] sm:$0xf] }
  0x8d   :  { %2753 = vmatpush.bf16.msrb.mxu3 %v4621_v43  ;;  %v4580_v43 = vld [vmem:[#allocation2 + $0x790] sm:$0xf]  ;;  %v4668_v55 = vld [vmem:[#allocation2 + $0x840] sm:$0xf] }
  0x8e   :  { %2715 = vmatpush.bf16.msrb.mxu0 %v4421_v50  ;;  %v5547_v50 = vld [vmem:[#allocation2 + $0x684] sm:$0xf0] }
  0x8f   :  { %2728 = vmatpush.bf16.msrb.mxu1 %v4485_v51  ;;  %v4453_v51 = vor.u32 %v5549_v37, %v4452_v35  ;;  %v4749_v37 = vor.u32 %v5623_v24, %v4748_v17  ;;  %v4716_v17 = vld [vmem:[#allocation2 + $0x8a0] sm:$0xf]  ;;  %v5615_v24 = vld [vmem:[#allocation2 + $0x8a4] sm:$0xf0] }
  0x90   :  { %2741 = vmatpush.bf16.msrb.mxu2 %v4549_v52  ;;  %v4517_v52 = vor.u32 %v5565_v40, %v4516_v39  ;;  %v4676_v40 = vld [vmem:[#allocation2 + $0x850] sm:$0xf] }
  0x91   :  { %2754 = vmatpush.bf16.msrb.mxu3 %v4613_v56  ;;  %v4581_v56 = vor.u32 %v5581_v45, %v4580_v43  ;;  %v5605_v43 = vld [vmem:[#allocation2 + $0x854] sm:$0xf0]  ;;  %v4740_v45 = vld [vmem:[#allocation2 + $0x8d0] sm:$0xf] }
  0x92   :  { %2716 = vmatpush.bf16.msrb.mxu0 %v4413_v62  ;;  %v4756_v62 = vld [vmem:[#allocation2 + $0x8f0] sm:$0xf] }
  0x93   :  { %2729 = vmatpush.bf16.msrb.mxu1 %v4477_v63  ;;  %v4381_v63 = vor.u32 %v5531_v48, %v4380_v46  ;;  %v4877_v46 = vor.u32 %v5655_v34, %v4876_v32  ;;  %v4804_v48 = vld [vmem:[#allocation2 + $0x950] sm:$0xf]  ;;  %v4844_v32 = vld [vmem:[#allocation2 + $0x9a0] sm:$0xf]  ;;  %v5647_v34 = vld [vmem:[#allocation2 + $0x9a4] sm:$0xf0] }
  0x94   :  { %2742 = vmatpush.bf16.msrb.mxu2 %v4541_v0  ;;  %v5625_v0 = vld [vmem:[#allocation2 + $0x8f4] sm:$0xf0] }
  0x95   :  { %2755 = vmatpush.bf16.msrb.mxu3 %v4605_v4  ;;  %v4445_v4 = vor.u32 %v5547_v50, %v4444_v49  ;;  %v4757_v13 = vor.u32 %v5625_v0, %v4756_v62  ;;  %v5637_v49 = vld [vmem:[#allocation2 + $0x954] sm:$0xf0]  ;;  %v4868_v50 = vld [vmem:[#allocation2 + $0x9d0] sm:$0xf]  ;;  %v4860_v62 = vld [vmem:[#allocation2 + $0x9c0] sm:$0xf] }
  0x96   :  { %2717 = vmatpush.bf16.msrb.mxu0 %v4405_v10  ;;  %v4573_v10 = vor.u32 %v5579_v58, %v4572_v57  ;;  %v4805_v54 = vor.u32 %v5637_v49, %v4804_v48  ;;  %v4732_v57 = vld [vmem:[#allocation2 + $0x8c0] sm:$0xf]  ;;  %v4772_v48 = vld [vmem:[#allocation2 + $0x910] sm:$0xf]  ;;  %v5629_v49 = vld [vmem:[#allocation2 + $0x914] sm:$0xf0] }
  0x97   :  { %2730 = vmatpush.bf16.msrb.mxu1 %v4469_v11  ;;  %v4693_v11 = vor.u32 %v5609_v61, %v4692_v60  ;;  %v4796_v60 = vld [vmem:[#allocation2 + $0x940] sm:$0xf]  ;;  %v5635_v61 = vld [vmem:[#allocation2 + $0x944] sm:$0xf0] }
  0x98   :  { %2743 = vmatpush.bf16.msrb.mxu2 %v4533_v12  ;;  %v580_v12 = vunpack.c.h.b16 %v158_v59  ;;  %v5619_v59 = vld [vmem:[#allocation2 + $0x8c4] sm:$0xf0]  ;;  %v4797_v2 = vor.u32 %v5635_v61, %v4796_v60  ;;  %v159_v61 = vld [vmem:[%s6253_s0 + $0x40] sm:$0xff] }
  0x99   :  { %2756 = vmatpush.bf16.msrb.mxu3 %v4597_v16  ;;  %v5607_v16 = vld [vmem:[#allocation2 + $0x864] sm:$0xf0]  ;;  %v4733_v1 = vor.u32 %v5619_v59, %v4732_v57  ;;  %v4764_v59 = vld [vmem:[#allocation2 + $0x900] sm:$0xf] }
  0x9a   :  { %2718 = vmatpush.bf16.msrb.mxu0 %v4397_v27  ;;  %v5639_v27 = vld [vmem:[#allocation2 + $0x964] sm:$0xf0]  ;;  %v6144_v35 = vpack.c.b16 %v580_v12, %v580_v12 }
  0x9b   :  { %2731 = vmatpush.bf16.msrb.mxu1 %v4461_v28  ;;  %v6140_v28 = vpack.c.b16 %v579_v8, %v579_v8  ;;  %v4813_v39 = vor.u32 %v5639_v27, %v4812_v26  ;;  %v4788_v8 = vld [vmem:[#allocation2 + $0x930] sm:$0xf]  ;;  %v4780_v26 = vld [vmem:[#allocation2 + $0x920] sm:$0xf]  ;;  %v5631_v27 = vld [vmem:[#allocation2 + $0x924] sm:$0xf0] }
  0x9c   :  { %2744 = vmatpush.bf16.msrb.mxu2 %v4525_v31  ;;  %v6142_v31 = vpack.c.b16 %v578_v9, %v578_v9  ;;  %v5633_v9 = vld [vmem:[#allocation2 + $0x934] sm:$0xf0]  ;;  %v5627_v60 = vld [vmem:[#allocation2 + $0x904] sm:$0xf0] }
  0x9d   :  { %2757 = vmatpush.bf16.msrb.mxu3 %v4589_v36  ;;  %v4685_v36 = vor.u32 %v5607_v16, %v4684_v15  ;;  %v4652_v15 = vld [vmem:[#allocation2 + $0x820] sm:$0xf]  ;;  %v5599_v16 = vld [vmem:[#allocation2 + $0x824] sm:$0xf0] }
  0x9e   :  { %2719 = vmatpush.bf16.msrb.mxu0 %v4389_v47  ;;  %v5621_v47 = vld [vmem:[#allocation2 + $0x8d4] sm:$0xf0] }
  0x9f   :  { %2732 = vmatpush.bf16.msrb.mxu1 %v4453_v51  ;;  %v5653_v51 = vld [vmem:[#allocation2 + $0x9d4] sm:$0xf0]  ;;  %v4741_v53 = vor.u32 %v5621_v47, %v4740_v45  ;;  %v4708_v45 = vld [vmem:[#allocation2 + $0x890] sm:$0xf] }
  0xa0   :  { %2745 = vmatpush.bf16.msrb.mxu2 %v4517_v52  ;;  %v4677_v52 = vor.u32 %v5605_v43, %v4676_v40  ;;  %v4869_v58 = vor.u32 %v5653_v51, %v4868_v50  ;;  %v4644_v40 = vld [vmem:[#allocation2 + $0x810] sm:$0xf]  ;;  %v5597_v43 = vld [vmem:[#allocation2 + $0x814] sm:$0xf0] }
  0xa1   :  { %2758 = vmatpush.bf16.msrb.mxu3 %v4581_v56  ;;  %v5603_v56 = vld [vmem:[#allocation2 + $0x844] sm:$0xf0]  ;;  %v5613_v47 = vld [vmem:[#allocation2 + $0x894] sm:$0xf0]  ;;  %v4836_v50 = vld [vmem:[#allocation2 + $0x990] sm:$0xf] }
  0xa2   :  { %2720 = vmatpush.bf16.msrb.mxu0 %v4381_v63  ;;  %v5651_v63 = vld [vmem:[#allocation2 + $0x9c4] sm:$0xf0]  ;;  %v4669_v0 = vor.u32 %v5603_v56, %v4668_v55  ;;  %v5645_v51 = vld [vmem:[#allocation2 + $0x994] sm:$0xf0]  ;;  %v4700_v55 = vld [vmem:[#allocation2 + $0x880] sm:$0xf]  ;;  %v4709_v57 = vor.u32 %v5613_v47, %v4708_v45 }
  0xa3   :  { %2733 = vmatpush.bf16.msrb.mxu1 %v4445_v4  ;;  %v5601_v4 = vld [vmem:[#allocation2 + $0x834] sm:$0xf0]  ;;  %v4861_v6 = vor.u32 %v5651_v63, %v4860_v62  ;;  %v5611_v56 = vld [vmem:[#allocation2 + $0x884] sm:$0xf0]  ;;  %v4837_v62 = vor.u32 %v5645_v51, %v4836_v50  ;;  %v4828_v63 = vld [vmem:[#allocation2 + $0x980] sm:$0xf] }
  0xa4   :  { %2746 = vmatpush.bf16.msrb.mxu2 %v4509_v5  ;;  %v4724_v5 = vld [vmem:[#allocation2 + $0x8b0] sm:$0xf]  ;;  %v4661_v12 = vor.u32 %v5601_v4, %v4660_v3  ;;  %v5673_v3 = vld [vmem:[#allocation2 + $0xa74] sm:$0xf0]  ;;  %v5132_v47 = vld [vmem:[#allocation2 + $0xbe0] sm:$0xf] }
  0xa5   :  { %2759 = vmatpush.bf16.msrb.mxu3 %v4573_v10  ;;  %2721 = vmatmul.bf16.vlgmr.msrb.gmra.mxu0 %v6138_v23  ;;  %v4852_v10 = vld [vmem:[#allocation2 + $0x9b0] sm:$0xf] }
  0xa6   :  { %2765 = vmatpush.bf16.msra.mxu0 %v4693_v11  ;;  %2734 = vmatmul.bf16.vlgmr.msrb.gmra.mxu1 %v6142_v31  ;;  %v5649_v11 = vld [vmem:[#allocation2 + $0x9b4] sm:$0xf0]  ;;  %v5012_v4 = vld [vmem:[#allocation2 + $0xaf0] sm:$0xf] }
  0xa7   :  { %2778 = vmatpush.bf16.msra.mxu1 %v4757_v13  ;;  %2747 = vmatmul.bf16.vlgmr.msrb.gmra.mxu2 %v6140_v28  ;;  %v4725_v13 = vor.u32 %v5617_v7, %v4724_v5  ;;  %v5076_v7 = vld [vmem:[#allocation2 + $0xb70] sm:$0xf] }
  0xa8   :  { %2791 = vmatpush.bf16.msra.mxu2 %v4821_v14  ;;  %2760 = vmatmul.bf16.vlgmr.msrb.gmra.mxu3 %v6144_v35  ;;  %v4789_v14 = vor.u32 %v5633_v9, %v4788_v8  ;;  %v5705_v8 = vld [vmem:[#allocation2 + $0xb74] sm:$0xf0]  ;;  %v581_v9 = vunpack.c.l.b16 %v159_v61 }
  0xa9   :  { %2804 = vmatpush.bf16.msra.mxu3 %v4885_v21  ;;  %v4853_v21 = vor.u32 %v5649_v11, %v4852_v10  ;;  %v4701_v10 = vor.u32 %v5611_v56, %v4700_v55  ;;  %v4765_v11 = vor.u32 %v5627_v60, %v4764_v59  ;;  %v4996_v55 = vld [vmem:[#allocation2 + $0xad0] sm:$0xf]  ;;  %v5701_v59 = vld [vmem:[#allocation2 + $0xb54] sm:$0xf0] }
  0xaa   :  { %2766 = vmatpush.bf16.msra.mxu0 %v4685_v36  ;;  %v4653_v36 = vor.u32 %v5599_v16, %v4652_v15  ;;  %v582_v15 = vunpack.c.h.b16 %v159_v61  ;;  %v5124_v60 = vld [vmem:[#allocation2 + $0xbd0] sm:$0xf]  ;;  %v5717_v61 = vld [vmem:[#allocation2 + $0xbd4] sm:$0xf0] }
  0xab   :  { %2779 = vmatpush.bf16.msra.mxu1 %v4749_v37  ;;  %v4717_v37 = vor.u32 %v5615_v24, %v4716_v17 }
  0xac   :  { %2792 = vmatpush.bf16.msra.mxu2 %v4813_v39  ;;  %v4781_v39 = vor.u32 %v5631_v27, %v4780_v26  ;;  %v5077_v26 = vor.u32 %v5705_v8, %v5076_v7  ;;  %v4940_v27 = vld [vmem:[#allocation2 + $0xa60] sm:$0xf]  ;;  %v5699_v7 = vld [vmem:[#allocation2 + $0xb44] sm:$0xf0] }
  0xad   :  { %2805 = vmatpush.bf16.msra.mxu3 %v4877_v46  ;;  %v4845_v46 = vor.u32 %v5647_v34, %v4844_v32  ;;  %v5671_v32 = vld [vmem:[#allocation2 + $0xa64] sm:$0xf0]  ;;  %v5004_v34 = vld [vmem:[#allocation2 + $0xae0] sm:$0xf] }
  0xae   :  { %2767 = vmatpush.bf16.msra.mxu0 %v4677_v52  ;;  %v4636_v52 = vld [vmem:[#allocation2 + $0x800] sm:$0xf]  ;;  %v4941_v50 = vor.u32 %v5671_v32, %v4940_v27  ;;  %v5108_v27 = vld [vmem:[#allocation2 + $0xbb0] sm:$0xf]  ;;  %v5713_v32 = vld [vmem:[#allocation2 + $0xbb4] sm:$0xf0] }
  0xaf   :  { %2780 = vmatpush.bf16.msra.mxu1 %v4741_v53  ;;  %v4645_v53 = vor.u32 %v5597_v43, %v4644_v40  ;;  %v5068_v40 = vld [vmem:[#allocation2 + $0xb60] sm:$0xf]  ;;  %v5703_v43 = vld [vmem:[#allocation2 + $0xb64] sm:$0xf0] }
  0xb0   :  { %2793 = vmatpush.bf16.msra.mxu2 %v4805_v54  ;;  %v5595_v54 = vld [vmem:[#allocation2 + $0x804] sm:$0xf0]  ;;  %v5116_v8 = vld [vmem:[#allocation2 + $0xbc0] sm:$0xf] }
  0xb1   :  { %2806 = vmatpush.bf16.msra.mxu3 %v4869_v58  ;;  %v4773_v58 = vor.u32 %v5629_v49, %v4772_v48  ;;  %v4637_v5 = vor.u32 %v5595_v54, %v4636_v52  ;;  %v5719_v48 = vld [vmem:[#allocation2 + $0xbe4] sm:$0xf0]  ;;  %v5069_v52 = vor.u32 %v5703_v43, %v5068_v40  ;;  %v5669_v54 = vld [vmem:[#allocation2 + $0xa54] sm:$0xf0] }
  0xb2   :  { %2768 = vmatpush.bf16.msra.mxu0 %v4669_v0  ;;  %v5643_v0 = vld [vmem:[#allocation2 + $0x984] sm:$0xf0]  ;;  %v5133_v56 = vor.u32 %v5719_v48, %v5132_v47  ;;  %v4972_v47 = vld [vmem:[#allocation2 + $0xaa0] sm:$0xf] }
  0xb3   :  { %2781 = vmatpush.bf16.msra.mxu1 %v4733_v1  ;;  %v160_v1 = vld [vmem:[%s6253_s0 + $0x48] sm:$0xff]  ;;  %v4829_v16 = vor.u32 %v5643_v0, %v4828_v63 }
  0xb4   :  { %2794 = vmatpush.bf16.msra.mxu2 %v4797_v2  ;;  %v4948_v2 = vld [vmem:[#allocation2 + $0xa70] sm:$0xf]  ;;  %v5663_v43 = vld [vmem:[#allocation2 + $0xa24] sm:$0xf0] }
  0xb5   :  { %2807 = vmatpush.bf16.msra.mxu3 %v4861_v6  ;;  %v5689_v6 = vld [vmem:[#allocation2 + $0xaf4] sm:$0xf0]  ;;  %v4949_v17 = vor.u32 %v5673_v3, %v4948_v2  ;;  %v5667_v2 = vld [vmem:[#allocation2 + $0xa44] sm:$0xf0]  ;;  %v4988_v3 = vld [vmem:[#allocation2 + $0xac0] sm:$0xf] }
  0xb6   :  { %2769 = vmatpush.bf16.msra.mxu0 %v4661_v12  ;;  %v5140_v12 = vld [vmem:[#allocation2 + $0xbf0] sm:$0xf]  ;;  %v5013_v24 = vor.u32 %v5689_v6, %v5012_v4  ;;  %v5125_v4 = vor.u32 %v5717_v61, %v5124_v60  ;;  %v5052_v6 = vld [vmem:[#allocation2 + $0xb40] sm:$0xf]  ;;  %v5661_v61 = vld [vmem:[#allocation2 + $0xa14] sm:$0xf0] }
  0xb7   :  { %2782 = vmatpush.bf16.msra.mxu1 %v4725_v13  ;;  %v5721_v13 = vld [vmem:[#allocation2 + $0xbf4] sm:$0xf0]  ;;  %v4900_v60 = vld [vmem:[#allocation2 + $0xa10] sm:$0xf] }
  0xb8   :  { %2795 = vmatpush.bf16.msra.mxu2 %v4789_v14  ;;  %v583_v14 = vunpack.c.l.b16 %v160_v1 }
  0xb9   :  { %2808 = vmatpush.bf16.msra.mxu3 %v4853_v21  ;;  %v584_v21 = vunpack.c.h.b16 %v160_v1  ;;  %v4924_v1 = vld [vmem:[#allocation2 + $0xa40] sm:$0xf] }
  0xba   :  { %2770 = vmatpush.bf16.msra.mxu0 %v4653_v36  ;;  %v5141_v36 = vor.u32 %v5721_v13, %v5140_v12  ;;  %v6158_v45 = vpack.c.b16 %v583_v14, %v583_v14  ;;  %v5053_v13 = vor.u32 %v5699_v7, %v5052_v6  ;;  %v5665_v14 = vld [vmem:[#allocation2 + $0xa34] sm:$0xf0]  ;;  %v4892_v7 = vld [vmem:[#allocation2 + $0xa00] sm:$0xf] }
  0xbb   :  { %2783 = vmatpush.bf16.msra.mxu1 %v4717_v37  ;;  %v6156_v37 = vpack.c.b16 %v581_v9, %v581_v9  ;;  %v6162_v49 = vpack.c.b16 %v584_v21, %v584_v21  ;;  %v5715_v9 = vld [vmem:[#allocation2 + $0xbc4] sm:$0xf0]  ;;  %v5044_v21 = vld [vmem:[#allocation2 + $0xb30] sm:$0xf]  ;;  %v5709_v6 = vld [vmem:[#allocation2 + $0xb94] sm:$0xf0] }
  0xbc   :  { %2796 = vmatpush.bf16.msra.mxu2 %v4781_v39  ;;  %v5687_v39 = vld [vmem:[#allocation2 + $0xae4] sm:$0xf0] }
  0xbd   :  { %2809 = vmatpush.bf16.msra.mxu3 %v4845_v46  ;;  %v6160_v46 = vpack.c.b16 %v582_v15, %v582_v15  ;;  %v5005_v51 = vor.u32 %v5687_v39, %v5004_v34  ;;  %v4980_v15 = vld [vmem:[#allocation2 + $0xab0] sm:$0xf] }
  0xbe   :  { %2771 = vmatpush.bf16.msra.mxu0 %v4645_v53  ;;  %v4932_v53 = vld [vmem:[#allocation2 + $0xa50] sm:$0xf] }
  0xbf   :  { %2784 = vmatpush.bf16.msra.mxu1 %v4709_v57  ;;  %v5685_v57 = vld [vmem:[#allocation2 + $0xad4] sm:$0xf0] }
  0xc0   :  { %2797 = vmatpush.bf16.msra.mxu2 %v4773_v58  ;;  %v5060_v58 = vld [vmem:[#allocation2 + $0xb50] sm:$0xf]  ;;  %v4997_v63 = vor.u32 %v5685_v57, %v4996_v55  ;;  %v5711_v55 = vld [vmem:[#allocation2 + $0xba4] sm:$0xf0] }
  0xc1   :  { %2810 = vmatpush.bf16.msra.mxu3 %v4837_v62  ;;  %v4933_v62 = vor.u32 %v5669_v54, %v4932_v53  ;;  %v5061_v0 = vor.u32 %v5701_v59, %v5060_v58  ;;  %v5695_v53 = vld [vmem:[#allocation2 + $0xb24] sm:$0xf0]  ;;  %v5100_v54 = vld [vmem:[#allocation2 + $0xba0] sm:$0xf] }
  0xc2   :  { %2772 = vmatpush.bf16.msra.mxu0 %v4637_v5  ;;  %v5683_v5 = vld [vmem:[#allocation2 + $0xac4] sm:$0xf0]  ;;  %v2566_v57 = vpop.f32.mrf.mxu0 }
  0xc3   :  { %2785 = vmatpush.bf16.msra.mxu1 %v4701_v10  ;;  %v4925_v10 = vor.u32 %v5667_v2, %v4924_v1  ;;  %v4989_v12 = vor.u32 %v5683_v5, %v4988_v3  ;;  %v5101_v1 = vor.u32 %v5711_v55, %v5100_v54  ;;  %v5677_v2 = vld [vmem:[#allocation2 + $0xa94] sm:$0xf0]  ;;  %v5028_v3 = vld [vmem:[#allocation2 + $0xb10] sm:$0xf] }
  0xc4   :  { %2798 = vmatpush.bf16.msra.mxu2 %v4765_v11  ;;  %v4916_v11 = vld [vmem:[#allocation2 + $0xa30] sm:$0xf] }
  0xc5   :  { %2811 = vmatpush.bf16.msra.mxu3 %v4829_v16  ;;  %2773 = vmatmul.bf16.vlgmr.msra.gmra.mxu0 %v6156_v37  ;;  %v5681_v16 = vld [vmem:[#allocation2 + $0xab4] sm:$0xf0]  ;;  %v4917_v34 = vor.u32 %v5665_v14, %v4916_v11  ;;  %v5092_v5 = vld [vmem:[#allocation2 + $0xb90] sm:$0xf]  ;;  %v4956_v11 = vld [vmem:[#allocation2 + $0xa80] sm:$0xf] }
  0xc6   :  { %2817 = vmatpush.bf16.msrb.mxu0 %v4949_v17  ;;  %2786 = vmatmul.bf16.vlgmr.msra.gmra.mxu1 %v6160_v46  ;;  %v5117_v17 = vor.u32 %v5715_v9, %v5116_v8  ;;  %v4981_v39 = vor.u32 %v5681_v16, %v4980_v15  ;;  %v4901_v9 = vor.u32 %v5661_v61, %v4900_v60  ;;  %v5020_v15 = vld [vmem:[#allocation2 + $0xb00] sm:$0xf]  ;;  %v5691_v16 = vld [vmem:[#allocation2 + $0xb04] sm:$0xf0] }
  0xc7   :  { %2830 = vmatpush.bf16.msrb.mxu1 %v5013_v24  ;;  %2799 = vmatmul.bf16.vlgmr.msra.gmra.mxu2 %v6158_v45  ;;  %v5697_v24 = vld [vmem:[#allocation2 + $0xb34] sm:$0xf0] }
  0xc8   :  { %2843 = vmatpush.bf16.msrb.mxu2 %v5077_v26  ;;  %2812 = vmatmul.bf16.vlgmr.msra.gmra.mxu3 %v6162_v49  ;;  %v547_v26 = vld [vmem:[#allocation4] sm:$0x3]  ;;  %v5045_v40 = vor.u32 %v5697_v24, %v5044_v21  ;;  %v5093_v24 = vor.u32 %v5709_v6, %v5092_v5  ;;  %v5366_v5 = vld [vmem:[#allocation2 + $0xe4] sm:$0xf] }
  0xc9   :  { %2856 = vmatpush.bf16.msrb.mxu3 %v5141_v36  ;;  %v4908_v36 = vld [vmem:[#allocation2 + $0xa20] sm:$0xf]  ;;  %v549_v48 = vperm.slane %v547_v26, 0 }
  0xca   :  { %2818 = vmatpush.bf16.msrb.mxu0 %v4941_v50  ;;  %v5109_v50 = vor.u32 %v5713_v32, %v5108_v27  ;;  %v2592_v21 = vpop.f32.mrf.mxu2  ;;  %v5084_v26 = vld [vmem:[#allocation2 + $0xb80] sm:$0xf]  ;;  %v5707_v27 = vld [vmem:[#allocation2 + $0xb84] sm:$0xf0]  ;;  %v162_v32 = vld [vmem:[%s6253_s0 + $0x58] sm:$0xff]  ;;  %v2568_v54 = vpop.f32.mrf.mxu0 }
  0xcb   :  { %2831 = vmatpush.bf16.msrb.mxu1 %v5005_v51  ;;  %v5679_v51 = vld [vmem:[#allocation2 + $0xaa4] sm:$0xf0]  ;;  %v5346_v54 = vld [vmem:[#allocation2 + $0x44] sm:$0xf] }
  0xcc   :  { %2844 = vmatpush.bf16.msrb.mxu2 %v5069_v52  ;;  %v5036_v52 = vld [vmem:[#allocation2 + $0xb20] sm:$0xf]  ;;  %v4973_v58 = vor.u32 %v5679_v51, %v4972_v47  ;;  %v3798_v51 = vld [vmem:[#allocation2 + $0x178] sm:$0xf0] }
  0xcd   :  { %2857 = vmatpush.bf16.msrb.mxu3 %v5133_v56  ;;  %v4909_v56 = vor.u32 %v5663_v43, %v4908_v36  ;;  %v5037_v59 = vor.u32 %v5695_v53, %v5036_v52  ;;  %v2605_v36 = vpop.f32.mrf.mxu3  ;;  %v5368_v43 = vld [vmem:[#allocation2 + $0xf4] sm:$0xf] }
  0xce   :  { %2819 = vmatpush.bf16.msrb.mxu0 %v4933_v62  ;;  %v4964_v62 = vld [vmem:[#allocation2 + $0xa90] sm:$0xf] }
  0xcf   :  { %2832 = vmatpush.bf16.msrb.mxu1 %v4997_v63  ;;  %v2567_v63 = vadd.f32 %v2566_v57, %v549_v48  ;;  %v3734_v48 = vld [vmem:[#allocation2 + $0xf8] sm:$0xf0]  ;;  %v5400_v57 = vld [vmem:[#allocation2 + $0x1f4] sm:$0xf] }
  0xd0   :  { %2845 = vmatpush.bf16.msrb.mxu2 %v5061_v0  ;;  %v2579_v0 = vpop.f32.mrf.mxu1 }
  0xd1   :  { %2858 = vmatpush.bf16.msrb.mxu3 %v5125_v4  ;;  %v5693_v4 = vld [vmem:[#allocation2 + $0xb14] sm:$0xf0]  ;;  %v2580_v8 = vadd.f32 %v2579_v0, %v2567_v63  ;;  %v588_v0 = vunpack.c.h.b16 %v162_v32 }
  0xd2   :  { %2820 = vmatpush.bf16.msrb.mxu0 %v4925_v10  ;;  %v5659_v10 = vld [vmem:[#allocation2 + $0xa04] sm:$0xf0]  ;;  %v5029_v14 = vor.u32 %v5693_v4, %v5028_v3  ;;  %v5350_v3 = vld [vmem:[#allocation2 + $0x64] sm:$0xf]  ;;  %v3662_v4 = vld [vmem:[#allocation2 + $0x68] sm:$0xf0] }
  0xd3   :  { %2833 = vmatpush.bf16.msrb.mxu1 %v4989_v12  ;;  %v5675_v12 = vld [vmem:[#allocation2 + $0xa84] sm:$0xf0]  ;;  %v4893_v47 = vor.u32 %v5659_v10, %v4892_v7  ;;  %v3790_v10 = vld [vmem:[#allocation2 + $0x168] sm:$0xf0] }
  0xd4   :  { %2846 = vmatpush.bf16.msrb.mxu2 %v5053_v13  ;;  %v4965_v13 = vor.u32 %v5677_v2, %v4964_v62  ;;  %v4957_v55 = vor.u32 %v5675_v12, %v4956_v11  ;;  %v5085_v62 = vor.u32 %v5707_v27, %v5084_v26  ;;  %v5348_v27 = vld [vmem:[#allocation2 + $0x54] sm:$0xf] }
  0xd5   :  { %2859 = vmatpush.bf16.msrb.mxu3 %v5117_v17  ;;  %v161_v17 = vld [vmem:[%s6253_s0 + $0x50] sm:$0xff] }
  0xd6   :  { %2821 = vmatpush.bf16.msrb.mxu0 %v4917_v34  ;;  %v2593_v34 = vadd.f32 %v2592_v21, %v2580_v8  ;;  %v585_v52 = vunpack.c.l.b16 %v161_v17  ;;  %v586_v60 = vunpack.c.h.b16 %v161_v17  ;;  %v3726_v8 = vld [vmem:[#allocation2 + $0xe8] sm:$0xf0]  ;;  %v3665_v17 = vor.u32 %v5350_v3, %v3662_v4  ;;  %v2607_v21 = vpop.f32.mrf.mxu3  ;;  %v5344_v3 = vld [vmem:[#allocation2 + $0x34] sm:$0xf]  ;;  %v3638_v4 = vld [vmem:[#allocation2 + $0x38] sm:$0xf0] }
  0xd7   :  { %2834 = vmatpush.bf16.msrb.mxu1 %v4981_v39  ;;  %v5352_v39 = vld [vmem:[#allocation2 + $0x74] sm:$0xf] }
  0xd8   :  { %2847 = vmatpush.bf16.msrb.mxu2 %v5045_v40  ;;  %v3670_v40 = vld [vmem:[#allocation2 + $0x78] sm:$0xf0]  ;;  %v6174_v53 = vadd.f32 %v2605_v36, %v2593_v34  ;;  %v2581_v61 = vpop.f32.mrf.mxu1  ;;  %v6176_v7 = vpack.c.b16 %v585_v52, %v585_v52  ;;  %v6180_v12 = vpack.c.b16 %v586_v60, %v586_v60  ;;  %v5364_v34 = vld [vmem:[#allocation2 + $0xd4] sm:$0xf]  ;;  %v3774_v60 = vld [vmem:[#allocation2 + $0x148] sm:$0xf0] }
  0xd9   :  { %2860 = vmatpush.bf16.msrb.mxu3 %v5109_v50  ;;  %v5384_v50 = vld [vmem:[#allocation2 + $0x174] sm:$0xf]  ;;  %v3673_v63 = vor.u32 %v5352_v39, %v3670_v40  ;;  %v3718_v39 = vld [vmem:[#allocation2 + $0xd8] sm:$0xf0]  ;;  %v5394_v61 = vld [vmem:[#allocation2 + $0x1c4] sm:$0xf] }
  0xda   :  { %2822 = vmatpush.bf16.msrb.mxu0 %v4909_v56  ;;  %v5021_v56 = vor.u32 %v5691_v16, %v5020_v15  ;;  %v3801_v2 = vor.u32 %v5384_v50, %v3798_v51  ;;  %v2594_v15 = vpop.f32.mrf.mxu2  ;;  %v6182_v16 = vpack.c.b16 %v588_v0, %v588_v0  ;;  %v5380_v40 = vld [vmem:[#allocation2 + $0x154] sm:$0xf]  ;;  %v3721_v51 = vor.u32 %v5364_v34, %v3718_v39  ;;  %v3630_v34 = vld [vmem:[#allocation2 + $0x28] sm:$0xf0] }
  0xdb   :  { %2835 = vmatpush.bf16.msrb.mxu1 %v4973_v58  ;;  %v3862_v58 = vld [vmem:[#allocation2 + $0x1f8] sm:$0xf0]  ;;  %v5392_v15 = vld [vmem:[#allocation2 + $0x1b4] sm:$0xf] }
  0xdc   :  { %2848 = vmatpush.bf16.msrb.mxu2 %v5037_v59  ;;  %v587_v59 = vunpack.c.l.b16 %v162_v32  ;;  %v3865_v6 = vor.u32 %v5400_v57, %v3862_v58  ;;  %v3654_v32 = vld [vmem:[#allocation2 + $0x58] sm:$0xf0]  ;;  %v3710_v58 = vld [vmem:[#allocation2 + $0xc8] sm:$0xf0] }
  0xdd   :  { %2861 = vmatpush.bf16.msrb.mxu3 %v5101_v1  ;;  %v3737_v1 = vor.u32 %v5368_v43, %v3734_v48  ;;  %v3782_v43 = vld [vmem:[#allocation2 + $0x158] sm:$0xf0]  ;;  %v3657_v50 = vor.u32 %v5348_v27, %v3654_v32  ;;  %v5342_v32 = vld [vmem:[#allocation2 + $0x24] sm:$0xf] }
  0xde   :  { %2823 = vmatpush.bf16.msrb.mxu0 %v4901_v9  ;;  %v5382_v9 = vld [vmem:[#allocation2 + $0x164] sm:$0xf]  ;;  %v6178_v11 = vpack.c.b16 %v587_v59, %v587_v59  ;;  %v3846_v48 = vld [vmem:[#allocation2 + $0x1d8] sm:$0xf0]  ;;  %v3785_v52 = vor.u32 %v5380_v40, %v3782_v43  ;;  %v3694_v40 = vld [vmem:[#allocation2 + $0xa8] sm:$0xf0] }
  0xdf   :  { %2836 = vmatpush.bf16.msrb.mxu1 %v4965_v13  ;;  %v5398_v13 = vld [vmem:[#allocation2 + $0x1e4] sm:$0xf]  ;;  %v3793_v26 = vor.u32 %v5382_v9, %v3790_v10  ;;  %v3702_v10 = vld [vmem:[#allocation2 + $0xb8] sm:$0xf0] }
  0xe0   :  { %2849 = vmatpush.bf16.msrb.mxu2 %v5029_v14  ;;  %v3854_v14 = vld [vmem:[#allocation2 + $0x1e8] sm:$0xf0]  ;;  %v5378_v59 = vld [vmem:[#allocation2 + $0x144] sm:$0xf] }
  0xe1   :  { %2862 = vmatpush.bf16.msrb.mxu3 %v5093_v24  ;;  %v3729_v24 = vor.u32 %v5366_v5, %v3726_v8  ;;  %v3857_v36 = vor.u32 %v5398_v13, %v3854_v14  ;;  %v5360_v5 = vld [vmem:[#allocation2 + $0xb4] sm:$0xf]  ;;  %v3766_v14 = vld [vmem:[#allocation2 + $0x138] sm:$0xf0]  ;;  %v5374_v43 = vld [vmem:[#allocation2 + $0x124] sm:$0xf] }
  0xe2   :  { %2824 = vmatpush.bf16.msrb.mxu0 %v4893_v47  ;;  %v5396_v47 = vld [vmem:[#allocation2 + $0x1d4] sm:$0xf]  ;;  %v2618_v0 = vpop.f32.mrf.mxu0 }
  0xe3   :  { %2837 = vmatpush.bf16.msrb.mxu1 %v4957_v55  ;;  %v3646_v55 = vld [vmem:[#allocation2 + $0x48] sm:$0xf0]  ;;  %v3849_v57 = vor.u32 %v5396_v47, %v3846_v48  ;;  %v2631_v8 = vpop.f32.mrf.mxu1  ;;  %v5376_v13 = vld [vmem:[#allocation2 + $0x134] sm:$0xf] }
  0xe4   :  { %2850 = vmatpush.bf16.msrb.mxu2 %v5021_v56  ;;  %v5362_v56 = vld [vmem:[#allocation2 + $0xc4] sm:$0xf]  ;;  %v3769_v27 = vor.u32 %v5376_v13, %v3766_v14  ;;  %v3758_v47 = vld [vmem:[#allocation2 + $0x128] sm:$0xf0] }
  0xe5   :  { %2863 = vmatpush.bf16.msrb.mxu3 %v5085_v62  ;;  %2825 = vmatmul.bf16.vlgmr.msrb.gmra.mxu0 %v6176_v7  ;;  %v3838_v62 = vld [vmem:[#allocation2 + $0x1c8] sm:$0xf0]  ;;  %v5354_v13 = vld [vmem:[#allocation2 + $0x84] sm:$0xf] }
  0xe6   :  { %2869 = vmatpush.bf16.msra.mxu0 %v3673_v63  ;;  %2838 = vmatmul.bf16.vlgmr.msrb.gmra.mxu1 %v6180_v12  ;;  %v3649_v63 = vor.u32 %v5346_v54, %v3646_v55  ;;  %v3841_v9 = vor.u32 %v5394_v61, %v3838_v62  ;;  %v3633_v54 = vor.u32 %v5342_v32, %v3630_v34  ;;  %v5356_v61 = vld [vmem:[#allocation2 + $0x94] sm:$0xf]  ;;  %v3678_v14 = vld [vmem:[#allocation2 + $0x88] sm:$0xf0] }
  0xe7   :  { %2882 = vmatpush.bf16.msra.mxu1 %v3737_v1  ;;  %2851 = vmatmul.bf16.vlgmr.msrb.gmra.mxu2 %v6178_v11  ;;  %v3713_v1 = vor.u32 %v5362_v56, %v3710_v58  ;;  %v3761_v58 = vor.u32 %v5374_v43, %v3758_v47  ;;  %v5416_v34 = vld [vmem:[#allocation2 + $0x274] sm:$0xf]  ;;  %v4054_v47 = vld [vmem:[#allocation2 + $0x378] sm:$0xf0] }
  0xe8   :  { %2895 = vmatpush.bf16.msra.mxu2 %v3801_v2  ;;  %2864 = vmatmul.bf16.vlgmr.msrb.gmra.mxu3 %v6182_v16  ;;  %v3777_v2 = vor.u32 %v5378_v59, %v3774_v60  ;;  %v5340_v59 = vld [vmem:[#allocation2 + $0x14] sm:$0xf]  ;;  %v3622_v60 = vld [vmem:[#allocation2 + $0x18] sm:$0xf0] }
  0xe9   :  { %2908 = vmatpush.bf16.msra.mxu3 %v3865_v6  ;;  %v2619_v6 = vadd.f32 %v2618_v0, %v6174_v53  ;;  %v3686_v0 = vld [vmem:[#allocation2 + $0x98] sm:$0xf0]  ;;  %v5448_v43 = vld [vmem:[#allocation2 + $0x374] sm:$0xf] }
  0xea   :  { %2870 = vmatpush.bf16.msra.mxu0 %v3665_v17  ;;  %v3830_v17 = vld [vmem:[#allocation2 + $0x1b8] sm:$0xf0]  ;;  %v2644_v39 = vpop.f32.mrf.mxu2  ;;  %v2620_v56 = vpop.f32.mrf.mxu0 }
  0xeb   :  { %2883 = vmatpush.bf16.msra.mxu1 %v3729_v24  ;;  %v2632_v21 = vadd.f32 %v2631_v8, %v2619_v6  ;;  %v3641_v24 = vor.u32 %v5344_v3, %v3638_v4  ;;  %v3833_v53 = vor.u32 %v5392_v15, %v3830_v17  ;;  %v2633_v62 = vpop.f32.mrf.mxu1  ;;  %v5388_v3 = vld [vmem:[#allocation2 + $0x194] sm:$0xf]  ;;  %v3814_v4 = vld [vmem:[#allocation2 + $0x198] sm:$0xf0]  ;;  %v5338_v6 = vld [vmem:[#allocation2 + $0x4] sm:$0xf] }
  0xec   :  { %2896 = vmatpush.bf16.msra.mxu2 %v3793_v26  ;;  %v3705_v26 = vor.u32 %v5360_v5, %v3702_v10  ;;  %v3625_v5 = vor.u32 %v5340_v59, %v3622_v60  ;;  %v3614_v8 = vld [vmem:[#allocation2 + $0x8] sm:$0xf0]  ;;  %v5370_v15 = vld [vmem:[#allocation2 + $0x104] sm:$0xf] }
  0xed   :  { %2909 = vmatpush.bf16.msra.mxu3 %v3857_v36  ;;  %v5358_v36 = vld [vmem:[#allocation2 + $0xa4] sm:$0xf]  ;;  %v2645_v48 = vadd.f32 %v2644_v39, %v2632_v21  ;;  %v3817_v21 = vor.u32 %v5388_v3, %v3814_v4  ;;  %v5432_v39 = vld [vmem:[#allocation2 + $0x2f4] sm:$0xf]  ;;  %v3918_v60 = vld [vmem:[#allocation2 + $0x268] sm:$0xf0] }
  0xee   :  { %2871 = vmatpush.bf16.msra.mxu0 %v3657_v50  ;;  %v2657_v50 = vpop.f32.mrf.mxu3  ;;  %v5414_v59 = vld [vmem:[#allocation2 + $0x264] sm:$0xf]  ;;  %v4110_v3 = vld [vmem:[#allocation2 + $0x3e8] sm:$0xf0] }
  0xef   :  { %2884 = vmatpush.bf16.msra.mxu1 %v3721_v51  ;;  %v5390_v51 = vld [vmem:[#allocation2 + $0x1a4] sm:$0xf]  ;;  %v6189_v55 = vadd.f32 %v2657_v50, %v2645_v48  ;;  %v3681_v48 = vor.u32 %v5354_v13, %v3678_v14  ;;  %v3921_v4 = vor.u32 %v5414_v59, %v3918_v60  ;;  %v3974_v14 = vld [vmem:[#allocation2 + $0x2d8] sm:$0xf0] }
  0xf0   :  { %2897 = vmatpush.bf16.msra.mxu2 %v3785_v52  ;;  %v3822_v52 = vld [vmem:[#allocation2 + $0x1a8] sm:$0xf0]  ;;  %v3958_v60 = vld [vmem:[#allocation2 + $0x2b8] sm:$0xf0] }
  0xf1   :  { %2910 = vmatpush.bf16.msra.mxu3 %v3849_v57  ;;  %v3697_v57 = vor.u32 %v5358_v36, %v3694_v40  ;;  %v3926_v36 = vld [vmem:[#allocation2 + $0x278] sm:$0xf0] }
  0xf2   :  { %2872 = vmatpush.bf16.msra.mxu0 %v3649_v63  ;;  %v3825_v63 = vor.u32 %v5390_v51, %v3822_v52  ;;  %v2646_v17 = vpop.f32.mrf.mxu2  ;;  %v3990_v40 = vld [vmem:[#allocation2 + $0x2f8] sm:$0xf0]  ;;  %v5464_v51 = vld [vmem:[#allocation2 + $0x3f4] sm:$0xf]  ;;  %v3929_v56 = vor.u32 %v5416_v34, %v3926_v36  ;;  %v5410_v34 = vld [vmem:[#allocation2 + $0x244] sm:$0xf] }
  0xf3   :  { %2885 = vmatpush.bf16.msra.mxu1 %v3713_v1  ;;  %v5372_v1 = vld [vmem:[#allocation2 + $0x114] sm:$0xf]  ;;  %v4118_v52 = vld [vmem:[#allocation2 + $0x3f8] sm:$0xf0]  ;;  %v3902_v36 = vld [vmem:[#allocation2 + $0x248] sm:$0xf0] }
  0xf4   :  { %2898 = vmatpush.bf16.msra.mxu2 %v3777_v2  ;;  %v3750_v2 = vld [vmem:[#allocation2 + $0x118] sm:$0xf0]  ;;  %v4121_v62 = vor.u32 %v5464_v51, %v4118_v52 }
  0xf5   :  { %2911 = vmatpush.bf16.msra.mxu3 %v3841_v9  ;;  %v3689_v9 = vor.u32 %v5356_v61, %v3686_v0  ;;  %v3753_v10 = vor.u32 %v5372_v1, %v3750_v2  ;;  %v5430_v61 = vld [vmem:[#allocation2 + $0x2e4] sm:$0xf]  ;;  %v4046_v1 = vld [vmem:[#allocation2 + $0x368] sm:$0xf0]  ;;  %v4038_v17 = vld [vmem:[#allocation2 + $0x358] sm:$0xf0] }
  0xf6   :  { %2873 = vmatpush.bf16.msra.mxu0 %v3641_v24  ;;  %v3742_v24 = vld [vmem:[#allocation2 + $0x108] sm:$0xf0]  ;;  %v2659_v32 = vpop.f32.mrf.mxu3  ;;  %v5446_v0 = vld [vmem:[#allocation2 + $0x364] sm:$0xf] }
  0xf7   :  { %2886 = vmatpush.bf16.msra.mxu1 %v3705_v26  ;;  %v5386_v26 = vld [vmem:[#allocation2 + $0x184] sm:$0xf]  ;;  %v3745_v50 = vor.u32 %v5370_v15, %v3742_v24  ;;  %v5444_v15 = vld [vmem:[#allocation2 + $0x354] sm:$0xf]  ;;  %v4102_v24 = vld [vmem:[#allocation2 + $0x3d8] sm:$0xf0] }
  0xf8   :  { %2899 = vmatpush.bf16.msra.mxu2 %v3769_v27  ;;  %v3806_v27 = vld [vmem:[#allocation2 + $0x188] sm:$0xf0]  ;;  %v5462_v2 = vld [vmem:[#allocation2 + $0x3e4] sm:$0xf]  ;;  %v4041_v32 = vor.u32 %v5444_v15, %v4038_v17 }
  0xf9   :  { %2912 = vmatpush.bf16.msra.mxu3 %v3833_v53  ;;  %v3617_v53 = vor.u32 %v5338_v6, %v3614_v8  ;;  %v4049_v6 = vor.u32 %v5446_v0, %v4046_v1  ;;  %v5412_v8 = vld [vmem:[#allocation2 + $0x254] sm:$0xf]  ;;  %v4113_v13 = vor.u32 %v5462_v2, %v4110_v3  ;;  %v4086_v0 = vld [vmem:[#allocation2 + $0x3b8] sm:$0xf0]  ;;  %v5406_v3 = vld [vmem:[#allocation2 + $0x224] sm:$0xf] }
  0xfa   :  { %2874 = vmatpush.bf16.msra.mxu0 %v3633_v54  ;;  %v3809_v54 = vor.u32 %v5386_v26, %v3806_v27  ;;  %v5454_v17 = vld [vmem:[#allocation2 + $0x3a4] sm:$0xf] }
  0xfb   :  { %2887 = vmatpush.bf16.msra.mxu1 %v3697_v57  ;;  %v3993_v57 = vor.u32 %v5432_v39, %v3990_v40  ;;  %v5426_v39 = vld [vmem:[#allocation2 + $0x2c4] sm:$0xf] }
  0xfc   :  { %2900 = vmatpush.bf16.msra.mxu2 %v3761_v58  ;;  %v4057_v58 = vor.u32 %v5448_v43, %v4054_v47  ;;  %v5442_v40 = vld [vmem:[#allocation2 + $0x344] sm:$0xf]  ;;  %v4030_v43 = vld [vmem:[#allocation2 + $0x348] sm:$0xf0] }
  0xfd   :  { %2913 = vmatpush.bf16.msra.mxu3 %v3825_v63  ;;  %v3982_v63 = vld [vmem:[#allocation2 + $0x2e8] sm:$0xf0]  ;;  %v4033_v52 = vor.u32 %v5442_v40, %v4030_v43  ;;  %v3942_v43 = vld [vmem:[#allocation2 + $0x298] sm:$0xf0] }
  0xfe   :  { %2875 = vmatpush.bf16.msra.mxu0 %v3625_v5  ;;  %v3985_v5 = vor.u32 %v5430_v61, %v3982_v63  ;;  %v5440_v61 = vld [vmem:[#allocation2 + $0x334] sm:$0xf] }
  0xff   :  { %2888 = vmatpush.bf16.msra.mxu1 %v3689_v9  ;;  %v3910_v9 = vld [vmem:[#allocation2 + $0x258] sm:$0xf0]  ;;  %v5456_v63 = vld [vmem:[#allocation2 + $0x3b4] sm:$0xf] }
 0x100   :  { %2901 = vmatpush.bf16.msra.mxu2 %v3753_v10  ;;  %v5428_v10 = vld [vmem:[#allocation2 + $0x2d4] sm:$0xf]  ;;  %v3913_v26 = vor.u32 %v5412_v8, %v3910_v9  ;;  %v3950_v9 = vld [vmem:[#allocation2 + $0x2a8] sm:$0xf0] }
 0x101   :  { %2914 = vmatpush.bf16.msra.mxu3 %v3817_v21  ;;  %v5460_v21 = vld [vmem:[#allocation2 + $0x3d4] sm:$0xf]  ;;  %v3977_v27 = vor.u32 %v5428_v10, %v3974_v14  ;;  %v5438_v10 = vld [vmem:[#allocation2 + $0x324] sm:$0xf] }
 0x102   :  { %2876 = vmatpush.bf16.msra.mxu0 %v3617_v53  ;;  %v4105_v53 = vor.u32 %v5460_v21, %v4102_v24  ;;  %v2670_v47 = vpop.f32.mrf.mxu0  ;;  %v4078_v21 = vld [vmem:[#allocation2 + $0x3a8] sm:$0xf0] }
 0x103   :  { %2889 = vmatpush.bf16.msra.mxu1 %v3681_v48  ;;  %v4094_v48 = vld [vmem:[#allocation2 + $0x3c8] sm:$0xf0]  ;;  %v4081_v40 = vor.u32 %v5454_v17, %v4078_v21 }
 0x104   :  { %2902 = vmatpush.bf16.msra.mxu2 %v3745_v50  ;;  %v3905_v50 = vor.u32 %v5410_v34, %v3902_v36 }
 0x105   :  { %2915 = vmatpush.bf16.msra.mxu3 %v3809_v54  ;;  %2877 = vmatmul.bf16.vlgmr.msra.gmra.mxu0 %v6086_v19  ;;  %v5458_v19 = vld [vmem:[#allocation2 + $0x3c4] sm:$0xf]  ;;  %v5408_v54 = vld [vmem:[#allocation2 + $0x234] sm:$0xf] }
 0x106   :  { %2921 = vmatpush.bf16.msrb.mxu0 %v3929_v56  ;;  %2890 = vmatmul.bf16.vlgmr.msra.gmra.mxu1 %v6090_v22  ;;  %v2683_v22 = vpop.f32.mrf.mxu1  ;;  %v3894_v56 = vld [vmem:[#allocation2 + $0x238] sm:$0xf0] }
 0x107   :  { %2934 = vmatpush.bf16.msrb.mxu1 %v3993_v57  ;;  %2903 = vmatmul.bf16.vlgmr.msra.gmra.mxu2 %v6084_v18  ;;  %v3966_v18 = vld [vmem:[#allocation2 + $0x2c8] sm:$0xf0]  ;;  %v5424_v57 = vld [vmem:[#allocation2 + $0x2b4] sm:$0xf]  ;;  %v3897_v1 = vor.u32 %v5408_v54, %v3894_v56  ;;  %v5418_v56 = vld [vmem:[#allocation2 + $0x284] sm:$0xf] }
 0x108   :  { %2947 = vmatpush.bf16.msrb.mxu2 %v4057_v58  ;;  %2916 = vmatmul.bf16.vlgmr.msra.gmra.mxu3 %v6088_v20  ;;  %v2671_v20 = vadd.f32 %v2670_v47, %v6189_v55  ;;  %v3969_v51 = vor.u32 %v5426_v39, %v3966_v18  ;;  %v4097_v58 = vor.u32 %v5458_v19, %v4094_v48  ;;  %v5404_v39 = vld [vmem:[#allocation2 + $0x214] sm:$0xf]  ;;  %v4006_v19 = vld [vmem:[#allocation2 + $0x318] sm:$0xf0] }
 0x109   :  { %2960 = vmatpush.bf16.msrb.mxu3 %v4121_v62  ;;  %v4022_v62 = vld [vmem:[#allocation2 + $0x338] sm:$0xf0]  ;;  %v3961_v55 = vor.u32 %v5424_v57, %v3958_v60  ;;  %v5420_v18 = vld [vmem:[#allocation2 + $0x294] sm:$0xf]  ;;  %v3934_v57 = vld [vmem:[#allocation2 + $0x288] sm:$0xf0] }
 0x10a   :  { %2922 = vmatpush.bf16.msrb.mxu0 %v3921_v4  ;;  %v2684_v59 = vadd.f32 %v2683_v22, %v2671_v20  ;;  %v4025_v2 = vor.u32 %v5440_v61, %v4022_v62  ;;  %v3886_v4 = vld [vmem:[#allocation2 + $0x228] sm:$0xf0]  ;;  %v2696_v8 = vpop.f32.mrf.mxu2  ;;  %v2672_v24 = vpop.f32.mrf.mxu0  ;;  %v5436_v47 = vld [vmem:[#allocation2 + $0x314] sm:$0xf]  ;;  %v4070_v20 = vld [vmem:[#allocation2 + $0x398] sm:$0xf0] }
 0x10b   :  { %2935 = vmatpush.bf16.msrb.mxu1 %v3985_v5  ;;  %v5422_v5 = vld [vmem:[#allocation2 + $0x2a4] sm:$0xf]  ;;  %v2709_v15 = vpop.f32.mrf.mxu3  ;;  %v5452_v48 = vld [vmem:[#allocation2 + $0x394] sm:$0xf]  ;;  %v4009_v54 = vor.u32 %v5436_v47, %v4006_v19  ;;  %v3998_v60 = vld [vmem:[#allocation2 + $0x308] sm:$0xf0] }
 0x10c   :  { %2948 = vmatpush.bf16.msrb.mxu2 %v4049_v6  ;;  %v4089_v6 = vor.u32 %v5456_v63, %v4086_v0  ;;  %v2697_v14 = vadd.f32 %v2696_v8, %v2684_v59  ;;  %v3953_v34 = vor.u32 %v5422_v5, %v3950_v9  ;;  %v5402_v22 = vld [vmem:[#allocation2 + $0x204] sm:$0xf]  ;;  %v4073_v59 = vor.u32 %v5452_v48, %v4070_v20  ;;  %v4062_v62 = vld [vmem:[#allocation2 + $0x388] sm:$0xf0]  ;;  %v5480_v0 = vld [vmem:[#allocation2 + $0x474] sm:$0xf] }
 0x10d   :  { %2961 = vmatpush.bf16.msrb.mxu3 %v4113_v13  ;;  %v4014_v13 = vld [vmem:[#allocation2 + $0x328] sm:$0xf0]  ;;  %v5450_v61 = vld [vmem:[#allocation2 + $0x384] sm:$0xf]  ;;  %v5512_v5 = vld [vmem:[#allocation2 + $0x574] sm:$0xf]  ;;  %v3937_v8 = vor.u32 %v5418_v56, %v3934_v57 }
 0x10e   :  { %2923 = vmatpush.bf16.msrb.mxu0 %v3913_v26  ;;  %v3889_v26 = vor.u32 %v5406_v3, %v3886_v4  ;;  %v4017_v36 = vor.u32 %v5438_v10, %v4014_v13  ;;  %v4246_v4 = vld [vmem:[#allocation2 + $0x4f8] sm:$0xf0]  ;;  %v5528_v10 = vld [vmem:[#allocation2 + $0x5f4] sm:$0xf]  ;;  %v5478_v24 = vld [vmem:[#allocation2 + $0x464] sm:$0xf] }
 0x10f   :  { %2936 = vmatpush.bf16.msrb.mxu1 %v3977_v27  ;;  %v2685_v27 = vpop.f32.mrf.mxu1  ;;  %v4374_v13 = vld [vmem:[#allocation2 + $0x5f8] sm:$0xf0]  ;;  %v5476_v48 = vld [vmem:[#allocation2 + $0x454] sm:$0xf] }
 0x110   :  { %2949 = vmatpush.bf16.msrb.mxu2 %v4041_v32  ;;  %v6196_v32 = vadd.f32 %v2709_v15, %v2697_v14  ;;  %v4065_v14 = vor.u32 %v5450_v61, %v4062_v62  ;;  %v5494_v27 = vld [vmem:[#allocation2 + $0x4e4] sm:$0xf]  ;;  %v4166_v20 = vld [vmem:[#allocation2 + $0x458] sm:$0xf0]  ;;  %v5524_v56 = vld [vmem:[#allocation2 + $0x5d4] sm:$0xf] }
 0x111   :  { %2962 = vmatpush.bf16.msrb.mxu3 %v4105_v53  ;;  %v3878_v53 = vld [vmem:[#allocation2 + $0x218] sm:$0xf0]  ;;  %v5474_v61 = vld [vmem:[#allocation2 + $0x444] sm:$0xf]  ;;  %v4158_v62 = vld [vmem:[#allocation2 + $0x448] sm:$0xf0] }
 0x112   :  { %2924 = vmatpush.bf16.msrb.mxu0 %v3905_v50  ;;  %v3881_v50 = vor.u32 %v5404_v39, %v3878_v53  ;;  %v2698_v63 = vpop.f32.mrf.mxu2  ;;  %v5510_v39 = vld [vmem:[#allocation2 + $0x564] sm:$0xf]  ;;  %v4302_v53 = vld [vmem:[#allocation2 + $0x568] sm:$0xf0]  ;;  %v4358_v57 = vld [vmem:[#allocation2 + $0x5d8] sm:$0xf0] }
 0x113   :  { %2937 = vmatpush.bf16.msrb.mxu1 %v3969_v51  ;;  %v3870_v51 = vld [vmem:[#allocation2 + $0x208] sm:$0xf0]  ;;  %v4305_v19 = vor.u32 %v5510_v39, %v4302_v53  ;;  %v4361_v63 = vor.u32 %v5524_v56, %v4358_v57  ;;  %v5486_v53 = vld [vmem:[#allocation2 + $0x4a4] sm:$0xf] }
 0x114   :  { %2950 = vmatpush.bf16.msrb.mxu2 %v4033_v52  ;;  %v3945_v52 = vor.u32 %v5420_v18, %v3942_v43  ;;  %v3873_v3 = vor.u32 %v5402_v22, %v3870_v51  ;;  %v5526_v18 = vld [vmem:[#allocation2 + $0x5e4] sm:$0xf]  ;;  %v4230_v51 = vld [vmem:[#allocation2 + $0x4d8] sm:$0xf0]  ;;  %v4142_v39 = vld [vmem:[#allocation2 + $0x428] sm:$0xf0] }
 0x115   :  { %2963 = vmatpush.bf16.msrb.mxu3 %v4097_v58  ;;  %v5434_v58 = vld [vmem:[#allocation2 + $0x304] sm:$0xf] }
 0x116   :  { %2925 = vmatpush.bf16.msrb.mxu0 %v3897_v1  ;;  %v4182_v1 = vld [vmem:[#allocation2 + $0x478] sm:$0xf0]  ;;  %v4001_v9 = vor.u32 %v5434_v58, %v3998_v60  ;;  %v4169_v58 = vor.u32 %v5476_v48, %v4166_v20 }
 0x117   :  { %2938 = vmatpush.bf16.msrb.mxu1 %v3961_v55  ;;  %v5496_v55 = vld [vmem:[#allocation2 + $0x4f4] sm:$0xf]  ;;  %v4185_v15 = vor.u32 %v5480_v0, %v4182_v1  ;;  %v4222_v0 = vld [vmem:[#allocation2 + $0x4c8] sm:$0xf0]  ;;  %v5506_v1 = vld [vmem:[#allocation2 + $0x544] sm:$0xf] }
 0x118   :  { %2951 = vmatpush.bf16.msrb.mxu2 %v4025_v2  ;;  %v2711_v2 = vpop.f32.mrf.mxu3  ;;  %v4249_v17 = vor.u32 %v5496_v55, %v4246_v4  ;;  %v4286_v55 = vld [vmem:[#allocation2 + $0x548] sm:$0xf0]  ;;  %v4161_v4 = vor.u32 %v5474_v61, %v4158_v62  ;;  %v5484_v61 = vld [vmem:[#allocation2 + $0x494] sm:$0xf] }
 0x119   :  { %2964 = vmatpush.bf16.msrb.mxu3 %v4089_v6  ;;  %v4310_v6 = vld [vmem:[#allocation2 + $0x578] sm:$0xf0] }
 0x11a   :  { %2926 = vmatpush.bf16.msrb.mxu0 %v3889_v26  ;;  %v4313_v21 = vor.u32 %v5512_v5, %v4310_v6  ;;  %v4174_v26 = vld [vmem:[#allocation2 + $0x468] sm:$0xf0]  ;;  %v4289_v6 = vor.u32 %v5506_v1, %v4286_v55  ;;  %v5516_v1 = vld [vmem:[#allocation2 + $0x594] sm:$0xf]  ;;  %v4326_v55 = vld [vmem:[#allocation2 + $0x598] sm:$0xf0] }
 0x11b   :  { %2939 = vmatpush.bf16.msrb.mxu1 %v3953_v34  ;;  %v4377_v34 = vor.u32 %v5528_v10, %v4374_v13  ;;  %v4177_v43 = vor.u32 %v5478_v24, %v4174_v26  ;;  %v5488_v10 = vld [vmem:[#allocation2 + $0x4b4] sm:$0xf]  ;;  %v4342_v26 = vld [vmem:[#allocation2 + $0x5b8] sm:$0xf0] }
 0x11c   :  { %2952 = vmatpush.bf16.msrb.mxu2 %v4017_v36  ;;  %v4238_v36 = vld [vmem:[#allocation2 + $0x4e8] sm:$0xf0]  ;;  %v5520_v24 = vld [vmem:[#allocation2 + $0x5b4] sm:$0xf] }
 0x11d   :  { %2965 = vmatpush.bf16.msrb.mxu3 %v4081_v40  ;;  %v4366_v40 = vld [vmem:[#allocation2 + $0x5e8] sm:$0xf0]  ;;  %v4241_v47 = vor.u32 %v5494_v27, %v4238_v36  ;;  %v5470_v36 = vld [vmem:[#allocation2 + $0x424] sm:$0xf] }
 0x11e   :  { %2927 = vmatpush.bf16.msrb.mxu0 %v3881_v50  ;;  %v5492_v50 = vld [vmem:[#allocation2 + $0x4d4] sm:$0xf]  ;;  %v4369_v22 = vor.u32 %v5526_v18, %v4366_v40  ;;  %v4345_v18 = vor.u32 %v5520_v24, %v4342_v26 }
 0x11f   :  { %2940 = vmatpush.bf16.msrb.mxu1 %v3945_v52  ;;  %v5508_v52 = vld [vmem:[#allocation2 + $0x554] sm:$0xf] }
 0x120   :  { %2953 = vmatpush.bf16.msrb.mxu2 %v4009_v54  ;;  %v4294_v54 = vld [vmem:[#allocation2 + $0x558] sm:$0xf0] }
 0x121   :  { %2966 = vmatpush.bf16.msrb.mxu3 %v4073_v59  ;;  %v4233_v59 = vor.u32 %v5492_v50, %v4230_v51  ;;  %v4297_v60 = vor.u32 %v5508_v52, %v4294_v54  ;;  %v5518_v50 = vld [vmem:[#allocation2 + $0x5a4] sm:$0xf]  ;;  %v4145_v52 = vor.u32 %v5470_v36, %v4142_v39 }
 0x122   :  { %2928 = vmatpush.bf16.msrb.mxu0 %v3873_v3  ;;  %v2722_v2 = vpop.f32.mrf.mxu0  ;;  %v4350_v3 = vld [vmem:[#allocation2 + $0x5c8] sm:$0xf0] }
 0x123   :  { %2941 = vmatpush.bf16.msrb.mxu1 %v3937_v8  ;;  %v5472_v8 = vld [vmem:[#allocation2 + $0x434] sm:$0xf] }
 0x124   :  { %2954 = vmatpush.bf16.msrb.mxu2 %v4001_v9  ;;  %v4150_v9 = vld [vmem:[#allocation2 + $0x438] sm:$0xf0] }
 0x125   :  { %2967 = vmatpush.bf16.msrb.mxu3 %v4065_v14  ;;  %2929 = vmatmul.bf16.vlgmr.msrb.gmra.mxu0 %v6104_v41  ;;  %v5522_v41 = vld [vmem:[#allocation2 + $0x5c4] sm:$0xf]  ;;  %v4153_v27 = vor.u32 %v5472_v8, %v4150_v9  ;;  %v4329_v8 = vor.u32 %v5516_v1, %v4326_v55  ;;  %v4254_v9 = vld [vmem:[#allocation2 + $0x508] sm:$0xf0]  ;;  %v4486_v1 = vld [vmem:[#allocation2 + $0x6d8] sm:$0xf0] }
 0x126   :  { %2973 = vmatpush.bf16.msra.mxu0 %v4185_v15  ;;  %2942 = vmatmul.bf16.vlgmr.msrb.gmra.mxu1 %v6108_v44  ;;  %v2735_v44 = vpop.f32.mrf.mxu1  ;;  %v4353_v13 = vor.u32 %v5522_v41, %v4350_v3  ;;  %v4214_v15 = vld [vmem:[#allocation2 + $0x4b8] sm:$0xf0]  ;;  %v5466_v41 = vld [vmem:[#allocation2 + $0x404] sm:$0xf]  ;;  %v4126_v3 = vld [vmem:[#allocation2 + $0x408] sm:$0xf0] }
 0x127   :  { %2986 = vmatpush.bf16.msra.mxu1 %v4249_v17  ;;  %2955 = vmatmul.bf16.vlgmr.msrb.gmra.mxu2 %v6102_v38  ;;  %v5490_v38 = vld [vmem:[#allocation2 + $0x4c4] sm:$0xf]  ;;  %v5504_v17 = vld [vmem:[#allocation2 + $0x534] sm:$0xf]  ;;  %v4129_v26 = vor.u32 %v5466_v41, %v4126_v3  ;;  %v4614_v3 = vld [vmem:[#allocation2 + $0x7d8] sm:$0xf0] }
 0x128   :  { %2999 = vmatpush.bf16.msra.mxu2 %v4313_v21  ;;  %2968 = vmatmul.bf16.vlgmr.msrb.gmra.mxu3 %v6106_v42  ;;  %v2723_v42 = vadd.f32 %v2722_v2, %v6196_v32  ;;  %v4225_v5 = vor.u32 %v5490_v38, %v4222_v0  ;;  %v4278_v21 = vld [vmem:[#allocation2 + $0x538] sm:$0xf0]  ;;  %v4217_v32 = vor.u32 %v5488_v10, %v4214_v15  ;;  %v5514_v10 = vld [vmem:[#allocation2 + $0x584] sm:$0xf]  ;;  %v5544_v15 = vld [vmem:[#allocation2 + $0x674] sm:$0xf] }
 0x129   :  { %3012 = vmatpush.bf16.msra.mxu3 %v4377_v34  ;;  %v4281_v34 = vor.u32 %v5504_v17, %v4278_v21  ;;  %v4198_v38 = vld [vmem:[#allocation2 + $0x498] sm:$0xf0]  ;;  %v5560_v21 = vld [vmem:[#allocation2 + $0x6f4] sm:$0xf] }
 0x12a   :  { %2974 = vmatpush.bf16.msra.mxu0 %v4177_v43  ;;  %v2736_v14 = vadd.f32 %v2735_v44, %v2723_v42  ;;  %v2748_v40 = vpop.f32.mrf.mxu2  ;;  %v4206_v43 = vld [vmem:[#allocation2 + $0x4a8] sm:$0xf0]  ;;  %v2724_v51 = vpop.f32.mrf.mxu0  ;;  %v4262_v0 = vld [vmem:[#allocation2 + $0x518] sm:$0xf0]  ;;  %v4201_v42 = vor.u32 %v5484_v61, %v4198_v38  ;;  %v5482_v44 = vld [vmem:[#allocation2 + $0x484] sm:$0xf] }
 0x12b   :  { %2987 = vmatpush.bf16.msra.mxu1 %v4241_v47  ;;  %v5502_v47 = vld [vmem:[#allocation2 + $0x524] sm:$0xf]  ;;  %v2761_v20 = vpop.f32.mrf.mxu3  ;;  %v4209_v57 = vor.u32 %v5486_v53, %v4206_v43  ;;  %v4438_v17 = vld [vmem:[#allocation2 + $0x678] sm:$0xf0]  ;;  %v5592_v53 = vld [vmem:[#allocation2 + $0x7f4] sm:$0xf] }
 0x12c   :  { %3000 = vmatpush.bf16.msra.mxu2 %v4305_v19  ;;  %v4270_v19 = vld [vmem:[#allocation2 + $0x528] sm:$0xf0]  ;;  %v2749_v48 = vadd.f32 %v2748_v40, %v2736_v14  ;;  %v4441_v43 = vor.u32 %v5544_v15, %v4438_v17  ;;  %v4422_v38 = vld [vmem:[#allocation2 + $0x658] sm:$0xf0]  ;;  %v5572_v55 = vld [vmem:[#allocation2 + $0x754] sm:$0xf] }
 0x12d   :  { %3013 = vmatpush.bf16.msra.mxu3 %v4369_v22  ;;  %v4334_v22 = vld [vmem:[#allocation2 + $0x5a8] sm:$0xf0]  ;;  %v5588_v41 = vld [vmem:[#allocation2 + $0x7d4] sm:$0xf] }
 0x12e   :  { %2975 = vmatpush.bf16.msra.mxu0 %v4169_v58  ;;  %v2737_v54 = vpop.f32.mrf.mxu1  ;;  %v6203_v56 = vadd.f32 %v2761_v20, %v2749_v48  ;;  %v4273_v58 = vor.u32 %v5502_v47, %v4270_v19  ;;  %v4337_v62 = vor.u32 %v5518_v50, %v4334_v22  ;;  %v5542_v48 = vld [vmem:[#allocation2 + $0x664] sm:$0xf]  ;;  %v4430_v20 = vld [vmem:[#allocation2 + $0x668] sm:$0xf0] }
 0x12f   :  { %2988 = vmatpush.bf16.msra.mxu1 %v4233_v59  ;;  %v5468_v59 = vld [vmem:[#allocation2 + $0x414] sm:$0xf]  ;;  %v5558_v50 = vld [vmem:[#allocation2 + $0x6e4] sm:$0xf]  ;;  %v4494_v51 = vld [vmem:[#allocation2 + $0x6e8] sm:$0xf0] }
 0x130   :  { %3001 = vmatpush.bf16.msra.mxu2 %v4297_v60  ;;  %v4134_v60 = vld [vmem:[#allocation2 + $0x418] sm:$0xf0]  ;;  %v4558_v54 = vld [vmem:[#allocation2 + $0x768] sm:$0xf0] }
 0x131   :  { %3014 = vmatpush.bf16.msra.mxu3 %v4361_v63  ;;  %v5500_v63 = vld [vmem:[#allocation2 + $0x514] sm:$0xf]  ;;  %v4137_v2 = vor.u32 %v5468_v59, %v4134_v60  ;;  %v4433_v59 = vor.u32 %v5542_v48, %v4430_v20  ;;  %v4497_v60 = vor.u32 %v5558_v50, %v4494_v51  ;;  %v5534_v48 = vld [vmem:[#allocation2 + $0x624] sm:$0xf]  ;;  %v4398_v20 = vld [vmem:[#allocation2 + $0x628] sm:$0xf0] }
 0x132   :  { %2976 = vmatpush.bf16.msra.mxu0 %v4161_v4  ;;  %v4265_v4 = vor.u32 %v5500_v63, %v4262_v0  ;;  %v2750_v14 = vpop.f32.mrf.mxu2  ;;  %v5556_v63 = vld [vmem:[#allocation2 + $0x6d4] sm:$0xf]  ;;  %v5550_v50 = vld [vmem:[#allocation2 + $0x6a4] sm:$0xf] }
 0x133   :  { %2989 = vmatpush.bf16.msra.mxu1 %v4225_v5  ;;  %v4190_v5 = vld [vmem:[#allocation2 + $0x488] sm:$0xf0]  ;;  %v2763_v24 = vpop.f32.mrf.mxu3 }
 0x134   :  { %3002 = vmatpush.bf16.msra.mxu2 %v4289_v6  ;;  %v5498_v6 = vld [vmem:[#allocation2 + $0x504] sm:$0xf]  ;;  %v4193_v36 = vor.u32 %v5482_v44, %v4190_v5  ;;  %v4606_v14 = vld [vmem:[#allocation2 + $0x7c8] sm:$0xf0] }
 0x135   :  { %3015 = vmatpush.bf16.msra.mxu3 %v4353_v13  ;;  %v4318_v13 = vld [vmem:[#allocation2 + $0x588] sm:$0xf0]  ;;  %v4257_v39 = vor.u32 %v5498_v6, %v4254_v9  ;;  %v5538_v5 = vld [vmem:[#allocation2 + $0x644] sm:$0xf] }
 0x136   :  { %2977 = vmatpush.bf16.msra.mxu0 %v4153_v27  ;;  %v4502_v27 = vld [vmem:[#allocation2 + $0x6f8] sm:$0xf0]  ;;  %v4321_v40 = vor.u32 %v5514_v10, %v4318_v13  ;;  %v5554_v6 = vld [vmem:[#allocation2 + $0x6c4] sm:$0xf]  ;;  %v4478_v9 = vld [vmem:[#allocation2 + $0x6c8] sm:$0xf0] }
 0x137   :  { %2990 = vmatpush.bf16.msra.mxu1 %v4217_v32  ;;  %v5576_v32 = vld [vmem:[#allocation2 + $0x774] sm:$0xf]  ;;  %v4505_v47 = vor.u32 %v5560_v21, %v4502_v27  ;;  %v5570_v10 = vld [vmem:[#allocation2 + $0x744] sm:$0xf]  ;;  %v4481_v21 = vor.u32 %v5554_v6, %v4478_v9  ;;  %v4406_v27 = vld [vmem:[#allocation2 + $0x638] sm:$0xf0] }
 0x138   :  { %3003 = vmatpush.bf16.msra.mxu2 %v4281_v34  ;;  %v4566_v34 = vld [vmem:[#allocation2 + $0x778] sm:$0xf0]  ;;  %v5530_v9 = vld [vmem:[#allocation2 + $0x604] sm:$0xf] }
 0x139   :  { %3016 = vmatpush.bf16.msra.mxu3 %v4345_v18  ;;  %v4630_v18 = vld [vmem:[#allocation2 + $0x7f8] sm:$0xf0]  ;;  %v4569_v19 = vor.u32 %v5576_v32, %v4566_v34  ;;  %v5552_v32 = vld [vmem:[#allocation2 + $0x6b4] sm:$0xf] }
 0x13a   :  { %2978 = vmatpush.bf16.msra.mxu0 %v4145_v52  ;;  %v4633_v22 = vor.u32 %v5592_v53, %v4630_v18  ;;  %v5574_v52 = vld [vmem:[#allocation2 + $0x764] sm:$0xf]  ;;  %v5568_v53 = vld [vmem:[#allocation2 + $0x734] sm:$0xf]  ;;  %v4534_v18 = vld [vmem:[#allocation2 + $0x738] sm:$0xf0] }
 0x13b   :  { %2991 = vmatpush.bf16.msra.mxu1 %v4209_v57  ;;  %v5590_v57 = vld [vmem:[#allocation2 + $0x7e4] sm:$0xf]  ;;  %v4561_v61 = vor.u32 %v5574_v52, %v4558_v54  ;;  %v4462_v52 = vld [vmem:[#allocation2 + $0x6a8] sm:$0xf0]  ;;  %v4582_v6 = vld [vmem:[#allocation2 + $0x798] sm:$0xf0] }
 0x13c   :  { %3004 = vmatpush.bf16.msra.mxu2 %v4273_v58  ;;  %v4622_v58 = vld [vmem:[#allocation2 + $0x7e8] sm:$0xf0]  ;;  %v5566_v54 = vld [vmem:[#allocation2 + $0x724] sm:$0xf] }
 0x13d   :  { %3017 = vmatpush.bf16.msra.mxu3 %v4337_v62  ;;  %v5540_v62 = vld [vmem:[#allocation2 + $0x654] sm:$0xf]  ;;  %v4625_v0 = vor.u32 %v5590_v57, %v4622_v58  ;;  %v4526_v57 = vld [vmem:[#allocation2 + $0x728] sm:$0xf0] }
 0x13e   :  { %2979 = vmatpush.bf16.msra.mxu0 %v4137_v2  ;;  %v4550_v2 = vld [vmem:[#allocation2 + $0x758] sm:$0xf0] }
 0x13f   :  { %2992 = vmatpush.bf16.msra.mxu1 %v4201_v42  ;;  %v4425_v42 = vor.u32 %v5540_v62, %v4422_v38  ;;  %v4553_v44 = vor.u32 %v5572_v55, %v4550_v2  ;;  %v4401_v38 = vor.u32 %v5534_v48, %v4398_v20  ;;  %v4529_v55 = vor.u32 %v5566_v54, %v4526_v57  ;;  %v5532_v2 = vld [vmem:[#allocation2 + $0x614] sm:$0xf]  ;;  %v5622_v54 = vld [vmem:[#allocation2 + $0x8e4] sm:$0xf] }
 0x140   :  { %3005 = vmatpush.bf16.msra.mxu2 %v4265_v4  ;;  %v4489_v4 = vor.u32 %v5556_v63, %v4486_v1  ;;  %v4465_v1 = vor.u32 %v5550_v50, %v4462_v52  ;;  %v4686_v52 = vld [vmem:[#allocation2 + $0x868] sm:$0xf0] }
 0x141   :  { %3018 = vmatpush.bf16.msra.mxu3 %v4329_v8  ;;  %v4617_v8 = vor.u32 %v5588_v41, %v4614_v3  ;;  %v4390_v41 = vld [vmem:[#allocation2 + $0x618] sm:$0xf0]  ;;  %v5548_v3 = vld [vmem:[#allocation2 + $0x694] sm:$0xf] }
 0x142   :  { %2980 = vmatpush.bf16.msra.mxu0 %v4129_v26  ;;  %v2774_v13 = vpop.f32.mrf.mxu0  ;;  %v5536_v26 = vld [vmem:[#allocation2 + $0x634] sm:$0xf] }
 0x143   :  { %2993 = vmatpush.bf16.msra.mxu1 %v4193_v36  ;;  %v2787_v17 = vpop.f32.mrf.mxu1 }
 0x144   :  { %3006 = vmatpush.bf16.msra.mxu2 %v4257_v39  ;;  %v4470_v39 = vld [vmem:[#allocation2 + $0x6b8] sm:$0xf0] }
 0x145   :  { %3019 = vmatpush.bf16.msra.mxu3 %v4321_v40  ;;  %2981 = vmatmul.bf16.vlgmr.msra.gmra.mxu0 %v6120_v25  ;;  %v4414_v25 = vld [vmem:[#allocation2 + $0x648] sm:$0xf0]  ;;  %v5584_v40 = vld [vmem:[#allocation2 + $0x7b4] sm:$0xf] }
 0x146   :  { %3025 = vmatpush.bf16.msrb.mxu0 %v4441_v43  ;;  %2994 = vmatmul.bf16.vlgmr.msra.gmra.mxu1 %v6124_v30  ;;  %v5586_v30 = vld [vmem:[#allocation2 + $0x7c4] sm:$0xf]  ;;  %v4417_v15 = vor.u32 %v5538_v5, %v4414_v25  ;;  %v4598_v43 = vld [vmem:[#allocation2 + $0x7b8] sm:$0xf0]  ;;  %v5580_v25 = vld [vmem:[#allocation2 + $0x794] sm:$0xf] }
 0x147   :  { %3038 = vmatpush.bf16.msrb.mxu1 %v4505_v47  ;;  %3007 = vmatmul.bf16.vlgmr.msra.gmra.mxu2 %v6122_v29  ;;  %v4542_v29 = vld [vmem:[#allocation2 + $0x748] sm:$0xf0]  ;;  %v4609_v34 = vor.u32 %v5586_v30, %v4606_v14  ;;  %v4409_v47 = vor.u32 %v5536_v26, %v4406_v27  ;;  %v4518_v5 = vld [vmem:[#allocation2 + $0x718] sm:$0xf0]  ;;  %v5546_v30 = vld [vmem:[#allocation2 + $0x684] sm:$0xf] }
 0x148   :  { %3051 = vmatpush.bf16.msrb.mxu2 %v4569_v19  ;;  %3020 = vmatmul.bf16.vlgmr.msra.gmra.mxu3 %v6126_v33  ;;  %v2775_v33 = vadd.f32 %v2774_v13, %v6203_v56  ;;  %v4545_v24 = vor.u32 %v5570_v10, %v4542_v29  ;;  %v4473_v56 = vor.u32 %v5552_v32, %v4470_v39  ;;  %v4382_v10 = vld [vmem:[#allocation2 + $0x608] sm:$0xf0]  ;;  %v5608_v27 = vld [vmem:[#allocation2 + $0x874] sm:$0xf]  ;;  %v4694_v32 = vld [vmem:[#allocation2 + $0x878] sm:$0xf0] }
 0x149   :  { %3064 = vmatpush.bf16.msrb.mxu3 %v4633_v22  ;;  %v4537_v19 = vor.u32 %v5568_v53, %v4534_v18  ;;  %v4601_v22 = vor.u32 %v5584_v40, %v4598_v43  ;;  %v4446_v14 = vld [vmem:[#allocation2 + $0x688] sm:$0xf0]  ;;  %v4385_v39 = vor.u32 %v5530_v9, %v4382_v10  ;;  %v4758_v53 = vld [vmem:[#allocation2 + $0x8f8] sm:$0xf0]  ;;  %v5640_v18 = vld [vmem:[#allocation2 + $0x974] sm:$0xf]  ;;  %v4697_v20 = vor.u32 %v5608_v27, %v4694_v32 }
 0x14a   :  { %3026 = vmatpush.bf16.msrb.mxu0 %v4433_v59  ;;  %v2788_v36 = vadd.f32 %v2787_v17, %v2775_v33  ;;  %v2800_v51 = vpop.f32.mrf.mxu2  ;;  %v2776_v62 = vpop.f32.mrf.mxu0  ;;  %v5562_v33 = vld [vmem:[#allocation2 + $0x704] sm:$0xf]  ;;  %v4510_v17 = vld [vmem:[#allocation2 + $0x708] sm:$0xf0]  ;;  %v4822_v40 = vld [vmem:[#allocation2 + $0x978] sm:$0xf0]  ;;  %v4449_v43 = vor.u32 %v5546_v30, %v4446_v14 }
 0x14b   :  { %3039 = vmatpush.bf16.msrb.mxu1 %v4497_v60  ;;  %v2813_v59 = vpop.f32.mrf.mxu3  ;;  %v5582_v60 = vld [vmem:[#allocation2 + $0x7a4] sm:$0xf]  ;;  %v2789_v63 = vpop.f32.mrf.mxu1  ;;  %v4878_v62 = vld [vmem:[#allocation2 + $0x9e8] sm:$0xf0]  ;;  %v5600_v27 = vld [vmem:[#allocation2 + $0x834] sm:$0xf] }
 0x14c   :  { %3052 = vmatpush.bf16.msrb.mxu2 %v4561_v61  ;;  %v2801_v58 = vadd.f32 %v2800_v51, %v2788_v36  ;;  %v4590_v61 = vld [vmem:[#allocation2 + $0x7a8] sm:$0xf0]  ;;  %v5606_v51 = vld [vmem:[#allocation2 + $0x864] sm:$0xf]  ;;  %v4662_v32 = vld [vmem:[#allocation2 + $0x838] sm:$0xf0] }
 0x14d   :  { %3065 = vmatpush.bf16.msrb.mxu3 %v4625_v0  ;;  %v5602_v10 = vld [vmem:[#allocation2 + $0x844] sm:$0xf]  ;;  %v4734_v30 = vld [vmem:[#allocation2 + $0x8c8] sm:$0xf0] }
 0x14e   :  { %3027 = vmatpush.bf16.msrb.mxu0 %v4425_v42  ;;  %v6210_v0 = vadd.f32 %v2813_v59, %v2801_v58  ;;  %v4593_v42 = vor.u32 %v5582_v60, %v4590_v61  ;;  %v4750_v58 = vld [vmem:[#allocation2 + $0x8e8] sm:$0xf0]  ;;  %v5638_v59 = vld [vmem:[#allocation2 + $0x964] sm:$0xf] }
 0x14f   :  { %3040 = vmatpush.bf16.msrb.mxu1 %v4489_v4  ;;  %v4454_v4 = vld [vmem:[#allocation2 + $0x698] sm:$0xf0]  ;;  %v4814_v60 = vld [vmem:[#allocation2 + $0x968] sm:$0xf0]  ;;  %v5654_v61 = vld [vmem:[#allocation2 + $0x9e4] sm:$0xf]  ;;  %v4753_v63 = vor.u32 %v5622_v54, %v4750_v58 }
 0x150   :  { %3053 = vmatpush.bf16.msrb.mxu2 %v4553_v44  ;;  %v5564_v44 = vld [vmem:[#allocation2 + $0x714] sm:$0xf]  ;;  %v4457_v29 = vor.u32 %v5548_v3, %v4454_v4  ;;  %v4881_v3 = vor.u32 %v5654_v61, %v4878_v62  ;;  %v5634_v14 = vld [vmem:[#allocation2 + $0x944] sm:$0xf]  ;;  %v4846_v61 = vld [vmem:[#allocation2 + $0x9a8] sm:$0xf0] }
 0x151   :  { %3066 = vmatpush.bf16.msrb.mxu3 %v4617_v8  ;;  %v4393_v8 = vor.u32 %v5532_v2, %v4390_v41  ;;  %v4521_v13 = vor.u32 %v5564_v44, %v4518_v5  ;;  %v4678_v2 = vld [vmem:[#allocation2 + $0x858] sm:$0xf0]  ;;  %v5620_v41 = vld [vmem:[#allocation2 + $0x8d4] sm:$0xf]  ;;  %v5630_v54 = vld [vmem:[#allocation2 + $0x924] sm:$0xf] }
 0x152   :  { %3028 = vmatpush.bf16.msrb.mxu0 %v4417_v15  ;;  %v4585_v15 = vor.u32 %v5580_v25, %v4582_v6  ;;  %v2802_v26 = vpop.f32.mrf.mxu2  ;;  %v5636_v4 = vld [vmem:[#allocation2 + $0x954] sm:$0xf]  ;;  %v4806_v44 = vld [vmem:[#allocation2 + $0x958] sm:$0xf0] }
 0x153   :  { %3041 = vmatpush.bf16.msrb.mxu1 %v4481_v21  ;;  %v5578_v21 = vld [vmem:[#allocation2 + $0x784] sm:$0xf]  ;;  %v2815_v36 = vpop.f32.mrf.mxu3  ;;  %v5652_v5 = vld [vmem:[#allocation2 + $0x9d4] sm:$0xf]  ;;  %v4870_v25 = vld [vmem:[#allocation2 + $0x9d8] sm:$0xf0]  ;;  %v4809_v9 = vor.u32 %v5636_v4, %v4806_v44 }
 0x154   :  { %3054 = vmatpush.bf16.msrb.mxu2 %v4545_v24  ;;  %v4574_v24 = vld [vmem:[#allocation2 + $0x788] sm:$0xf0]  ;;  %v4710_v44 = vld [vmem:[#allocation2 + $0x898] sm:$0xf0] }
 0x155   :  { %3067 = vmatpush.bf16.msrb.mxu3 %v4609_v34  ;;  %v5624_v34 = vld [vmem:[#allocation2 + $0x8f4] sm:$0xf]  ;;  %v4577_v48 = vor.u32 %v5578_v21, %v4574_v24 }
 0x156   :  { %3029 = vmatpush.bf16.msrb.mxu0 %v4409_v47  ;;  %v4513_v47 = vor.u32 %v5562_v33, %v4510_v17  ;;  %v4761_v50 = vor.u32 %v5624_v34, %v4758_v53  ;;  %v5616_v34 = vld [vmem:[#allocation2 + $0x8b4] sm:$0xf]  ;;  %v4726_v53 = vld [vmem:[#allocation2 + $0x8b8] sm:$0xf0] }
 0x157   :  { %3042 = vmatpush.bf16.msrb.mxu1 %v4473_v56  ;;  %v5656_v56 = vld [vmem:[#allocation2 + $0x9f4] sm:$0xf] }
 0x158   :  { %3055 = vmatpush.bf16.msrb.mxu2 %v4537_v19  ;;  %v4886_v19 = vld [vmem:[#allocation2 + $0x9f8] sm:$0xf0] }
 0x159   :  { %3068 = vmatpush.bf16.msrb.mxu3 %v4601_v22  ;;  %v4825_v22 = vor.u32 %v5640_v18, %v4822_v40  ;;  %v4889_v57 = vor.u32 %v5656_v56, %v4886_v19  ;;  %v5632_v18 = vld [vmem:[#allocation2 + $0x934] sm:$0xf]  ;;  %v4790_v40 = vld [vmem:[#allocation2 + $0x938] sm:$0xf0]  ;;  %v4665_v56 = vor.u32 %v5600_v27, %v4662_v32 }
 0x15a   :  { %3030 = vmatpush.bf16.msrb.mxu0 %v4401_v38  ;;  %v4689_v38 = vor.u32 %v5606_v51, %v4686_v52  ;;  %v4793_v19 = vor.u32 %v5632_v18, %v4790_v40  ;;  %v4718_v52 = vld [vmem:[#allocation2 + $0x8a8] sm:$0xf0]  ;;  %v5720_v40 = vld [vmem:[#allocation2 + $0xbf4] sm:$0xf] }
 0x15b   :  { %3043 = vmatpush.bf16.msrb.mxu1 %v4465_v1  ;;  %v4817_v1 = vor.u32 %v5638_v59, %v4814_v60  ;;  %v5646_v60 = vld [vmem:[#allocation2 + $0x9a4] sm:$0xf] }
 0x15c   :  { %3056 = vmatpush.bf16.msrb.mxu2 %v4529_v55  ;;  %v5604_v55 = vld [vmem:[#allocation2 + $0x854] sm:$0xf]  ;;  %v4849_v4 = vor.u32 %v5646_v60, %v4846_v61 }
 0x15d   :  { %3069 = vmatpush.bf16.msrb.mxu3 %v4593_v42  ;;  %v4742_v42 = vld [vmem:[#allocation2 + $0x8d8] sm:$0xf0]  ;;  %v4681_v6 = vor.u32 %v5604_v55, %v4678_v2 }
 0x15e   :  { %3031 = vmatpush.bf16.msrb.mxu0 %v4393_v8  ;;  %v4745_v8 = vor.u32 %v5620_v41, %v4742_v42  ;;  %v5596_v41 = vld [vmem:[#allocation2 + $0x814] sm:$0xf] }
 0x15f   :  { %3044 = vmatpush.bf16.msrb.mxu1 %v4457_v29  ;;  %v5618_v29 = vld [vmem:[#allocation2 + $0x8c4] sm:$0xf]  ;;  %v5612_v42 = vld [vmem:[#allocation2 + $0x894] sm:$0xf] }
 0x160   :  { %3057 = vmatpush.bf16.msrb.mxu2 %v4521_v13  ;;  %v4873_v13 = vor.u32 %v5652_v5, %v4870_v25  ;;  %v4737_v24 = vor.u32 %v5618_v29, %v4734_v30  ;;  %v5628_v5 = vld [vmem:[#allocation2 + $0x914] sm:$0xf]  ;;  %v4774_v25 = vld [vmem:[#allocation2 + $0x918] sm:$0xf0]  ;;  %v4713_v29 = vor.u32 %v5612_v42, %v4710_v44  ;;  %v5610_v30 = vld [vmem:[#allocation2 + $0x884] sm:$0xf] }
 0x161   :  { %3070 = vmatpush.bf16.msrb.mxu3 %v4585_v15  ;;  %v4862_v15 = vld [vmem:[#allocation2 + $0x9c8] sm:$0xf0]  ;;  %v5716_v42 = vld [vmem:[#allocation2 + $0xbd4] sm:$0xf] }
 0x162   :  { %3032 = vmatpush.bf16.msrb.mxu0 %v4385_v39  ;;  %v2826_v33 = vpop.f32.mrf.mxu0 }
 0x163   :  { %3045 = vmatpush.bf16.msrb.mxu1 %v4449_v43  ;;  %v2839_v21 = vpop.f32.mrf.mxu1  ;;  %v5648_v43 = vld [vmem:[#allocation2 + $0x9b4] sm:$0xf] }
 0x164   :  { %3058 = vmatpush.bf16.msrb.mxu2 %v4513_v47  ;;  %v4854_v47 = vld [vmem:[#allocation2 + $0x9b8] sm:$0xf0] }
 0x165   :  { %3071 = vmatpush.bf16.msrb.mxu3 %v4577_v48  ;;  %3033 = vmatmul.bf16.vlgmr.msrb.gmra.mxu0 %v6138_v23  ;;  %v4670_v23 = vld [vmem:[#allocation2 + $0x848] sm:$0xf0]  ;;  %v5598_v48 = vld [vmem:[#allocation2 + $0x824] sm:$0xf] }
 0x166   :  { %3077 = vmatpush.bf16.msra.mxu0 %v4697_v20  ;;  %3046 = vmatmul.bf16.vlgmr.msrb.gmra.mxu1 %v6142_v31  ;;  %v5650_v31 = vld [vmem:[#allocation2 + $0x9c4] sm:$0xf]  ;;  %v4673_v17 = vor.u32 %v5602_v10, %v4670_v23  ;;  %v4654_v20 = vld [vmem:[#allocation2 + $0x828] sm:$0xf0] }
 0x167   :  { %3090 = vmatpush.bf16.msra.mxu1 %v4761_v50  ;;  %3059 = vmatmul.bf16.vlgmr.msrb.gmra.mxu2 %v6140_v28  ;;  %v4798_v28 = vld [vmem:[#allocation2 + $0x948] sm:$0xf0]  ;;  %v4865_v36 = vor.u32 %v5650_v31, %v4862_v15  ;;  %v5614_v50 = vld [vmem:[#allocation2 + $0x8a4] sm:$0xf] }
 0x168   :  { %3103 = vmatpush.bf16.msra.mxu2 %v4825_v22  ;;  %3072 = vmatmul.bf16.vlgmr.msrb.gmra.mxu3 %v6144_v35  ;;  %v2827_v35 = vadd.f32 %v2826_v33, %v6210_v0  ;;  %v4801_v26 = vor.u32 %v5634_v14, %v4798_v28  ;;  %v4729_v0 = vor.u32 %v5616_v34, %v4726_v53  ;;  %v5594_v10 = vld [vmem:[#allocation2 + $0x804] sm:$0xf]  ;;  %v4638_v23 = vld [vmem:[#allocation2 + $0x808] sm:$0xf0]  ;;  %v5014_v34 = vld [vmem:[#allocation2 + $0xaf8] sm:$0xf0] }
 0x169   :  { %3116 = vmatpush.bf16.msra.mxu3 %v4889_v57  ;;  %v4857_v22 = vor.u32 %v5648_v43, %v4854_v47  ;;  %v4782_v57 = vld [vmem:[#allocation2 + $0x928] sm:$0xf0]  ;;  %v4721_v55 = vor.u32 %v5614_v50, %v4718_v52  ;;  %v5626_v28 = vld [vmem:[#allocation2 + $0x904] sm:$0xf]  ;;  %v4641_v32 = vor.u32 %v5594_v10, %v4638_v23  ;;  %v5142_v43 = vld [vmem:[#allocation2 + $0xbf8] sm:$0xf0] }
 0x16a   :  { %3078 = vmatpush.bf16.msra.mxu0 %v4689_v38  ;;  %v2840_v39 = vadd.f32 %v2839_v21, %v2827_v35  ;;  %v2852_v51 = vpop.f32.mrf.mxu2  ;;  %v2828_v62 = vpop.f32.mrf.mxu0  ;;  %v4657_v38 = vor.u32 %v5598_v48, %v4654_v20  ;;  %v4785_v2 = vor.u32 %v5630_v54, %v4782_v57  ;;  %v4702_v14 = vld [vmem:[#allocation2 + $0x888] sm:$0xf0]  ;;  %v5642_v15 = vld [vmem:[#allocation2 + $0x984] sm:$0xf]  ;;  %v5672_v21 = vld [vmem:[#allocation2 + $0xa74] sm:$0xf] }
 0x16b   :  { %3091 = vmatpush.bf16.msra.mxu1 %v4753_v63  ;;  %v2865_v59 = vpop.f32.mrf.mxu3  ;;  %v2841_v63 = vpop.f32.mrf.mxu1  ;;  %v4766_v31 = vld [vmem:[#allocation2 + $0x908] sm:$0xf0]  ;;  %v4705_v53 = vor.u32 %v5610_v30, %v4702_v14  ;;  %v5670_v48 = vld [vmem:[#allocation2 + $0xa64] sm:$0xf]  ;;  %v5668_v62 = vld [vmem:[#allocation2 + $0xa54] sm:$0xf] }
 0x16c   :  { %3104 = vmatpush.bf16.msra.mxu2 %v4817_v1  ;;  %v2853_v58 = vadd.f32 %v2852_v51, %v2840_v39  ;;  %v4830_v35 = vld [vmem:[#allocation2 + $0x988] sm:$0xf0]  ;;  %v5078_v39 = vld [vmem:[#allocation2 + $0xb78] sm:$0xf0]  ;;  %v4769_v18 = vor.u32 %v5626_v28, %v4766_v31  ;;  %v5686_v50 = vld [vmem:[#allocation2 + $0xae4] sm:$0xf] }
 0x16d   :  { %3117 = vmatpush.bf16.msra.mxu3 %v4881_v3  ;;  %v4646_v3 = vld [vmem:[#allocation2 + $0x818] sm:$0xf0]  ;;  %v4833_v47 = vor.u32 %v5642_v15, %v4830_v35  ;;  %v4942_v20 = vld [vmem:[#allocation2 + $0xa68] sm:$0xf0]  ;;  %v5702_v52 = vld [vmem:[#allocation2 + $0xb64] sm:$0xf] }
 0x16e   :  { %3079 = vmatpush.bf16.msra.mxu0 %v4681_v6  ;;  %v6217_v1 = vadd.f32 %v2865_v59, %v2853_v58  ;;  %v5644_v6 = vld [vmem:[#allocation2 + $0x994] sm:$0xf]  ;;  %v5006_v51 = vld [vmem:[#allocation2 + $0xae8] sm:$0xf0]  ;;  %v5718_v57 = vld [vmem:[#allocation2 + $0xbe4] sm:$0xf]  ;;  %v4945_v59 = vor.u32 %v5670_v48, %v4942_v20 }
 0x16f   :  { %3092 = vmatpush.bf16.msra.mxu1 %v4745_v8  ;;  %v4838_v8 = vld [vmem:[#allocation2 + $0x998] sm:$0xf0]  ;;  %v5070_v54 = vld [vmem:[#allocation2 + $0xb68] sm:$0xf0]  ;;  %v5009_v60 = vor.u32 %v5686_v50, %v5006_v51  ;;  %v5684_v63 = vld [vmem:[#allocation2 + $0xad4] sm:$0xf] }
 0x170   :  { %3105 = vmatpush.bf16.msra.mxu2 %v4809_v9  ;;  %v4649_v9 = vor.u32 %v5596_v41, %v4646_v3  ;;  %v4841_v33 = vor.u32 %v5644_v6, %v4838_v8  ;;  %v5134_v58 = vld [vmem:[#allocation2 + $0xbe8] sm:$0xf0]  ;;  %v5073_v61 = vor.u32 %v5702_v52, %v5070_v54  ;;  %v5700_v41 = vld [vmem:[#allocation2 + $0xb54] sm:$0xf]  ;;  %v5062_v3 = vld [vmem:[#allocation2 + $0xb58] sm:$0xf0] }
 0x171   :  { %3118 = vmatpush.bf16.msra.mxu3 %v4873_v13  ;;  %v4777_v13 = vor.u32 %v5628_v5, %v4774_v25  ;;  %v5666_v5 = vld [vmem:[#allocation2 + $0xa44] sm:$0xf]  ;;  %v5065_v6 = vor.u32 %v5700_v41, %v5062_v3  ;;  %v5118_v30 = vld [vmem:[#allocation2 + $0xbc8] sm:$0xf0]  ;;  %v5664_v31 = vld [vmem:[#allocation2 + $0xa34] sm:$0xf] }
 0x172   :  { %3080 = vmatpush.bf16.msra.mxu0 %v4673_v17  ;;  %v2854_v17 = vpop.f32.mrf.mxu2  ;;  %v5682_v8 = vld [vmem:[#allocation2 + $0xac4] sm:$0xf]  ;;  %v4918_v15 = vld [vmem:[#allocation2 + $0xa38] sm:$0xf0]  ;;  %v5680_v35 = vld [vmem:[#allocation2 + $0xab4] sm:$0xf] }
 0x173   :  { %3093 = vmatpush.bf16.msra.mxu1 %v4737_v24  ;;  %v4950_v24 = vld [vmem:[#allocation2 + $0xa78] sm:$0xf0]  ;;  %v2867_v27 = vpop.f32.mrf.mxu3  ;;  %v4974_v48 = vld [vmem:[#allocation2 + $0xaa8] sm:$0xf0]  ;;  %v5694_v20 = vld [vmem:[#allocation2 + $0xb24] sm:$0xf] }
 0x174   :  { %3106 = vmatpush.bf16.msra.mxu2 %v4801_v26  ;;  %v5688_v26 = vld [vmem:[#allocation2 + $0xaf4] sm:$0xf]  ;;  %v5038_v50 = vld [vmem:[#allocation2 + $0xb28] sm:$0xf0]  ;;  %v5710_v52 = vld [vmem:[#allocation2 + $0xba4] sm:$0xf] }
 0x175   :  { %3119 = vmatpush.bf16.msra.mxu3 %v4865_v36  ;;  %v5704_v36 = vld [vmem:[#allocation2 + $0xb74] sm:$0xf]  ;;  %v5102_v54 = vld [vmem:[#allocation2 + $0xba8] sm:$0xf0]  ;;  %v4966_v41 = vld [vmem:[#allocation2 + $0xa98] sm:$0xf0] }
 0x176   :  { %3081 = vmatpush.bf16.msra.mxu0 %v4665_v56  ;;  %v4953_v56 = vor.u32 %v5672_v21, %v4950_v24  ;;  %v5696_v27 = vld [vmem:[#allocation2 + $0xb34] sm:$0xf] }
 0x177   :  { %3094 = vmatpush.bf16.msra.mxu1 %v4729_v0  ;;  %v5017_v0 = vor.u32 %v5688_v26, %v5014_v34  ;;  %v4982_v26 = vld [vmem:[#allocation2 + $0xab8] sm:$0xf0]  ;;  %v5712_v34 = vld [vmem:[#allocation2 + $0xbb4] sm:$0xf] }
 0x178   :  { %3107 = vmatpush.bf16.msra.mxu2 %v4793_v19  ;;  %v5081_v19 = vor.u32 %v5704_v36, %v5078_v39  ;;  %v5110_v36 = vld [vmem:[#allocation2 + $0xbb8] sm:$0xf0]  ;;  %v5692_v3 = vld [vmem:[#allocation2 + $0xb14] sm:$0xf] }
 0x179   :  { %3120 = vmatpush.bf16.msra.mxu3 %v4857_v22  ;;  %v5145_v22 = vor.u32 %v5720_v40, %v5142_v43  ;;  %v5662_v43 = vld [vmem:[#allocation2 + $0xa24] sm:$0xf] }
 0x17a   :  { %3082 = vmatpush.bf16.msra.mxu0 %v4657_v38  ;;  %v4934_v38 = vld [vmem:[#allocation2 + $0xa58] sm:$0xf0] }
 0x17b   :  { %3095 = vmatpush.bf16.msra.mxu1 %v4721_v55  ;;  %v5137_v55 = vor.u32 %v5718_v57, %v5134_v58  ;;  %v4937_v44 = vor.u32 %v5668_v62, %v4934_v38  ;;  %v5660_v62 = vld [vmem:[#allocation2 + $0xa14] sm:$0xf]  ;;  %v4902_v38 = vld [vmem:[#allocation2 + $0xa18] sm:$0xf0] }
 0x17c   :  { %3108 = vmatpush.bf16.msra.mxu2 %v4785_v2  ;;  %v4998_v2 = vld [vmem:[#allocation2 + $0xad8] sm:$0xf0] }
 0x17d   :  { %3121 = vmatpush.bf16.msra.mxu3 %v4849_v4  ;;  %v5126_v4 = vld [vmem:[#allocation2 + $0xbd8] sm:$0xf0]  ;;  %v5001_v25 = vor.u32 %v5684_v63, %v4998_v2  ;;  %v5676_v63 = vld [vmem:[#allocation2 + $0xa94] sm:$0xf]  ;;  %v5105_v2 = vor.u32 %v5710_v52, %v5102_v54 }
 0x17e   :  { %3083 = vmatpush.bf16.msra.mxu0 %v4649_v9  ;;  %v5783_v9 = vld [vmem:[#allocation4] sm:$0x3]  ;;  %v5129_v23 = vor.u32 %v5716_v42, %v5126_v4  ;;  %v5030_v42 = vld [vmem:[#allocation2 + $0xb18] sm:$0xf0]  ;;  %v5708_v4 = vld [vmem:[#allocation2 + $0xb94] sm:$0xf] }
 0x17f   :  { %3096 = vmatpush.bf16.msra.mxu1 %v4713_v29  ;;  %v550_v10 = vperm.slane %v5783_v9, 1  ;;  %v5698_v29 = vld [vmem:[#allocation2 + $0xb44] sm:$0xf]  ;;  %v5204_v54 = vld [vmem:[#allocation7 + $0x70] sm:$0xf] }
 0x180   :  { %3109 = vmatpush.bf16.msra.mxu2 %v4777_v13  ;;  %v5714_v13 = vld [vmem:[#allocation2 + $0xbc4] sm:$0xf] }
 0x181   :  { %3122 = vmatpush.bf16.msra.mxu3 %v4841_v33  ;;  %v5121_v24 = vor.u32 %v5714_v13, %v5118_v30  ;;  %v5674_v9 = vld [vmem:[#allocation2 + $0xa84] sm:$0xf] }
 0x182   :  { %3084 = vmatpush.bf16.msra.mxu0 %v4641_v32  ;;  %v2878_v14 = vpop.f32.mrf.mxu0  ;;  %v5046_v32 = vld [vmem:[#allocation2 + $0xb38] sm:$0xf0]  ;;  %v5706_v30 = vld [vmem:[#allocation2 + $0xb84] sm:$0xf] }
 0x183   :  { %3097 = vmatpush.bf16.msra.mxu1 %v4705_v53  ;;  %v2879_v17 = vadd.f32 %v2878_v14, %v550_v10  ;;  %v2891_v21 = vpop.f32.mrf.mxu1  ;;  %v4921_v53 = vor.u32 %v5664_v31, %v4918_v15  ;;  %v5049_v40 = vor.u32 %v5696_v27, %v5046_v32 }
 0x184   :  { %3110 = vmatpush.bf16.msra.mxu2 %v4769_v18  ;;  %v4985_v18 = vor.u32 %v5680_v35, %v4982_v26 }
 0x185   :  { %3123 = vmatpush.bf16.msra.mxu3 %v4833_v47  ;;  %3085 = vmatmul.bf16.vlgmr.msra.gmra.mxu0 %v6156_v37  ;;  %v4926_v37 = vld [vmem:[#allocation2 + $0xa48] sm:$0xf0]  ;;  %v2892_v39 = vadd.f32 %v2891_v21, %v2879_v17 }
 0x186   :  { %3129 = vmatpush.bf16.msrb.mxu0 %v4953_v56  ;;  %3098 = vmatmul.bf16.vlgmr.msra.gmra.mxu1 %v6160_v46  ;;  %v5054_v46 = vld [vmem:[#allocation2 + $0xb48] sm:$0xf0]  ;;  %v5678_v56 = vld [vmem:[#allocation2 + $0xaa4] sm:$0xf] }
 0x187   :  { %3142 = vmatpush.bf16.msrb.mxu1 %v5017_v0  ;;  %3111 = vmatmul.bf16.vlgmr.msra.gmra.mxu2 %v6158_v45  ;;  %v4990_v45 = vld [vmem:[#allocation2 + $0xac8] sm:$0xf0]  ;;  %v5057_v33 = vor.u32 %v5698_v29, %v5054_v46  ;;  %v5690_v29 = vld [vmem:[#allocation2 + $0xb04] sm:$0xf] }
 0x188   :  { %3155 = vmatpush.bf16.msrb.mxu2 %v5081_v19  ;;  %3124 = vmatmul.bf16.vlgmr.msra.gmra.mxu3 %v6162_v49  ;;  %v4929_v49 = vor.u32 %v5666_v5, %v4926_v37  ;;  %v4993_v28 = vor.u32 %v5682_v8, %v4990_v45  ;;  %v4910_v47 = vld [vmem:[#allocation2 + $0xa28] sm:$0xf0]  ;;  %v5113_v19 = vor.u32 %v5712_v34, %v5110_v36  ;;  %v5658_v37 = vld [vmem:[#allocation2 + $0xa04] sm:$0xf] }
 0x189   :  { %3168 = vmatpush.bf16.msrb.mxu3 %v5145_v22  ;;  %v4913_v57 = vor.u32 %v5662_v43, %v4910_v47  ;;  %v4905_v5 = vor.u32 %v5660_v62, %v4902_v38  ;;  %v4894_v8 = vld [vmem:[#allocation2 + $0xa08] sm:$0xf0]  ;;  %v5268_v62 = vld [vmem:[#allocation6 + $0x70] sm:$0xf]  ;;  %v5737_v38 = vld [vmem:[#allocation6 + $0x74] sm:$0xf0] }
 0x18a   :  { %3130 = vmatpush.bf16.msrb.mxu0 %v4945_v59  ;;  %v2904_v0 = vpop.f32.mrf.mxu2  ;;  %v2880_v59 = vpop.f32.mrf.mxu0  ;;  %v4958_v45 = vld [vmem:[#allocation2 + $0xa88] sm:$0xf0]  ;;  %v4897_v14 = vor.u32 %v5658_v37, %v4894_v8  ;;  %v5260_v37 = vld [vmem:[#allocation6 + $0x60] sm:$0xf] }
 0x18b   :  { %3143 = vmatpush.bf16.msrb.mxu1 %v5009_v60  ;;  %v2905_v22 = vadd.f32 %v2904_v0, %v2892_v39  ;;  %v2917_v51 = vpop.f32.mrf.mxu3  ;;  %v4977_v60 = vor.u32 %v5678_v56, %v4974_v48  ;;  %v5022_v46 = vld [vmem:[#allocation2 + $0xb08] sm:$0xf0] }
 0x18c   :  { %3156 = vmatpush.bf16.msrb.mxu2 %v5073_v61  ;;  %v5041_v61 = vor.u32 %v5694_v20, %v5038_v50  ;;  %v5735_v8 = vld [vmem:[#allocation6 + $0x64] sm:$0xf0] }
 0x18d   :  { %3169 = vmatpush.bf16.msrb.mxu3 %v5137_v55  ;;  %v2918_v58 = vadd.f32 %v2917_v51, %v2905_v22  ;;  %v2893_v55 = vpop.f32.mrf.mxu1 }
 0x18e   :  { %3131 = vmatpush.bf16.msrb.mxu0 %v4937_v44  ;;  %v5094_v44 = vld [vmem:[#allocation2 + $0xb98] sm:$0xf0]  ;;  %v5269_v55 = vor.u32 %v5737_v38, %v5268_v62  ;;  %v5164_v62 = vld [vmem:[#allocation7 + $0x20] sm:$0xf]  ;;  %v5743_v38 = vld [vmem:[#allocation7 + $0x24] sm:$0xf0] }
 0x18f   :  { %3144 = vmatpush.bf16.msrb.mxu1 %v5001_v25  ;;  %v4969_v25 = vor.u32 %v5676_v63, %v4966_v41  ;;  %v5270_v41 = vld [vmem:[#allocation6 + $0x78] sm:$0xf0] }
 0x190   :  { %3157 = vmatpush.bf16.msrb.mxu2 %v5065_v6  ;;  %v5033_v6 = vor.u32 %v5692_v3, %v5030_v42  ;;  %v5196_v3 = vld [vmem:[#allocation7 + $0x60] sm:$0xf] }
 0x191   :  { %3170 = vmatpush.bf16.msrb.mxu3 %v5129_v23  ;;  %v5097_v23 = vor.u32 %v5708_v4, %v5094_v44  ;;  %v5751_v4 = vld [vmem:[#allocation7 + $0x64] sm:$0xf0]  ;;  %v5750_v44 = vld [vmem:[#allocation7 + $0x64] sm:$0xf] }
 0x192   :  { %3132 = vmatpush.bf16.msrb.mxu0 %v4929_v49  ;;  %v2906_v10 = vpop.f32.mrf.mxu2  ;;  %v5086_v49 = vld [vmem:[#allocation2 + $0xb88] sm:$0xf0] }
 0x193   :  { %3145 = vmatpush.bf16.msrb.mxu1 %v4993_v28  ;;  %v2919_v13 = vpop.f32.mrf.mxu3  ;;  %v4961_v28 = vor.u32 %v5674_v9, %v4958_v45  ;;  %v5089_v31 = vor.u32 %v5706_v30, %v5086_v49  ;;  %v5734_v9 = vld [vmem:[#allocation6 + $0x64] sm:$0xf]  ;;  %v5261_v10 = vor.u32 %v5735_v8, %v5260_v37  ;;  %v5156_v37 = vld [vmem:[#allocation7 + $0x10] sm:$0xf]  ;;  %v5741_v8 = vld [vmem:[#allocation7 + $0x14] sm:$0xf0] }
 0x194   :  { %3158 = vmatpush.bf16.msrb.mxu2 %v5057_v33  ;;  %v5025_v33 = vor.u32 %v5690_v29, %v5022_v46  ;;  %v5188_v29 = vld [vmem:[#allocation7 + $0x50] sm:$0xf]  ;;  %v5749_v46 = vld [vmem:[#allocation7 + $0x54] sm:$0xf0]  ;;  %v5748_v13 = vld [vmem:[#allocation7 + $0x54] sm:$0xf] }
 0x195   :  { %3171 = vmatpush.bf16.msrb.mxu3 %v5121_v24  ;;  %v5189_v49 = vor.u32 %v5749_v46, %v5188_v29  ;;  %v5725_v29 = vld [vmem:[#allocation6 + $0x14] sm:$0xf0] }
 0x196   :  { %3133 = vmatpush.bf16.msrb.mxu0 %v4921_v53 }
 0x197   :  { %3146 = vmatpush.bf16.msrb.mxu1 %v4985_v18 }
 0x198   :  { %3159 = vmatpush.bf16.msrb.mxu2 %v5049_v40 }
 0x199   :  { %3172 = vmatpush.bf16.msrb.mxu3 %v5113_v19 }
 0x19a   :  { %3134 = vmatpush.bf16.msrb.mxu0 %v4913_v57  ;;  %v5753_v57 = vld [vmem:[#allocation7 + $0x74] sm:$0xf0] }
 0x19b   :  { %3147 = vmatpush.bf16.msrb.mxu1 %v4977_v60  ;;  %v5205_v60 = vor.u32 %v5753_v57, %v5204_v54 }
 0x19c   :  { %3160 = vmatpush.bf16.msrb.mxu2 %v5041_v61  ;;  %v5206_v61 = vld [vmem:[#allocation7 + $0x78] sm:$0xf0] }
 0x19d   :  { %3173 = vmatpush.bf16.msrb.mxu3 %v5105_v2  ;;  %v5736_v2 = vld [vmem:[#allocation6 + $0x74] sm:$0xf] }
 0x19e   :  { %3135 = vmatpush.bf16.msrb.mxu0 %v4905_v5  ;;  %v5273_v42 = vor.u32 %v5736_v2, %v5270_v41  ;;  %v5198_v5 = vld [vmem:[#allocation7 + $0x68] sm:$0xf0]  ;;  %v5165_v2 = vor.u32 %v5743_v38, %v5164_v62 }
 0x19f   :  { %3148 = vmatpush.bf16.msrb.mxu1 %v4969_v25  ;;  %v5197_v25 = vor.u32 %v5751_v4, %v5196_v3  ;;  %v5166_v41 = vld [vmem:[#allocation7 + $0x28] sm:$0xf0]  ;;  %v5228_v3 = vld [vmem:[#allocation6 + $0x20] sm:$0xf] }
 0x1a0   :  { %3161 = vmatpush.bf16.msrb.mxu2 %v5033_v6  ;;  %v5201_v6 = vor.u32 %v5750_v44, %v5198_v5  ;;  %v5726_v5 = vld [vmem:[#allocation6 + $0x24] sm:$0xf] }
 0x1a1   :  { %3174 = vmatpush.bf16.msrb.mxu3 %v5097_v23  ;;  %v5262_v23 = vld [vmem:[#allocation6 + $0x68] sm:$0xf0] }
 0x1a2   :  { %3136 = vmatpush.bf16.msrb.mxu0 %v4897_v14  ;;  %v2930_v15 = vpop.f32.mrf.mxu0  ;;  %v5265_v45 = vor.u32 %v5734_v9, %v5262_v23  ;;  %v5190_v14 = vld [vmem:[#allocation7 + $0x58] sm:$0xf0]  ;;  %v5740_v9 = vld [vmem:[#allocation7 + $0x14] sm:$0xf] }
 0x1a3   :  { %3149 = vmatpush.bf16.msrb.mxu1 %v4961_v28  ;;  %v2931_v35 = vadd.f32 %v2930_v15, %v2918_v58  ;;  %v2943_v17 = vpop.f32.mrf.mxu1  ;;  %v5752_v58 = vld [vmem:[#allocation7 + $0x74] sm:$0xf]  ;;  %v5252_v28 = vld [vmem:[#allocation6 + $0x50] sm:$0xf]  ;;  %v5193_v15 = vor.u32 %v5748_v13, %v5190_v14  ;;  %v5158_v23 = vld [vmem:[#allocation7 + $0x18] sm:$0xf0] }
 0x1a4   :  { %3162 = vmatpush.bf16.msrb.mxu2 %v5025_v33  ;;  %v5209_v63 = vor.u32 %v5752_v58, %v5206_v61  ;;  %v5733_v33 = vld [vmem:[#allocation6 + $0x54] sm:$0xf0]  ;;  %v5728_v58 = vld [vmem:[#allocation6 + $0x34] sm:$0xf]  ;;  %v5161_v46 = vor.u32 %v5740_v9, %v5158_v23  ;;  %v5755_v23 = vld [vmem:[#allocation10 + $0x8] sm:$0xff] }
 0x1a5   :  { %3175 = vmatpush.bf16.msrb.mxu3 %v5089_v31  ;;  %3137 = vmatmul.bf16.vlgmr.msrb.gmra.mxu0 %v6176_v7  ;;  %v2944_v21 = vadd.f32 %v2943_v17, %v2931_v35  ;;  %v5253_v35 = vor.u32 %v5733_v33, %v5252_v28  ;;  %v5732_v17 = vld [vmem:[#allocation6 + $0x54] sm:$0xf] }
 0x1a6   :  { %3150 = vmatmul.bf16.vlgmr.msrb.gmra.mxu1 %v6180_v12  ;;  %3297 = vmatpush.bf16.msra.mxu0 %v5205_v60  ;;  %v5756_v9 = vld [vmem:[#allocation10 + $0x10] sm:$0xff] }
 0x1a7   :  { %3163 = vmatmul.bf16.vlgmr.msrb.gmra.mxu2 %v6178_v11  ;;  %3310 = vmatpush.bf16.msra.mxu1 %v5209_v63  ;;  %v5742_v63 = vld [vmem:[#allocation7 + $0x24] sm:$0xf] }
 0x1a8   :  { %3176 = vmatmul.bf16.vlgmr.msrb.gmra.mxu3 %v6182_v16  ;;  %3403 = vmatpush.bf16.msra.mxu2 %v5269_v55  ;;  %v5169_v4 = vor.u32 %v5742_v63, %v5166_v41 }
 0x1a9   :  { %3416 = vmatpush.bf16.msra.mxu3 %v5273_v42  ;;  %v5727_v42 = vld [vmem:[#allocation6 + $0x24] sm:$0xf0] }
 0x1aa   :  { %v2956_v24 = vpop.f32.mrf.mxu2  ;;  %v2932_v34 = vpop.f32.mrf.mxu0  ;;  %3298 = vmatpush.bf16.msra.mxu0 %v5197_v25  ;;  %v5229_v44 = vor.u32 %v5727_v42, %v5228_v3  ;;  %v5230_v25 = vld [vmem:[#allocation6 + $0x28] sm:$0xf0] }
 0x1ab   :  { %v2957_v26 = vadd.f32 %v2956_v24, %v2944_v21  ;;  %v2969_v27 = vpop.f32.mrf.mxu3  ;;  %v2945_v36 = vpop.f32.mrf.mxu1  ;;  %3311 = vmatpush.bf16.msra.mxu1 %v5201_v6  ;;  %v5254_v21 = vld [vmem:[#allocation6 + $0x58] sm:$0xf0]  ;;  %v5180_v24 = vld [vmem:[#allocation7 + $0x40] sm:$0xf]  ;;  %v5182_v34 = vld [vmem:[#allocation7 + $0x48] sm:$0xf0]  ;;  %v5233_v6 = vor.u32 %v5726_v5, %v5230_v25 }
 0x1ac   :  { %3404 = vmatpush.bf16.msra.mxu2 %v5261_v10  ;;  %v5244_v36 = vld [vmem:[#allocation6 + $0x40] sm:$0xf]  ;;  %v5157_v10 = vor.u32 %v5741_v8, %v5156_v37  ;;  %v5764_v8 = vld [vmem:[#allocation12 + $0x10] sm:$0xff] }
 0x1ad   :  { %v2970_v32 = vadd.f32 %v2969_v27, %v2957_v26  ;;  %3417 = vmatpush.bf16.msra.mxu3 %v5265_v45  ;;  %v5257_v26 = vor.u32 %v5732_v17, %v5254_v21  ;;  %v5747_v27 = vld [vmem:[#allocation7 + $0x44] sm:$0xf0]  ;;  %v5220_v45 = vld [vmem:[#allocation6 + $0x10] sm:$0xf]  ;;  %v5738_v21 = vld [vmem:[#allocation7 + $0x4] sm:$0xf] }
 0x1ae   :  { %3299 = vmatpush.bf16.msra.mxu0 %v5189_v49  ;;  %v5221_v13 = vor.u32 %v5725_v29, %v5220_v45  ;;  %v5222_v49 = vld [vmem:[#allocation6 + $0x18] sm:$0xf0]  ;;  %v5739_v17 = vld [vmem:[#allocation7 + $0x4] sm:$0xf0] }
 0x1af   :  { %3312 = vmatpush.bf16.msra.mxu1 %v5193_v15  ;;  %v5757_v37 = vld [vmem:[#allocation10 + $0x18] sm:$0xff]  ;;  %v5754_v45 = vld [vmem:[#allocation10] sm:$0xff] }
 0x1b0   :  { %3405 = vmatpush.bf16.msra.mxu2 %v5253_v35  ;;  %v5148_v35 = vld [vmem:[#allocation7] sm:$0xf] }
 0x1b1   :  { %3418 = vmatpush.bf16.msra.mxu3 %v5257_v26  ;;  %v5149_v26 = vor.u32 %v5739_v17, %v5148_v35 }
 0x1b2   :  { %v2958_v39 = vpop.f32.mrf.mxu2 }
 0x1b3   :  { %v2971_v53 = vpop.f32.mrf.mxu3  ;;  %v5731_v39 = vld [vmem:[#allocation6 + $0x44] sm:$0xf0] }
 0x1b4   :  { %v5730_v53 = vld [vmem:[#allocation6 + $0x44] sm:$0xf] }
 0x1c2   :  { %v2982_v18 = vpop.f32.mrf.mxu0 }
 0x1c3   :  { %v2983_v7 = vadd.f32 %v2982_v18, %v2970_v32  ;;  %v2995_v40 = vpop.f32.mrf.mxu1  ;;  %v5746_v32 = vld [vmem:[#allocation7 + $0x44] sm:$0xf]  ;;  %v5181_v18 = vor.u32 %v5747_v27, %v5180_v24  ;;  %v5150_v27 = vld [vmem:[#allocation7 + $0x8] sm:$0xf0] }
 0x1c5   :  { %v2996_v12 = vadd.f32 %v2995_v40, %v2983_v7  ;;  %v5246_v7 = vld [vmem:[#allocation6 + $0x48] sm:$0xf0]  ;;  %v5185_v40 = vor.u32 %v5746_v32, %v5182_v34  ;;  %3300 = vmatpush.bf16.msra.mxu0 %v5181_v18  ;;  %v5212_v32 = vld [vmem:[#allocation6] sm:$0xf]  ;;  %v5723_v34 = vld [vmem:[#allocation6 + $0x4] sm:$0xf0] }
 0x1c7   :  { %3313 = vmatpush.bf16.msra.mxu1 %v5185_v40  ;;  %v5769_v40 = vld [vmem:[#allocation12 + $0x38] sm:$0xff] }
 0x1ca   :  { %v3008_v43 = vpop.f32.mrf.mxu2  ;;  %v2984_v16 = vpop.f32.mrf.mxu0 }
 0x1cb   :  { %v3009_v11 = vadd.f32 %v3008_v43, %v2996_v12  ;;  %v3021_v47 = vpop.f32.mrf.mxu3  ;;  %v2997_v56 = vpop.f32.mrf.mxu1  ;;  %v5245_v12 = vor.u32 %v5731_v39, %v5244_v36  ;;  %v5249_v43 = vor.u32 %v5730_v53, %v5246_v7  ;;  %v5744_v16 = vld [vmem:[#allocation7 + $0x34] sm:$0xf]  ;;  %v5153_v36 = vor.u32 %v5738_v21, %v5150_v27  ;;  %v5722_v53 = vld [vmem:[#allocation6 + $0x4] sm:$0xf] }
 0x1cc   :  { %v5213_v39 = vor.u32 %v5723_v34, %v5212_v32 }
 0x1cd   :  { %v6227_v0 = vadd.f32 %v3021_v47, %v3009_v11  ;;  %3406 = vmatpush.bf16.msra.mxu2 %v5245_v12  ;;  %3419 = vmatpush.bf16.msra.mxu3 %v5249_v43  ;;  %v5172_v11 = vld [vmem:[#allocation7 + $0x30] sm:$0xf]  ;;  %v5745_v47 = vld [vmem:[#allocation7 + $0x34] sm:$0xf0] }
 0x1ce   :  { %v5173_v56 = vor.u32 %v5745_v47, %v5172_v11  ;;  %v5761_v12 = vld [vmem:[#allocation10 + $0x38] sm:$0xff]  ;;  %v5768_v47 = vld [vmem:[#allocation12 + $0x30] sm:$0xff] }
 0x1d0   :  { %3301 = vmatpush.bf16.msra.mxu0 %v5173_v56 }
 0x1d2   :  { %v3010_v19 = vpop.f32.mrf.mxu2 }
 0x1d3   :  { %v3023_v48 = vpop.f32.mrf.mxu3  ;;  %v5174_v19 = vld [vmem:[#allocation7 + $0x38] sm:$0xf0] }
 0x1d4   :  { %v5236_v48 = vld [vmem:[#allocation6 + $0x30] sm:$0xf]  ;;  %v5177_v54 = vor.u32 %v5744_v16, %v5174_v19  ;;  %3302 = vmatpush.bf16.msra.mxu0 %v5165_v2 }
 0x1d5   :  { %v5760_v16 = vld [vmem:[#allocation10 + $0x30] sm:$0xff] }
 0x1d6   :  { %3314 = vmatpush.bf16.msra.mxu1 %v5177_v54  ;;  %v5758_v54 = vld [vmem:[#allocation10 + $0x20] sm:$0xff] }
 0x1d8   :  { %3303 = vmatpush.bf16.msra.mxu0 %v5157_v10  ;;  %v5763_v10 = vld [vmem:[#allocation12 + $0x8] sm:$0xff] }
 0x1da   :  { %3315 = vmatpush.bf16.msra.mxu1 %v5169_v4 }
 0x1dc   :  { %3304 = vmatpush.bf16.msra.mxu0 %v5149_v26 }
 0x1de   :  { %3316 = vmatpush.bf16.msra.mxu1 %v5161_v46 }
 0x1e0   :  { %3521 = vmatpush.bf16.msrb.mxu0 %v5769_v40 }
 0x1e2   :  { %v6229_v20 = vpop.f32.mrf.mxu0  ;;  %3317 = vmatpush.bf16.msra.mxu1 %v5153_v36 }
 0x1e3   :  { %v6231_v50 = vpop.f32.mrf.mxu1  ;;  %v3035_v14 = vadd.f32 %v6229_v20, %v6227_v0  ;;  %v5214_v0 = vld [vmem:[#allocation6 + $0x8] sm:$0xf0] }
 0x1e4   :  { %v5217_v18 = vor.u32 %v5722_v53, %v5214_v0  ;;  %3522 = vmatpush.bf16.msrb.mxu0 %v5768_v47 }
 0x1e5   :  { %v3048_v20 = vadd.f32 %v6231_v50, %v3035_v14  ;;  %v5767_v50 = vld [vmem:[#allocation12 + $0x28] sm:$0xff] }
 0x1e6   :  { %3582 = vmatpush.bf16.msrb.mxu1 %v5761_v12 }
 0x1e8   :  { %3523 = vmatpush.bf16.msrb.mxu0 %v5767_v50 }
 0x1ea   :  { %v6233_v22 = vpop.f32.mrf.mxu2  ;;  %v3036_v52 = vpop.f32.mrf.mxu0  ;;  %3583 = vmatpush.bf16.msrb.mxu1 %v5760_v16 }
 0x1eb   :  { %v6235_v51 = vpop.f32.mrf.mxu3  ;;  %v3049_v59 = vpop.f32.mrf.mxu1  ;;  %v5729_v52 = vld [vmem:[#allocation6 + $0x34] sm:$0xf0]  ;;  %v3061_v7 = vadd.f32 %v6233_v22, %v3048_v20  ;;  %v5766_v22 = vld [vmem:[#allocation12 + $0x20] sm:$0xff] }
 0x1ec   :  { %v5237_v57 = vor.u32 %v5729_v52, %v5236_v48  ;;  %v5238_v59 = vld [vmem:[#allocation6 + $0x38] sm:$0xf0]  ;;  %v5759_v48 = vld [vmem:[#allocation10 + $0x28] sm:$0xff]  ;;  %3524 = vmatpush.bf16.msrb.mxu0 %v5766_v22 }
 0x1ed   :  { %v5241_v60 = vor.u32 %v5728_v58, %v5238_v59  ;;  %v3074_v56 = vadd.f32 %v6235_v51, %v3061_v7 }
 0x1ee   :  { %3407 = vmatpush.bf16.msra.mxu2 %v5237_v57  ;;  %3584 = vmatpush.bf16.msrb.mxu1 %v5759_v48 }
 0x1ef   :  { %3420 = vmatpush.bf16.msra.mxu3 %v5241_v60 }
 0x1f2   :  { %v3062_v30 = vpop.f32.mrf.mxu2  ;;  %3408 = vmatpush.bf16.msra.mxu2 %v5229_v44  ;;  %3585 = vmatpush.bf16.msrb.mxu1 %v5758_v54 }
 0x1f3   :  { %v3075_v31 = vpop.f32.mrf.mxu3  ;;  %3421 = vmatpush.bf16.msra.mxu3 %v5233_v6  ;;  %v5724_v30 = vld [vmem:[#allocation6 + $0x14] sm:$0xf]  ;;  %v5765_v6 = vld [vmem:[#allocation12 + $0x18] sm:$0xff] }
 0x1f4   :  { %v5225_v33 = vor.u32 %v5724_v30, %v5222_v49  ;;  %3525 = vmatpush.bf16.msrb.mxu0 %v5765_v6 }
 0x1f6   :  { %3409 = vmatpush.bf16.msra.mxu2 %v5221_v13  ;;  %3586 = vmatpush.bf16.msrb.mxu1 %v5757_v37  ;;  %v3429_v13 = vld [vmem:[#allocation9] sm:$0x3] }
 0x1f7   :  { %3422 = vmatpush.bf16.msra.mxu3 %v5225_v33  ;;  %v3431_v30 = vperm.slane %v3429_v13, 0  ;;  %v3432_v49 = vperm.slane %v3429_v13, 1 }
 0x1f8   :  { %3526 = vmatpush.bf16.msrb.mxu0 %v5764_v8 }
 0x1fa   :  { %3410 = vmatpush.bf16.msra.mxu2 %v5213_v39  ;;  %3587 = vmatpush.bf16.msrb.mxu1 %v5756_v9  ;;  %v5782_v39 = vld [vmem:[#allocation13] ss:$0 sm:$0xff] }
 0x1fb   :  { %3423 = vmatpush.bf16.msra.mxu3 %v5217_v18 }
 0x1fc   :  { %3527 = vmatpush.bf16.msrb.mxu0 %v5763_v10 }
 0x1fe   :  { %3588 = vmatpush.bf16.msrb.mxu1 %v5755_v23 }
 0x202   :  { %v6237_v61 = vpop.f32.mrf.mxu0  ;;  %3589 = vmatpush.bf16.msrb.mxu1 %v5754_v45 }
 0x203   :  { %v6239_v55 = vpop.f32.mrf.mxu1  ;;  %v3087_v19 = vadd.f32 %v6237_v61, %v3074_v56 }
 0x205   :  { %v3100_v52 = vadd.f32 %v6239_v55, %v3087_v19 }
 0x20a   :  { %v3112_v28 = vpop.f32.mrf.mxu2  ;;  %v3088_v15 = vpop.f32.mrf.mxu0 }
 0x20b   :  { %v3125_v31 = vpop.f32.mrf.mxu3  ;;  %v3101_v24 = vpop.f32.mrf.mxu1  ;;  %v3113_v57 = vadd.f32 %v3112_v28, %v3100_v52 }
 0x20d   :  { %v3126_v58 = vadd.f32 %v3125_v31, %v3113_v57 }
 0x212   :  { %v3114_v43 = vpop.f32.mrf.mxu2 }
 0x213   :  { %v3127_v11 = vpop.f32.mrf.mxu3 }
 0x222   :  { %v3138_v59 = vpop.f32.mrf.mxu0 }
 0x223   :  { %v3151_v60 = vpop.f32.mrf.mxu1  ;;  %v3139_v62 = vadd.f32 %v3138_v59, %v3126_v58 }
 0x225   :  { %v3152_v51 = vadd.f32 %v3151_v60, %v3139_v62 }
 0x22a   :  { %v3164_v38 = vpop.f32.mrf.mxu2  ;;  %v3140_v2 = vpop.f32.mrf.mxu0 }
 0x22b   :  { %v3165_v61 = vadd.f32 %v3164_v38, %v3152_v51  ;;  %v3177_v63 = vpop.f32.mrf.mxu3  ;;  %v3153_v41 = vpop.f32.mrf.mxu1 }
 0x22d   :  { %v3178_v3 = vadd.f32 %v3177_v63, %v3165_v61 }
 0x22f   :  { %v3181_v55 = vmax.f32 %v6217_v1, %v3178_v3  ;;  %v3183_v42 = vmin.f32 %v6217_v1, %v3178_v3  ;;  %v5762_v1 = vld [vmem:[#allocation12] sm:$0xff] }
 0x230   :  { %3528 = vmatpush.bf16.msrb.mxu0 %v5762_v1 }
 0x231   :  { %v3182_v4 = vpack.c.bf16 %v3181_v55, %v3181_v55  ;;  %v3184_v44 = vpack.c.bf16 %v3183_v42, %v3183_v42 }
 0x232   :  { %v3166_v5 = vpop.f32.mrf.mxu2 }
 0x233   :  { %v3179_v25 = vpop.f32.mrf.mxu3  ;;  %3305 = vmatmul.bf16.vlgmr.msra.gmra.mxu0 %v3184_v44  ;;  %3318 = vmatmul.bf16.vlgmr.msra.gmra.mxu1 %v3184_v44 }
 0x234   :  { %3411 = vmatmul.bf16.vlgmr.msra.gmra.mxu2 %v3182_v4  ;;  %3424 = vmatmul.bf16.vlgmr.msra.gmra.mxu3 %v3182_v4 }
 0x2b0   :  { %v3306_v29 = vpop.f32.mrf.mxu0  ;;  %v3319_v46 = vpop.f32.mrf.mxu1 }
 0x2b7   :  { %v3412_v14 = vpop.f32.mrf.mxu2  ;;  %v3425_v28 = vpop.f32.mrf.mxu3 }
 0x2b8   :  { %v3413_v33 = vadd.f32 %v3412_v14, %v3306_v29  ;;  %v3426_v31 = vadd.f32 %v3425_v28, %v3319_v46  ;;  %v3308_v15 = vpop.f32.mrf.mxu0  ;;  %v3321_v35 = vpop.f32.mrf.mxu1 }
 0x2ba   :  { %v3435_v17 = vadd.f32 %v3431_v30, %v3413_v33  ;;  %v3436_v21 = vadd.f32 %v3432_v49, %v3426_v31 }
 0x2bc   :  { %v3437_v24 = vmax.f32 %v3435_v17, %v3436_v21  ;;  %v3439_v26 = vmin.f32 %v3435_v17, %v3436_v21 }
 0x2be   :  { %v3438_v27 = vpack.c.bf16 %v3437_v24, %v3437_v24  ;;  %v3440_v32 = vpack.c.bf16 %v3439_v26, %v3439_v26 }
 0x2bf   :  { %v3414_v34 = vpop.f32.mrf.mxu2  ;;  %v3427_v36 = vpop.f32.mrf.mxu3 }
 0x2c0   :  { %3529 = vmatmul.bf16.vlgmr.msrb.gmra.mxu0 %v3440_v32  ;;  %3590 = vmatmul.bf16.vlgmr.msrb.gmra.mxu1 %v3438_v27 }
 0x33d   :  { %v3530_v53 = vpop.f32.mrf.mxu0  ;;  %v3591_v0 = vpop.f32.mrf.mxu1 }
 0x33e   :  { %v3592_v20 = vadd.f32 %v3591_v0, %v3530_v53 }
 0x340   :  { %v3599_v18 = vadd.f32 %v5782_v39, %v3592_v20 }
 0x342   :  { %3600 = vst [vmem:[%s6262_s9] sm:$0xff] %v3599_v18 }
 0x345   :  { %v3532_v7 = vpop.f32.mrf.mxu0  ;;  %v3593_v40 = vpop.f32.mrf.mxu1 }
 0x346   :  { %3605 = vsyncpa [#allocation3], 1 }
 0x347   :  { %3606 = vsyncpa [#allocation5], 1 }
 0x348   :  { %3607 = vsyncpa [#allocation8], 1 }
 0x349   :  { %3608 = vsyncpa [#allocation11], 1 }
 0x34a   :  { %3609 = vsyncpa [#allocation14], 1 }

</bundles_post_ra>
